<compile_context>
chip_gen: v7x
topology: tpu7x:2x2x1
jax: 0.10.0
libtpu: 0.0.40
codegen_flags: <defaults>
</compile_context>

<pallas_src>
import functools

import jax
import jax.numpy as jnp
from jax.experimental import pallas as pl
from jax.experimental.pallas import tpu as pltpu


# ------------------------------ fused kernel -------------------------------

def _bert_fused_kernel(
    x_ref, embed_w_ref, pos_ref,
    qkv_w_ref, qkv_b_ref, proj_w_ref,
    ln_vec_ref, fc1_b_ref, mlp_w_ref,
    lnf_ref, head_w_ref,
    out_ref,
    *, n_layer, n_head, n_embd, bt, seq, eps,
):
    """One grid step == one batch tile of `bt` sequences.

    x_ref: (bt, T, d_in_pad); out_ref: (bt, T, 128).  All matmuls run on the
    flattened (bt*T, n) token slab; attention is batched per sequence.
    """
    dh = n_embd // n_head
    M = bt * seq
    scale = 1.0 / float(dh) ** 0.5
    bf16 = jnp.bfloat16

    def layernorm(x, g, b):
        mu = jnp.mean(x, axis=-1, keepdims=True)
        var = jnp.mean(x * x, axis=-1, keepdims=True) - mu * mu   # one-pass var
        return (x - mu) * jax.lax.rsqrt(var + eps) * g + b

    def mm(a, w):        # (M, K) @ (K, N) -> f32 accumulate on the MXU
        return jax.lax.dot_general(a, w, (((1,), (0,)), ((), ())),
                                   preferred_element_type=jnp.float32)

    def mm_t(a, wt):     # (M, K) @ (N, K)^T -> f32 (weight stored transposed)
        return jax.lax.dot_general(a, wt, (((1,), (1,)), ((), ())),
                                   preferred_element_type=jnp.float32)

    # ---- token embedding + (pos_emb + embed bias), dropout = identity (eval) ----
    x_in = x_ref[...].reshape(M, -1).astype(bf16)
    x = mm(x_in, embed_w_ref[...]) + pos_ref[...]              # (M, n) f32

    # Layers unrolled in Python; all per-layer / per-head weights are indexed on
    # LEADING axes of the packed refs (free views, no lane extraction).
    for l in range(n_layer):
        ln1_g = ln_vec_ref[l * 6 + 0]
        ln1_b = ln_vec_ref[l * 6 + 1]
        proj_b = ln_vec_ref[l * 6 + 2]
        ln2_g = ln_vec_ref[l * 6 + 3]
        ln2_b = ln_vec_ref[l * 6 + 4]
        fc2_b = ln_vec_ref[l * 6 + 5]

        # -------- attention sub-block (pre-LN, non-causal, unmasked) --------
        xn = layernorm(x, ln1_g, ln1_b)
        xnb = xn.astype(bf16)                                   # cast once / layer

        acc = jnp.zeros((M, n_embd), jnp.float32)
        for h in range(n_head):
            qi = (l * 3 + 0) * n_head + h
            ki = (l * 3 + 1) * n_head + h
            vi = (l * 3 + 2) * n_head + h
            q = mm(xnb, qkv_w_ref[qi]) + qkv_b_ref[qi]          # (M, dh) f32
            k = mm(xnb, qkv_w_ref[ki]) + qkv_b_ref[ki]
            v = mm(xnb, qkv_w_ref[vi]) + qkv_b_ref[vi]
            q3 = q.reshape(bt, seq, dh)                         # leading-dim split
            k3 = k.reshape(bt, seq, dh)
            v3 = v.reshape(bt, seq, dh)
            s = jnp.einsum("btd,bsd->bts", q3, k3,
                           preferred_element_type=jnp.float32) * scale
            s = s - jnp.max(s, axis=-1, keepdims=True)
            p = jnp.exp(s)
            p = p / jnp.sum(p, axis=-1, keepdims=True)          # exact softmax
            o = jnp.einsum("bts,bsd->btd", p, v3,
                           preferred_element_type=jnp.float32)  # (bt, T, dh)
            # Head concat folded into the output projection:
            #   concat_h(o_h) @ Wp == sum_h o_h @ Wp[h*dh:(h+1)*dh, :]
            acc = acc + mm(o.reshape(M, dh).astype(bf16),
                           proj_w_ref[l * n_head + h])
        x = x + acc + proj_b

        # ----------------------- MLP sub-block (pre-LN) ----------------------
        xn2 = layernorm(x, ln2_g, ln2_b)
        hmid = mm(xn2.astype(bf16), mlp_w_ref[l * 2 + 0]) + fc1_b_ref[l]
        # TODO(synk): Block source unavailable; tanh-approx GELU used (if the
        # reference uses exact-erf nn.GELU(), logits differ at ~1e-3).
        hmid = jax.nn.gelu(hmid, approximate=True)
        x = x + mm_t(hmid.astype(bf16), mlp_w_ref[l * 2 + 1]) + fc2_b

    # ---------------- final LayerNorm + head (no bias), lane-dense store ----
    xf = layernorm(x, lnf_ref[0], lnf_ref[1])
    out = mm(xf.astype(bf16), head_w_ref[...])                  # (M, 128)
    out_ref[...] = out.reshape(bt, seq, -1).astype(out_ref.dtype)


# ----------------------------- model / wrapper ------------------------------

class Config:
    dataset_name = "promoter"      # -> cond_dim = 2, no cond embedding in forward
    vocab_size = 4
    pred_vocab_size = 4
    n_embd = 32
    n_head = 4
    n_layer = 2
    block_size = 16
    embd_pdrop = 0.1               # dropout is identity in eval mode


def init_params(key, cfg):
    """Init mirroring Bert._init_weights: Linear W ~ N(0, 0.02), bias=0,
    LayerNorm weight=1 / bias=0, pos_emb=0.  Per-layer weights are stacked on a
    leading layer axis; packing into kernel operands happens in bert_forward."""
    cond_dim = 2 if cfg.dataset_name == "promoter" else 1
    d_in = cond_dim + cfg.vocab_size
    n, h4, L = cfg.n_embd, 4 * cfg.n_embd, cfg.n_layer
    ks = jax.random.split(key, 6)

    def normal(k, shape):
        return 0.02 * jax.random.normal(k, shape, dtype=jnp.float32)

    return {
        "embed_w": normal(ks[0], (d_in, n)),
        "embed_b": jnp.zeros((n,), jnp.float32),
        "pos_emb": jnp.zeros((1, cfg.block_size, n), jnp.float32),
        "ln1_g": jnp.ones((L, n), jnp.float32),
        "ln1_b": jnp.zeros((L, n), jnp.float32),
        "qkv_w": normal(ks[1], (L, n, 3 * n)),
        "qkv_b": jnp.zeros((L, 3 * n), jnp.float32),
        "proj_w": normal(ks[2], (L, n, n)),
        "proj_b": jnp.zeros((L, n), jnp.float32),
        "ln2_g": jnp.ones((L, n), jnp.float32),
        "ln2_b": jnp.zeros((L, n), jnp.float32),
        "fc1_w": normal(ks[3], (L, n, h4)),
        "fc1_b": jnp.zeros((L, h4), jnp.float32),
        "fc2_w": normal(ks[4], (L, h4, n)),
        "fc2_b": jnp.zeros((L, n), jnp.float32),
        "lnf_g": jnp.ones((n,), jnp.float32),
        "lnf_b": jnp.zeros((n,), jnp.float32),
        "head_w": normal(ks[5], (n, cfg.pred_vocab_size)),
    }


def _pick_batch_tile(B, T):
    """Aim for ~256 token rows per grid step (fills MXU sublanes, amortizes the
    ~0.35 us/step pipeline overhead).  Keep >=2 grid steps only when each step
    still gets a reasonably full slab, so v7x can shard the 'parallel' batch
    axis over its 2 TensorCores; tiny batches fold into a single step (best for
    single-TC v5e/v6e)."""
    target_rows = 256
    bt = max(1, min(B, target_rows // max(T, 1)))
    steps = pl.cdiv(B, bt)
    if steps == 1 and B > 1 and B * T >= 2 * 128:
        steps = 2
        bt = pl.cdiv(B, steps)
    return bt, steps


def bert_forward(params, input_embeds, input_seqs, cfg):
    """Eval-mode forward. input_embeds: (B, T, cond_dim+vocab), input_seqs: (B, T)."""
    B, T, d_in = input_embeds.shape
    assert T <= cfg.block_size, "model block size exhausted"
    n, L, H = cfg.n_embd, cfg.n_layer, cfg.n_head
    h4, dh = 4 * n, n // H
    n_out = cfg.pred_vocab_size
    n_out_pad = ((n_out + 127) // 128) * 128        # lane-dense HBM write
    d_in_pad = ((d_in + 7) // 8) * 8                # tile-aligned input K dim

    bt, steps = _pick_batch_tile(B, T)
    B_pad = bt * steps
    bf16, f32 = jnp.bfloat16, jnp.float32

    # ---------------- pack / pad parameters into 11 kernel operands ----------
    x_p = jnp.pad(input_embeds.astype(f32),
                  ((0, B_pad - B), (0, 0), (0, d_in_pad - d_in)))
    embed_w = jnp.pad(params["embed_w"],
                      ((0, d_in_pad - d_in), (0, 0))).astype(bf16)
    pos = params["pos_emb"][0, :T, :]
    pos_bias = (jnp.tile(pos, (bt, 1)) + params["embed_b"]).astype(f32)  # (bt*T, n)

    # per-head Q/K/V weights with (layer, type, head) on a single leading axis
    qkv_w = (params["qkv_w"].reshape(L, n, 3, H, dh)
             .transpose(0, 2, 3, 1, 4).reshape(L * 3 * H, n, dh).astype(bf16))
    qkv_b = params["qkv_b"].reshape(L * 3 * H, 1, dh).astype(f32)
    proj_w = params["proj_w"].reshape(L * H, dh, n).astype(bf16)
    ln_vecs = jnp.stack([params["ln1_g"], params["ln1_b"], params["proj_b"],
                         params["ln2_g"], params["ln2_b"], params["fc2_b"]],
                        axis=1).reshape(L * 6, 1, n).astype(f32)
    fc1_b = params["fc1_b"].reshape(L, 1, h4).astype(f32)
    mlp_w = jnp.stack([params["fc1_w"], params["fc2_w"].transpose(0, 2, 1)],
                      axis=1).reshape(L * 2, n, h4).astype(bf16)
    lnf = jnp.stack([params["lnf_g"], params["lnf_b"]], axis=0).reshape(2, 1, n).astype(f32)
    head_w = jnp.pad(params["head_w"],
                     ((0, 0), (0, n_out_pad - n_out))).astype(bf16)

    kern = functools.partial(
        _bert_fused_kernel,
        n_layer=L, n_head=H, n_embd=n, bt=bt, seq=T, eps=1e-5,
    )

    def rep(shape):  # replicated (weight) block: same full block every grid step
        zero = (0,) * len(shape)
        return pl.BlockSpec(shape, lambda b, _z=zero: _z)

    in_specs = [
        pl.BlockSpec((bt, T, d_in_pad), lambda b: (b, 0, 0)),   # input_embeds tile
        rep((d_in_pad, n)),                                     # embed_w
        rep((bt * T, n)),                                       # pos_emb + embed_b
        rep((L * 3 * H, n, dh)),                                # per-head q/k/v W
        rep((L * 3 * H, 1, dh)),                                # per-head q/k/v b
        rep((L * H, dh, n)),                                    # per-head proj W
        rep((L * 6, 1, n)),                                     # LN g/b + proj_b + fc2_b
        rep((L, 1, h4)),                                        # fc1_b
        rep((L * 2, n, h4)),                                    # fc1_w, fc2_w^T
        rep((2, 1, n)),                                         # ln_f g/b
        rep((n, n_out_pad)),                                    # head (padded)
    ]

    logits_pad = pl.pallas_call(
        kern,
        out_shape=jax.ShapeDtypeStruct((B_pad, T, n_out_pad), jnp.float32),
        grid=(steps,),
        in_specs=in_specs,
        out_specs=pl.BlockSpec((bt, T, n_out_pad), lambda b: (b, 0, 0)),
        compiler_params=pltpu.CompilerParams(
            dimension_semantics=("parallel",)),   # batch tiles are independent
    )(x_p, embed_w, pos_bias, qkv_w, qkv_b, proj_w,
      ln_vecs, fc1_b, mlp_w, lnf, head_w)

    logits = logits_pad[:B, :, :n_out]
    # eval mode: label = input_seqs (generate_mask / dropout are training-only)
    return logits, input_seqs


# ----------------------------------- main -----------------------------------

if __name__ == "__main__":
    cfg = Config()
    key = jax.random.PRNGKey(0)
    k_param, k_embed, k_seq = jax.random.split(key, 3)

    params = init_params(k_param, cfg)

    B, T = 2, cfg.block_size
    cond_dim = 2  # promoter
    input_embeds = jax.random.normal(
        k_embed, (B, T, cond_dim + cfg.vocab_size), dtype=jnp.float32
    )
    input_seqs = jax.random.randint(k_seq, (B, T), 0, cfg.vocab_size, dtype=jnp.int32)

    fwd = jax.jit(functools.partial(bert_forward, cfg=cfg))
    logits, labels = fwd(params, input_embeds, input_seqs)
    jax.block_until_ready((logits, labels))

    assert logits.shape == (B, T, cfg.pred_vocab_size)
    assert labels.shape == (B, T)
    assert bool(jnp.all(jnp.isfinite(logits)))
    print("KERNEL_OK")
</pallas_src>

<mosaic_0001>
module attributes {stable_mosaic.version = 11 : i64} {
  func.func @_bert_fused_kernel(%arg0: i32, %arg1: memref<2x16x8xf32, #tpu.memory_space<vmem>>, %arg2: memref<8x32xbf16, #tpu.memory_space<vmem>>, %arg3: memref<32x32xf32, #tpu.memory_space<vmem>>, %arg4: memref<24x32x8xbf16, #tpu.memory_space<vmem>>, %arg5: memref<24x1x8xf32, #tpu.memory_space<vmem>>, %arg6: memref<8x8x32xbf16, #tpu.memory_space<vmem>>, %arg7: memref<12x1x32xf32, #tpu.memory_space<vmem>>, %arg8: memref<2x1x128xf32, #tpu.memory_space<vmem>>, %arg9: memref<4x32x128xbf16, #tpu.memory_space<vmem>>, %arg10: memref<2x1x32xf32, #tpu.memory_space<vmem>>, %arg11: memref<32x128xbf16, #tpu.memory_space<vmem>>, %arg12: memref<2x16x128xf32, #tpu.memory_space<vmem>>) attributes {dimension_semantics = [#tpu.dimension_semantics<parallel>], iteration_bounds = array<i64: 1>, scalar_prefetch = 0 : i64, scratch_operands = 0 : i64, tpu.core_type = #tpu.core_type<tc>, window_params = [{transform_indices = @transform_0, window_bounds = array<i64: 2, 16, 8>}, {pipeline_mode = #tpu.pipeline_mode<synchronous>, transform_indices = @transform_1, window_bounds = array<i64: 8, 32>}, {pipeline_mode = #tpu.pipeline_mode<synchronous>, transform_indices = @transform_2, window_bounds = array<i64: 32, 32>}, {pipeline_mode = #tpu.pipeline_mode<synchronous>, transform_indices = @transform_3, window_bounds = array<i64: 24, 32, 8>}, {pipeline_mode = #tpu.pipeline_mode<synchronous>, transform_indices = @transform_4, window_bounds = array<i64: 24, 1, 8>}, {pipeline_mode = #tpu.pipeline_mode<synchronous>, transform_indices = @transform_5, window_bounds = array<i64: 8, 8, 32>}, {pipeline_mode = #tpu.pipeline_mode<synchronous>, transform_indices = @transform_6, window_bounds = array<i64: 12, 1, 32>}, {pipeline_mode = #tpu.pipeline_mode<synchronous>, transform_indices = @transform_7, window_bounds = array<i64: 2, 1, 128>}, {pipeline_mode = #tpu.pipeline_mode<synchronous>, transform_indices = @transform_8, window_bounds = array<i64: 4, 32, 128>}, {pipeline_mode = #tpu.pipeline_mode<synchronous>, transform_indices = @transform_9, window_bounds = array<i64: 2, 1, 32>}, {pipeline_mode = #tpu.pipeline_mode<synchronous>, transform_indices = @transform_10, window_bounds = array<i64: 32, 128>}, {transform_indices = @transform_11, window_bounds = array<i64: 2, 16, 128>}]} {
    %c0 = arith.constant 0 : index
    %c0_0 = arith.constant 0 : index
    %c0_1 = arith.constant 0 : index
    %0 = vector.load %arg1[%c0, %c0_0, %c0_1] : memref<2x16x8xf32, #tpu.memory_space<vmem>>, vector<2x16x8xf32>
    %1 = vector.shape_cast %0 : vector<2x16x8xf32> to vector<32x8xf32>
    %2 = arith.truncf %1 : vector<32x8xf32> to vector<32x8xbf16>
    %c0_2 = arith.constant 0 : index
    %c0_3 = arith.constant 0 : index
    %3 = vector.load %arg2[%c0_2, %c0_3] : memref<8x32xbf16, #tpu.memory_space<vmem>>, vector<8x32xbf16>
    %cst = arith.constant dense<0.000000e+00> : vector<32x32xf32>
    %4 = tpu.matmul %2, %3, %cst {dimension_numbers = #tpu.dot_dimension_numbers<[1], [0], [0], [1], [0, 0, 1, 1], [], []>} : vector<32x8xbf16>, vector<8x32xbf16>, vector<32x32xf32> -> vector<32x32xf32>
    %c0_4 = arith.constant 0 : index
    %c0_5 = arith.constant 0 : index
    %5 = vector.load %arg3[%c0_4, %c0_5] : memref<32x32xf32, #tpu.memory_space<vmem>>, vector<32x32xf32>
    %6 = arith.addf %4, %5 : vector<32x32xf32>
    %c0_6 = arith.constant 0 : index
    %c0_7 = arith.constant 0 : index
    %c0_8 = arith.constant 0 : index
    %7 = vector.load %arg7[%c0_6, %c0_7, %c0_8] : memref<12x1x32xf32, #tpu.memory_space<vmem>>, vector<1x1x32xf32>
    %8 = vector.shape_cast %7 : vector<1x1x32xf32> to vector<1x32xf32>
    %c1 = arith.constant 1 : index
    %c0_9 = arith.constant 0 : index
    %c0_10 = arith.constant 0 : index
    %9 = vector.load %arg7[%c1, %c0_9, %c0_10] : memref<12x1x32xf32, #tpu.memory_space<vmem>>, vector<1x1x32xf32>
    %10 = vector.shape_cast %9 : vector<1x1x32xf32> to vector<1x32xf32>
    %c2 = arith.constant 2 : index
    %c0_11 = arith.constant 0 : index
    %c0_12 = arith.constant 0 : index
    %11 = vector.load %arg7[%c2, %c0_11, %c0_12] : memref<12x1x32xf32, #tpu.memory_space<vmem>>, vector<1x1x32xf32>
    %12 = vector.shape_cast %11 : vector<1x1x32xf32> to vector<1x32xf32>
    %c3 = arith.constant 3 : index
    %c0_13 = arith.constant 0 : index
    %c0_14 = arith.constant 0 : index
    %13 = vector.load %arg7[%c3, %c0_13, %c0_14] : memref<12x1x32xf32, #tpu.memory_space<vmem>>, vector<1x1x32xf32>
    %14 = vector.shape_cast %13 : vector<1x1x32xf32> to vector<1x32xf32>
    %c4 = arith.constant 4 : index
    %c0_15 = arith.constant 0 : index
    %c0_16 = arith.constant 0 : index
    %15 = vector.load %arg7[%c4, %c0_15, %c0_16] : memref<12x1x32xf32, #tpu.memory_space<vmem>>, vector<1x1x32xf32>
    %16 = vector.shape_cast %15 : vector<1x1x32xf32> to vector<1x32xf32>
    %c5 = arith.constant 5 : index
    %c0_17 = arith.constant 0 : index
    %c0_18 = arith.constant 0 : index
    %17 = vector.load %arg7[%c5, %c0_17, %c0_18] : memref<12x1x32xf32, #tpu.memory_space<vmem>>, vector<1x1x32xf32>
    %18 = vector.shape_cast %17 : vector<1x1x32xf32> to vector<1x32xf32>
    %cst_19 = arith.constant dense<0.000000e+00> : vector<32xf32>
    %19 = vector.multi_reduction <add>, %6, %cst_19 [1] : vector<32x32xf32> to vector<32xf32>
    %20 = vector.shape_cast %19 : vector<32xf32> to vector<32x1xf32>
    %cst_20 = arith.constant 3.200000e+01 : f32
    %21 = vector.broadcast %cst_20 : f32 to vector<32x1xf32>
    %22 = arith.divf %20, %21 : vector<32x1xf32>
    %23 = arith.mulf %6, %6 : vector<32x32xf32>
    %cst_21 = arith.constant dense<0.000000e+00> : vector<32xf32>
    %24 = vector.multi_reduction <add>, %23, %cst_21 [1] : vector<32x32xf32> to vector<32xf32>
    %25 = vector.shape_cast %24 : vector<32xf32> to vector<32x1xf32>
    %cst_22 = arith.constant 3.200000e+01 : f32
    %26 = vector.broadcast %cst_22 : f32 to vector<32x1xf32>
    %27 = arith.divf %25, %26 : vector<32x1xf32>
    %28 = arith.mulf %22, %22 : vector<32x1xf32>
    %29 = arith.subf %27, %28 : vector<32x1xf32>
    %30 = vector.broadcast %22 : vector<32x1xf32> to vector<32x32xf32>
    %31 = arith.subf %6, %30 : vector<32x32xf32>
    %cst_23 = arith.constant 9.99999974E-6 : f32
    %32 = vector.broadcast %cst_23 : f32 to vector<32x1xf32>
    %33 = arith.addf %29, %32 : vector<32x1xf32>
    %34 = math.rsqrt %33 : vector<32x1xf32>
    %35 = vector.broadcast %34 : vector<32x1xf32> to vector<32x32xf32>
    %36 = arith.mulf %31, %35 : vector<32x32xf32>
    %37 = vector.broadcast %8 : vector<1x32xf32> to vector<32x32xf32>
    %38 = arith.mulf %36, %37 : vector<32x32xf32>
    %39 = vector.broadcast %10 : vector<1x32xf32> to vector<32x32xf32>
    %40 = arith.addf %38, %39 : vector<32x32xf32>
    %41 = arith.truncf %40 : vector<32x32xf32> to vector<32x32xbf16>
    %cst_24 = arith.constant 0.000000e+00 : f32
    %42 = vector.broadcast %cst_24 : f32 to vector<32x32xf32>
    %c0_25 = arith.constant 0 : index
    %c0_26 = arith.constant 0 : index
    %c0_27 = arith.constant 0 : index
    %43 = vector.load %arg4[%c0_25, %c0_26, %c0_27] : memref<24x32x8xbf16, #tpu.memory_space<vmem>>, vector<1x32x8xbf16>
    %44 = vector.shape_cast %43 : vector<1x32x8xbf16> to vector<32x8xbf16>
    %cst_28 = arith.constant dense<0.000000e+00> : vector<32x8xf32>
    %45 = tpu.matmul %41, %44, %cst_28 {dimension_numbers = #tpu.dot_dimension_numbers<[1], [0], [0], [1], [0, 0, 1, 1], [], []>} : vector<32x32xbf16>, vector<32x8xbf16>, vector<32x8xf32> -> vector<32x8xf32>
    %c0_29 = arith.constant 0 : index
    %c0_30 = arith.constant 0 : index
    %c0_31 = arith.constant 0 : index
    %46 = vector.load %arg5[%c0_29, %c0_30, %c0_31] : memref<24x1x8xf32, #tpu.memory_space<vmem>>, vector<1x1x8xf32>
    %47 = vector.shape_cast %46 : vector<1x1x8xf32> to vector<1x8xf32>
    %48 = vector.broadcast %47 : vector<1x8xf32> to vector<32x8xf32>
    %49 = arith.addf %45, %48 : vector<32x8xf32>
    %c4_32 = arith.constant 4 : index
    %c0_33 = arith.constant 0 : index
    %c0_34 = arith.constant 0 : index
    %50 = vector.load %arg4[%c4_32, %c0_33, %c0_34] : memref<24x32x8xbf16, #tpu.memory_space<vmem>>, vector<1x32x8xbf16>
    %51 = vector.shape_cast %50 : vector<1x32x8xbf16> to vector<32x8xbf16>
    %cst_35 = arith.constant dense<0.000000e+00> : vector<32x8xf32>
    %52 = tpu.matmul %41, %51, %cst_35 {dimension_numbers = #tpu.dot_dimension_numbers<[1], [0], [0], [1], [0, 0, 1, 1], [], []>} : vector<32x32xbf16>, vector<32x8xbf16>, vector<32x8xf32> -> vector<32x8xf32>
    %c4_36 = arith.constant 4 : index
    %c0_37 = arith.constant 0 : index
    %c0_38 = arith.constant 0 : index
    %53 = vector.load %arg5[%c4_36, %c0_37, %c0_38] : memref<24x1x8xf32, #tpu.memory_space<vmem>>, vector<1x1x8xf32>
    %54 = vector.shape_cast %53 : vector<1x1x8xf32> to vector<1x8xf32>
    %55 = vector.broadcast %54 : vector<1x8xf32> to vector<32x8xf32>
    %56 = arith.addf %52, %55 : vector<32x8xf32>
    %c8 = arith.constant 8 : index
    %c0_39 = arith.constant 0 : index
    %c0_40 = arith.constant 0 : index
    %57 = vector.load %arg4[%c8, %c0_39, %c0_40] : memref<24x32x8xbf16, #tpu.memory_space<vmem>>, vector<1x32x8xbf16>
    %58 = vector.shape_cast %57 : vector<1x32x8xbf16> to vector<32x8xbf16>
    %cst_41 = arith.constant dense<0.000000e+00> : vector<32x8xf32>
    %59 = tpu.matmul %41, %58, %cst_41 {dimension_numbers = #tpu.dot_dimension_numbers<[1], [0], [0], [1], [0, 0, 1, 1], [], []>} : vector<32x32xbf16>, vector<32x8xbf16>, vector<32x8xf32> -> vector<32x8xf32>
    %c8_42 = arith.constant 8 : index
    %c0_43 = arith.constant 0 : index
    %c0_44 = arith.constant 0 : index
    %60 = vector.load %arg5[%c8_42, %c0_43, %c0_44] : memref<24x1x8xf32, #tpu.memory_space<vmem>>, vector<1x1x8xf32>
    %61 = vector.shape_cast %60 : vector<1x1x8xf32> to vector<1x8xf32>
    %62 = vector.broadcast %61 : vector<1x8xf32> to vector<32x8xf32>
    %63 = arith.addf %59, %62 : vector<32x8xf32>
    %64 = vector.shape_cast %49 : vector<32x8xf32> to vector<2x16x8xf32>
    %65 = vector.shape_cast %56 : vector<32x8xf32> to vector<2x16x8xf32>
    %66 = vector.shape_cast %63 : vector<32x8xf32> to vector<2x16x8xf32>
    "tpu.trace_start"() <{level = 10 : i32, message = "btd,bsd->bts"}> : () -> ()
    %cst_45 = arith.constant dense<0.000000e+00> : vector<2x16x16xf32>
    %67 = tpu.matmul %64, %65, %cst_45 {dimension_numbers = #tpu.dot_dimension_numbers<[2], [2], [1], [1], [0, 0, 0, 1, 1, 1], [0], [0]>} : vector<2x16x8xf32>, vector<2x16x8xf32>, vector<2x16x16xf32> -> vector<2x16x16xf32>
    "tpu.trace_stop"() : () -> ()
    %cst_46 = arith.constant 0.353553385 : f32
    %68 = vector.broadcast %cst_46 : f32 to vector<2x16x16xf32>
    %69 = arith.mulf %67, %68 : vector<2x16x16xf32>
    %cst_47 = arith.constant dense<0xFF800000> : vector<2x16xf32>
    %70 = vector.multi_reduction <maximumf>, %69, %cst_47 [2] : vector<2x16x16xf32> to vector<2x16xf32>
    %71 = vector.shape_cast %70 : vector<2x16xf32> to vector<2x16x1xf32>
    %72 = vector.broadcast %71 : vector<2x16x1xf32> to vector<2x16x16xf32>
    %73 = arith.subf %69, %72 : vector<2x16x16xf32>
    %74 = math.exp %73 : vector<2x16x16xf32>
    %cst_48 = arith.constant dense<0.000000e+00> : vector<2x16xf32>
    %75 = vector.multi_reduction <add>, %74, %cst_48 [2] : vector<2x16x16xf32> to vector<2x16xf32>
    %76 = vector.shape_cast %75 : vector<2x16xf32> to vector<2x16x1xf32>
    %77 = vector.broadcast %76 : vector<2x16x1xf32> to vector<2x16x16xf32>
    %78 = arith.divf %74, %77 : vector<2x16x16xf32>
    "tpu.trace_start"() <{level = 10 : i32, message = "bts,bsd->btd"}> : () -> ()
    %cst_49 = arith.constant dense<0.000000e+00> : vector<2x16x8xf32>
    %79 = tpu.matmul %78, %66, %cst_49 {dimension_numbers = #tpu.dot_dimension_numbers<[2], [1], [1], [2], [0, 0, 0, 1, 1, 2], [0], [0]>} : vector<2x16x16xf32>, vector<2x16x8xf32>, vector<2x16x8xf32> -> vector<2x16x8xf32>
    "tpu.trace_stop"() : () -> ()
    %80 = vector.shape_cast %79 : vector<2x16x8xf32> to vector<32x8xf32>
    %81 = arith.truncf %80 : vector<32x8xf32> to vector<32x8xbf16>
    %c0_50 = arith.constant 0 : index
    %c0_51 = arith.constant 0 : index
    %c0_52 = arith.constant 0 : index
    %82 = vector.load %arg6[%c0_50, %c0_51, %c0_52] : memref<8x8x32xbf16, #tpu.memory_space<vmem>>, vector<1x8x32xbf16>
    %83 = vector.shape_cast %82 : vector<1x8x32xbf16> to vector<8x32xbf16>
    %cst_53 = arith.constant dense<0.000000e+00> : vector<32x32xf32>
    %84 = tpu.matmul %81, %83, %cst_53 {dimension_numbers = #tpu.dot_dimension_numbers<[1], [0], [0], [1], [0, 0, 1, 1], [], []>} : vector<32x8xbf16>, vector<8x32xbf16>, vector<32x32xf32> -> vector<32x32xf32>
    %85 = arith.addf %42, %84 : vector<32x32xf32>
    %c1_54 = arith.constant 1 : index
    %c0_55 = arith.constant 0 : index
    %c0_56 = arith.constant 0 : index
    %86 = vector.load %arg4[%c1_54, %c0_55, %c0_56] : memref<24x32x8xbf16, #tpu.memory_space<vmem>>, vector<1x32x8xbf16>
    %87 = vector.shape_cast %86 : vector<1x32x8xbf16> to vector<32x8xbf16>
    %cst_57 = arith.constant dense<0.000000e+00> : vector<32x8xf32>
    %88 = tpu.matmul %41, %87, %cst_57 {dimension_numbers = #tpu.dot_dimension_numbers<[1], [0], [0], [1], [0, 0, 1, 1], [], []>} : vector<32x32xbf16>, vector<32x8xbf16>, vector<32x8xf32> -> vector<32x8xf32>
    %c1_58 = arith.constant 1 : index
    %c0_59 = arith.constant 0 : index
    %c0_60 = arith.constant 0 : index
    %89 = vector.load %arg5[%c1_58, %c0_59, %c0_60] : memref<24x1x8xf32, #tpu.memory_space<vmem>>, vector<1x1x8xf32>
    %90 = vector.shape_cast %89 : vector<1x1x8xf32> to vector<1x8xf32>
    %91 = vector.broadcast %90 : vector<1x8xf32> to vector<32x8xf32>
    %92 = arith.addf %88, %91 : vector<32x8xf32>
    %c5_61 = arith.constant 5 : index
    %c0_62 = arith.constant 0 : index
    %c0_63 = arith.constant 0 : index
    %93 = vector.load %arg4[%c5_61, %c0_62, %c0_63] : memref<24x32x8xbf16, #tpu.memory_space<vmem>>, vector<1x32x8xbf16>
    %94 = vector.shape_cast %93 : vector<1x32x8xbf16> to vector<32x8xbf16>
    %cst_64 = arith.constant dense<0.000000e+00> : vector<32x8xf32>
    %95 = tpu.matmul %41, %94, %cst_64 {dimension_numbers = #tpu.dot_dimension_numbers<[1], [0], [0], [1], [0, 0, 1, 1], [], []>} : vector<32x32xbf16>, vector<32x8xbf16>, vector<32x8xf32> -> vector<32x8xf32>
    %c5_65 = arith.constant 5 : index
    %c0_66 = arith.constant 0 : index
    %c0_67 = arith.constant 0 : index
    %96 = vector.load %arg5[%c5_65, %c0_66, %c0_67] : memref<24x1x8xf32, #tpu.memory_space<vmem>>, vector<1x1x8xf32>
    %97 = vector.shape_cast %96 : vector<1x1x8xf32> to vector<1x8xf32>
    %98 = vector.broadcast %97 : vector<1x8xf32> to vector<32x8xf32>
    %99 = arith.addf %95, %98 : vector<32x8xf32>
    %c9 = arith.constant 9 : index
    %c0_68 = arith.constant 0 : index
    %c0_69 = arith.constant 0 : index
    %100 = vector.load %arg4[%c9, %c0_68, %c0_69] : memref<24x32x8xbf16, #tpu.memory_space<vmem>>, vector<1x32x8xbf16>
    %101 = vector.shape_cast %100 : vector<1x32x8xbf16> to vector<32x8xbf16>
    %cst_70 = arith.constant dense<0.000000e+00> : vector<32x8xf32>
    %102 = tpu.matmul %41, %101, %cst_70 {dimension_numbers = #tpu.dot_dimension_numbers<[1], [0], [0], [1], [0, 0, 1, 1], [], []>} : vector<32x32xbf16>, vector<32x8xbf16>, vector<32x8xf32> -> vector<32x8xf32>
    %c9_71 = arith.constant 9 : index
    %c0_72 = arith.constant 0 : index
    %c0_73 = arith.constant 0 : index
    %103 = vector.load %arg5[%c9_71, %c0_72, %c0_73] : memref<24x1x8xf32, #tpu.memory_space<vmem>>, vector<1x1x8xf32>
    %104 = vector.shape_cast %103 : vector<1x1x8xf32> to vector<1x8xf32>
    %105 = vector.broadcast %104 : vector<1x8xf32> to vector<32x8xf32>
    %106 = arith.addf %102, %105 : vector<32x8xf32>
    %107 = vector.shape_cast %92 : vector<32x8xf32> to vector<2x16x8xf32>
    %108 = vector.shape_cast %99 : vector<32x8xf32> to vector<2x16x8xf32>
    %109 = vector.shape_cast %106 : vector<32x8xf32> to vector<2x16x8xf32>
    "tpu.trace_start"() <{level = 10 : i32, message = "btd,bsd->bts"}> : () -> ()
    %cst_74 = arith.constant dense<0.000000e+00> : vector<2x16x16xf32>
    %110 = tpu.matmul %107, %108, %cst_74 {dimension_numbers = #tpu.dot_dimension_numbers<[2], [2], [1], [1], [0, 0, 0, 1, 1, 1], [0], [0]>} : vector<2x16x8xf32>, vector<2x16x8xf32>, vector<2x16x16xf32> -> vector<2x16x16xf32>
    "tpu.trace_stop"() : () -> ()
    %cst_75 = arith.constant 0.353553385 : f32
    %111 = vector.broadcast %cst_75 : f32 to vector<2x16x16xf32>
    %112 = arith.mulf %110, %111 : vector<2x16x16xf32>
    %cst_76 = arith.constant dense<0xFF800000> : vector<2x16xf32>
    %113 = vector.multi_reduction <maximumf>, %112, %cst_76 [2] : vector<2x16x16xf32> to vector<2x16xf32>
    %114 = vector.shape_cast %113 : vector<2x16xf32> to vector<2x16x1xf32>
    %115 = vector.broadcast %114 : vector<2x16x1xf32> to vector<2x16x16xf32>
    %116 = arith.subf %112, %115 : vector<2x16x16xf32>
    %117 = math.exp %116 : vector<2x16x16xf32>
    %cst_77 = arith.constant dense<0.000000e+00> : vector<2x16xf32>
    %118 = vector.multi_reduction <add>, %117, %cst_77 [2] : vector<2x16x16xf32> to vector<2x16xf32>
    %119 = vector.shape_cast %118 : vector<2x16xf32> to vector<2x16x1xf32>
    %120 = vector.broadcast %119 : vector<2x16x1xf32> to vector<2x16x16xf32>
    %121 = arith.divf %117, %120 : vector<2x16x16xf32>
    "tpu.trace_start"() <{level = 10 : i32, message = "bts,bsd->btd"}> : () -> ()
    %cst_78 = arith.constant dense<0.000000e+00> : vector<2x16x8xf32>
    %122 = tpu.matmul %121, %109, %cst_78 {dimension_numbers = #tpu.dot_dimension_numbers<[2], [1], [1], [2], [0, 0, 0, 1, 1, 2], [0], [0]>} : vector<2x16x16xf32>, vector<2x16x8xf32>, vector<2x16x8xf32> -> vector<2x16x8xf32>
    "tpu.trace_stop"() : () -> ()
    %123 = vector.shape_cast %122 : vector<2x16x8xf32> to vector<32x8xf32>
    %124 = arith.truncf %123 : vector<32x8xf32> to vector<32x8xbf16>
    %c1_79 = arith.constant 1 : index
    %c0_80 = arith.constant 0 : index
    %c0_81 = arith.constant 0 : index
    %125 = vector.load %arg6[%c1_79, %c0_80, %c0_81] : memref<8x8x32xbf16, #tpu.memory_space<vmem>>, vector<1x8x32xbf16>
    %126 = vector.shape_cast %125 : vector<1x8x32xbf16> to vector<8x32xbf16>
    %cst_82 = arith.constant dense<0.000000e+00> : vector<32x32xf32>
    %127 = tpu.matmul %124, %126, %cst_82 {dimension_numbers = #tpu.dot_dimension_numbers<[1], [0], [0], [1], [0, 0, 1, 1], [], []>} : vector<32x8xbf16>, vector<8x32xbf16>, vector<32x32xf32> -> vector<32x32xf32>
    %128 = arith.addf %85, %127 : vector<32x32xf32>
    %c2_83 = arith.constant 2 : index
    %c0_84 = arith.constant 0 : index
    %c0_85 = arith.constant 0 : index
    %129 = vector.load %arg4[%c2_83, %c0_84, %c0_85] : memref<24x32x8xbf16, #tpu.memory_space<vmem>>, vector<1x32x8xbf16>
    %130 = vector.shape_cast %129 : vector<1x32x8xbf16> to vector<32x8xbf16>
    %cst_86 = arith.constant dense<0.000000e+00> : vector<32x8xf32>
    %131 = tpu.matmul %41, %130, %cst_86 {dimension_numbers = #tpu.dot_dimension_numbers<[1], [0], [0], [1], [0, 0, 1, 1], [], []>} : vector<32x32xbf16>, vector<32x8xbf16>, vector<32x8xf32> -> vector<32x8xf32>
    %c2_87 = arith.constant 2 : index
    %c0_88 = arith.constant 0 : index
    %c0_89 = arith.constant 0 : index
    %132 = vector.load %arg5[%c2_87, %c0_88, %c0_89] : memref<24x1x8xf32, #tpu.memory_space<vmem>>, vector<1x1x8xf32>
    %133 = vector.shape_cast %132 : vector<1x1x8xf32> to vector<1x8xf32>
    %134 = vector.broadcast %133 : vector<1x8xf32> to vector<32x8xf32>
    %135 = arith.addf %131, %134 : vector<32x8xf32>
    %c6 = arith.constant 6 : index
    %c0_90 = arith.constant 0 : index
    %c0_91 = arith.constant 0 : index
    %136 = vector.load %arg4[%c6, %c0_90, %c0_91] : memref<24x32x8xbf16, #tpu.memory_space<vmem>>, vector<1x32x8xbf16>
    %137 = vector.shape_cast %136 : vector<1x32x8xbf16> to vector<32x8xbf16>
    %cst_92 = arith.constant dense<0.000000e+00> : vector<32x8xf32>
    %138 = tpu.matmul %41, %137, %cst_92 {dimension_numbers = #tpu.dot_dimension_numbers<[1], [0], [0], [1], [0, 0, 1, 1], [], []>} : vector<32x32xbf16>, vector<32x8xbf16>, vector<32x8xf32> -> vector<32x8xf32>
    %c6_93 = arith.constant 6 : index
    %c0_94 = arith.constant 0 : index
    %c0_95 = arith.constant 0 : index
    %139 = vector.load %arg5[%c6_93, %c0_94, %c0_95] : memref<24x1x8xf32, #tpu.memory_space<vmem>>, vector<1x1x8xf32>
    %140 = vector.shape_cast %139 : vector<1x1x8xf32> to vector<1x8xf32>
    %141 = vector.broadcast %140 : vector<1x8xf32> to vector<32x8xf32>
    %142 = arith.addf %138, %141 : vector<32x8xf32>
    %c10 = arith.constant 10 : index
    %c0_96 = arith.constant 0 : index
    %c0_97 = arith.constant 0 : index
    %143 = vector.load %arg4[%c10, %c0_96, %c0_97] : memref<24x32x8xbf16, #tpu.memory_space<vmem>>, vector<1x32x8xbf16>
    %144 = vector.shape_cast %143 : vector<1x32x8xbf16> to vector<32x8xbf16>
    %cst_98 = arith.constant dense<0.000000e+00> : vector<32x8xf32>
    %145 = tpu.matmul %41, %144, %cst_98 {dimension_numbers = #tpu.dot_dimension_numbers<[1], [0], [0], [1], [0, 0, 1, 1], [], []>} : vector<32x32xbf16>, vector<32x8xbf16>, vector<32x8xf32> -> vector<32x8xf32>
    %c10_99 = arith.constant 10 : index
    %c0_100 = arith.constant 0 : index
    %c0_101 = arith.constant 0 : index
    %146 = vector.load %arg5[%c10_99, %c0_100, %c0_101] : memref<24x1x8xf32, #tpu.memory_space<vmem>>, vector<1x1x8xf32>
    %147 = vector.shape_cast %146 : vector<1x1x8xf32> to vector<1x8xf32>
    %148 = vector.broadcast %147 : vector<1x8xf32> to vector<32x8xf32>
    %149 = arith.addf %145, %148 : vector<32x8xf32>
    %150 = vector.shape_cast %135 : vector<32x8xf32> to vector<2x16x8xf32>
    %151 = vector.shape_cast %142 : vector<32x8xf32> to vector<2x16x8xf32>
    %152 = vector.shape_cast %149 : vector<32x8xf32> to vector<2x16x8xf32>
    "tpu.trace_start"() <{level = 10 : i32, message = "btd,bsd->bts"}> : () -> ()
    %cst_102 = arith.constant dense<0.000000e+00> : vector<2x16x16xf32>
    %153 = tpu.matmul %150, %151, %cst_102 {dimension_numbers = #tpu.dot_dimension_numbers<[2], [2], [1], [1], [0, 0, 0, 1, 1, 1], [0], [0]>} : vector<2x16x8xf32>, vector<2x16x8xf32>, vector<2x16x16xf32> -> vector<2x16x16xf32>
    "tpu.trace_stop"() : () -> ()
    %cst_103 = arith.constant 0.353553385 : f32
    %154 = vector.broadcast %cst_103 : f32 to vector<2x16x16xf32>
    %155 = arith.mulf %153, %154 : vector<2x16x16xf32>
    %cst_104 = arith.constant dense<0xFF800000> : vector<2x16xf32>
    %156 = vector.multi_reduction <maximumf>, %155, %cst_104 [2] : vector<2x16x16xf32> to vector<2x16xf32>
    %157 = vector.shape_cast %156 : vector<2x16xf32> to vector<2x16x1xf32>
    %158 = vector.broadcast %157 : vector<2x16x1xf32> to vector<2x16x16xf32>
    %159 = arith.subf %155, %158 : vector<2x16x16xf32>
    %160 = math.exp %159 : vector<2x16x16xf32>
    %cst_105 = arith.constant dense<0.000000e+00> : vector<2x16xf32>
    %161 = vector.multi_reduction <add>, %160, %cst_105 [2] : vector<2x16x16xf32> to vector<2x16xf32>
    %162 = vector.shape_cast %161 : vector<2x16xf32> to vector<2x16x1xf32>
    %163 = vector.broadcast %162 : vector<2x16x1xf32> to vector<2x16x16xf32>
    %164 = arith.divf %160, %163 : vector<2x16x16xf32>
    "tpu.trace_start"() <{level = 10 : i32, message = "bts,bsd->btd"}> : () -> ()
    %cst_106 = arith.constant dense<0.000000e+00> : vector<2x16x8xf32>
    %165 = tpu.matmul %164, %152, %cst_106 {dimension_numbers = #tpu.dot_dimension_numbers<[2], [1], [1], [2], [0, 0, 0, 1, 1, 2], [0], [0]>} : vector<2x16x16xf32>, vector<2x16x8xf32>, vector<2x16x8xf32> -> vector<2x16x8xf32>
    "tpu.trace_stop"() : () -> ()
    %166 = vector.shape_cast %165 : vector<2x16x8xf32> to vector<32x8xf32>
    %167 = arith.truncf %166 : vector<32x8xf32> to vector<32x8xbf16>
    %c2_107 = arith.constant 2 : index
    %c0_108 = arith.constant 0 : index
    %c0_109 = arith.constant 0 : index
    %168 = vector.load %arg6[%c2_107, %c0_108, %c0_109] : memref<8x8x32xbf16, #tpu.memory_space<vmem>>, vector<1x8x32xbf16>
    %169 = vector.shape_cast %168 : vector<1x8x32xbf16> to vector<8x32xbf16>
    %cst_110 = arith.constant dense<0.000000e+00> : vector<32x32xf32>
    %170 = tpu.matmul %167, %169, %cst_110 {dimension_numbers = #tpu.dot_dimension_numbers<[1], [0], [0], [1], [0, 0, 1, 1], [], []>} : vector<32x8xbf16>, vector<8x32xbf16>, vector<32x32xf32> -> vector<32x32xf32>
    %171 = arith.addf %128, %170 : vector<32x32xf32>
    %c3_111 = arith.constant 3 : index
    %c0_112 = arith.constant 0 : index
    %c0_113 = arith.constant 0 : index
    %172 = vector.load %arg4[%c3_111, %c0_112, %c0_113] : memref<24x32x8xbf16, #tpu.memory_space<vmem>>, vector<1x32x8xbf16>
    %173 = vector.shape_cast %172 : vector<1x32x8xbf16> to vector<32x8xbf16>
    %cst_114 = arith.constant dense<0.000000e+00> : vector<32x8xf32>
    %174 = tpu.matmul %41, %173, %cst_114 {dimension_numbers = #tpu.dot_dimension_numbers<[1], [0], [0], [1], [0, 0, 1, 1], [], []>} : vector<32x32xbf16>, vector<32x8xbf16>, vector<32x8xf32> -> vector<32x8xf32>
    %c3_115 = arith.constant 3 : index
    %c0_116 = arith.constant 0 : index
    %c0_117 = arith.constant 0 : index
    %175 = vector.load %arg5[%c3_115, %c0_116, %c0_117] : memref<24x1x8xf32, #tpu.memory_space<vmem>>, vector<1x1x8xf32>
    %176 = vector.shape_cast %175 : vector<1x1x8xf32> to vector<1x8xf32>
    %177 = vector.broadcast %176 : vector<1x8xf32> to vector<32x8xf32>
    %178 = arith.addf %174, %177 : vector<32x8xf32>
    %c7 = arith.constant 7 : index
    %c0_118 = arith.constant 0 : index
    %c0_119 = arith.constant 0 : index
    %179 = vector.load %arg4[%c7, %c0_118, %c0_119] : memref<24x32x8xbf16, #tpu.memory_space<vmem>>, vector<1x32x8xbf16>
    %180 = vector.shape_cast %179 : vector<1x32x8xbf16> to vector<32x8xbf16>
    %cst_120 = arith.constant dense<0.000000e+00> : vector<32x8xf32>
    %181 = tpu.matmul %41, %180, %cst_120 {dimension_numbers = #tpu.dot_dimension_numbers<[1], [0], [0], [1], [0, 0, 1, 1], [], []>} : vector<32x32xbf16>, vector<32x8xbf16>, vector<32x8xf32> -> vector<32x8xf32>
    %c7_121 = arith.constant 7 : index
    %c0_122 = arith.constant 0 : index
    %c0_123 = arith.constant 0 : index
    %182 = vector.load %arg5[%c7_121, %c0_122, %c0_123] : memref<24x1x8xf32, #tpu.memory_space<vmem>>, vector<1x1x8xf32>
    %183 = vector.shape_cast %182 : vector<1x1x8xf32> to vector<1x8xf32>
    %184 = vector.broadcast %183 : vector<1x8xf32> to vector<32x8xf32>
    %185 = arith.addf %181, %184 : vector<32x8xf32>
    %c11 = arith.constant 11 : index
    %c0_124 = arith.constant 0 : index
    %c0_125 = arith.constant 0 : index
    %186 = vector.load %arg4[%c11, %c0_124, %c0_125] : memref<24x32x8xbf16, #tpu.memory_space<vmem>>, vector<1x32x8xbf16>
    %187 = vector.shape_cast %186 : vector<1x32x8xbf16> to vector<32x8xbf16>
    %cst_126 = arith.constant dense<0.000000e+00> : vector<32x8xf32>
    %188 = tpu.matmul %41, %187, %cst_126 {dimension_numbers = #tpu.dot_dimension_numbers<[1], [0], [0], [1], [0, 0, 1, 1], [], []>} : vector<32x32xbf16>, vector<32x8xbf16>, vector<32x8xf32> -> vector<32x8xf32>
    %c11_127 = arith.constant 11 : index
    %c0_128 = arith.constant 0 : index
    %c0_129 = arith.constant 0 : index
    %189 = vector.load %arg5[%c11_127, %c0_128, %c0_129] : memref<24x1x8xf32, #tpu.memory_space<vmem>>, vector<1x1x8xf32>
    %190 = vector.shape_cast %189 : vector<1x1x8xf32> to vector<1x8xf32>
    %191 = vector.broadcast %190 : vector<1x8xf32> to vector<32x8xf32>
    %192 = arith.addf %188, %191 : vector<32x8xf32>
    %193 = vector.shape_cast %178 : vector<32x8xf32> to vector<2x16x8xf32>
    %194 = vector.shape_cast %185 : vector<32x8xf32> to vector<2x16x8xf32>
    %195 = vector.shape_cast %192 : vector<32x8xf32> to vector<2x16x8xf32>
    "tpu.trace_start"() <{level = 10 : i32, message = "btd,bsd->bts"}> : () -> ()
    %cst_130 = arith.constant dense<0.000000e+00> : vector<2x16x16xf32>
    %196 = tpu.matmul %193, %194, %cst_130 {dimension_numbers = #tpu.dot_dimension_numbers<[2], [2], [1], [1], [0, 0, 0, 1, 1, 1], [0], [0]>} : vector<2x16x8xf32>, vector<2x16x8xf32>, vector<2x16x16xf32> -> vector<2x16x16xf32>
    "tpu.trace_stop"() : () -> ()
    %cst_131 = arith.constant 0.353553385 : f32
    %197 = vector.broadcast %cst_131 : f32 to vector<2x16x16xf32>
    %198 = arith.mulf %196, %197 : vector<2x16x16xf32>
    %cst_132 = arith.constant dense<0xFF800000> : vector<2x16xf32>
    %199 = vector.multi_reduction <maximumf>, %198, %cst_132 [2] : vector<2x16x16xf32> to vector<2x16xf32>
    %200 = vector.shape_cast %199 : vector<2x16xf32> to vector<2x16x1xf32>
    %201 = vector.broadcast %200 : vector<2x16x1xf32> to vector<2x16x16xf32>
    %202 = arith.subf %198, %201 : vector<2x16x16xf32>
    %203 = math.exp %202 : vector<2x16x16xf32>
    %cst_133 = arith.constant dense<0.000000e+00> : vector<2x16xf32>
    %204 = vector.multi_reduction <add>, %203, %cst_133 [2] : vector<2x16x16xf32> to vector<2x16xf32>
    %205 = vector.shape_cast %204 : vector<2x16xf32> to vector<2x16x1xf32>
    %206 = vector.broadcast %205 : vector<2x16x1xf32> to vector<2x16x16xf32>
    %207 = arith.divf %203, %206 : vector<2x16x16xf32>
    "tpu.trace_start"() <{level = 10 : i32, message = "bts,bsd->btd"}> : () -> ()
    %cst_134 = arith.constant dense<0.000000e+00> : vector<2x16x8xf32>
    %208 = tpu.matmul %207, %195, %cst_134 {dimension_numbers = #tpu.dot_dimension_numbers<[2], [1], [1], [2], [0, 0, 0, 1, 1, 2], [0], [0]>} : vector<2x16x16xf32>, vector<2x16x8xf32>, vector<2x16x8xf32> -> vector<2x16x8xf32>
    "tpu.trace_stop"() : () -> ()
    %209 = vector.shape_cast %208 : vector<2x16x8xf32> to vector<32x8xf32>
    %210 = arith.truncf %209 : vector<32x8xf32> to vector<32x8xbf16>
    %c3_135 = arith.constant 3 : index
    %c0_136 = arith.constant 0 : index
    %c0_137 = arith.constant 0 : index
    %211 = vector.load %arg6[%c3_135, %c0_136, %c0_137] : memref<8x8x32xbf16, #tpu.memory_space<vmem>>, vector<1x8x32xbf16>
    %212 = vector.shape_cast %211 : vector<1x8x32xbf16> to vector<8x32xbf16>
    %cst_138 = arith.constant dense<0.000000e+00> : vector<32x32xf32>
    %213 = tpu.matmul %210, %212, %cst_138 {dimension_numbers = #tpu.dot_dimension_numbers<[1], [0], [0], [1], [0, 0, 1, 1], [], []>} : vector<32x8xbf16>, vector<8x32xbf16>, vector<32x32xf32> -> vector<32x32xf32>
    %214 = arith.addf %171, %213 : vector<32x32xf32>
    %215 = arith.addf %6, %214 : vector<32x32xf32>
    %216 = vector.broadcast %12 : vector<1x32xf32> to vector<32x32xf32>
    %217 = arith.addf %215, %216 : vector<32x32xf32>
    %cst_139 = arith.constant dense<0.000000e+00> : vector<32xf32>
    %218 = vector.multi_reduction <add>, %217, %cst_139 [1] : vector<32x32xf32> to vector<32xf32>
    %219 = vector.shape_cast %218 : vector<32xf32> to vector<32x1xf32>
    %cst_140 = arith.constant 3.200000e+01 : f32
    %220 = vector.broadcast %cst_140 : f32 to vector<32x1xf32>
    %221 = arith.divf %219, %220 : vector<32x1xf32>
    %222 = arith.mulf %217, %217 : vector<32x32xf32>
    %cst_141 = arith.constant dense<0.000000e+00> : vector<32xf32>
    %223 = vector.multi_reduction <add>, %222, %cst_141 [1] : vector<32x32xf32> to vector<32xf32>
    %224 = vector.shape_cast %223 : vector<32xf32> to vector<32x1xf32>
    %cst_142 = arith.constant 3.200000e+01 : f32
    %225 = vector.broadcast %cst_142 : f32 to vector<32x1xf32>
    %226 = arith.divf %224, %225 : vector<32x1xf32>
    %227 = arith.mulf %221, %221 : vector<32x1xf32>
    %228 = arith.subf %226, %227 : vector<32x1xf32>
    %229 = vector.broadcast %221 : vector<32x1xf32> to vector<32x32xf32>
    %230 = arith.subf %217, %229 : vector<32x32xf32>
    %cst_143 = arith.constant 9.99999974E-6 : f32
    %231 = vector.broadcast %cst_143 : f32 to vector<32x1xf32>
    %232 = arith.addf %228, %231 : vector<32x1xf32>
    %233 = math.rsqrt %232 : vector<32x1xf32>
    %234 = vector.broadcast %233 : vector<32x1xf32> to vector<32x32xf32>
    %235 = arith.mulf %230, %234 : vector<32x32xf32>
    %236 = vector.broadcast %14 : vector<1x32xf32> to vector<32x32xf32>
    %237 = arith.mulf %235, %236 : vector<32x32xf32>
    %238 = vector.broadcast %16 : vector<1x32xf32> to vector<32x32xf32>
    %239 = arith.addf %237, %238 : vector<32x32xf32>
    %240 = arith.truncf %239 : vector<32x32xf32> to vector<32x32xbf16>
    %c0_144 = arith.constant 0 : index
    %c0_145 = arith.constant 0 : index
    %c0_146 = arith.constant 0 : index
    %241 = vector.load %arg9[%c0_144, %c0_145, %c0_146] : memref<4x32x128xbf16, #tpu.memory_space<vmem>>, vector<1x32x128xbf16>
    %242 = vector.shape_cast %241 : vector<1x32x128xbf16> to vector<32x128xbf16>
    %cst_147 = arith.constant dense<0.000000e+00> : vector<32x128xf32>
    %243 = tpu.matmul %240, %242, %cst_147 {dimension_numbers = #tpu.dot_dimension_numbers<[1], [0], [0], [1], [0, 0, 1, 1], [], []>} : vector<32x32xbf16>, vector<32x128xbf16>, vector<32x128xf32> -> vector<32x128xf32>
    %c0_148 = arith.constant 0 : index
    %c0_149 = arith.constant 0 : index
    %c0_150 = arith.constant 0 : index
    %244 = vector.load %arg8[%c0_148, %c0_149, %c0_150] : memref<2x1x128xf32, #tpu.memory_space<vmem>>, vector<1x1x128xf32>
    %245 = vector.shape_cast %244 : vector<1x1x128xf32> to vector<1x128xf32>
    %246 = vector.broadcast %245 : vector<1x128xf32> to vector<32x128xf32>
    %247 = arith.addf %243, %246 : vector<32x128xf32>
    %248 = arith.mulf %247, %247 : vector<32x128xf32>
    %249 = arith.mulf %247, %248 : vector<32x128xf32>
    %cst_151 = arith.constant 4.471500e-02 : f32
    %250 = vector.broadcast %cst_151 : f32 to vector<32x128xf32>
    %251 = arith.mulf %250, %249 : vector<32x128xf32>
    %252 = arith.addf %247, %251 : vector<32x128xf32>
    %cst_152 = arith.constant 0.797884583 : f32
    %253 = vector.broadcast %cst_152 : f32 to vector<32x128xf32>
    %254 = arith.mulf %253, %252 : vector<32x128xf32>
    %255 = math.tanh %254 : vector<32x128xf32>
    %cst_153 = arith.constant 1.000000e+00 : f32
    %256 = vector.broadcast %cst_153 : f32 to vector<32x128xf32>
    %257 = arith.addf %256, %255 : vector<32x128xf32>
    %cst_154 = arith.constant 5.000000e-01 : f32
    %258 = vector.broadcast %cst_154 : f32 to vector<32x128xf32>
    %259 = arith.mulf %258, %257 : vector<32x128xf32>
    %260 = arith.mulf %247, %259 : vector<32x128xf32>
    %261 = arith.truncf %260 : vector<32x128xf32> to vector<32x128xbf16>
    %c1_155 = arith.constant 1 : index
    %c0_156 = arith.constant 0 : index
    %c0_157 = arith.constant 0 : index
    %262 = vector.load %arg9[%c1_155, %c0_156, %c0_157] : memref<4x32x128xbf16, #tpu.memory_space<vmem>>, vector<1x32x128xbf16>
    %263 = vector.shape_cast %262 : vector<1x32x128xbf16> to vector<32x128xbf16>
    %cst_158 = arith.constant dense<0.000000e+00> : vector<32x32xf32>
    %264 = tpu.matmul %261, %263, %cst_158 {dimension_numbers = #tpu.dot_dimension_numbers<[1], [1], [0], [0], [0, 0, 1, 0], [], []>} : vector<32x128xbf16>, vector<32x128xbf16>, vector<32x32xf32> -> vector<32x32xf32>
    %265 = arith.addf %217, %264 : vector<32x32xf32>
    %266 = vector.broadcast %18 : vector<1x32xf32> to vector<32x32xf32>
    %267 = arith.addf %265, %266 : vector<32x32xf32>
    %c6_159 = arith.constant 6 : index
    %c0_160 = arith.constant 0 : index
    %c0_161 = arith.constant 0 : index
    %268 = vector.load %arg7[%c6_159, %c0_160, %c0_161] : memref<12x1x32xf32, #tpu.memory_space<vmem>>, vector<1x1x32xf32>
    %269 = vector.shape_cast %268 : vector<1x1x32xf32> to vector<1x32xf32>
    %c7_162 = arith.constant 7 : index
    %c0_163 = arith.constant 0 : index
    %c0_164 = arith.constant 0 : index
    %270 = vector.load %arg7[%c7_162, %c0_163, %c0_164] : memref<12x1x32xf32, #tpu.memory_space<vmem>>, vector<1x1x32xf32>
    %271 = vector.shape_cast %270 : vector<1x1x32xf32> to vector<1x32xf32>
    %c8_165 = arith.constant 8 : index
    %c0_166 = arith.constant 0 : index
    %c0_167 = arith.constant 0 : index
    %272 = vector.load %arg7[%c8_165, %c0_166, %c0_167] : memref<12x1x32xf32, #tpu.memory_space<vmem>>, vector<1x1x32xf32>
    %273 = vector.shape_cast %272 : vector<1x1x32xf32> to vector<1x32xf32>
    %c9_168 = arith.constant 9 : index
    %c0_169 = arith.constant 0 : index
    %c0_170 = arith.constant 0 : index
    %274 = vector.load %arg7[%c9_168, %c0_169, %c0_170] : memref<12x1x32xf32, #tpu.memory_space<vmem>>, vector<1x1x32xf32>
    %275 = vector.shape_cast %274 : vector<1x1x32xf32> to vector<1x32xf32>
    %c10_171 = arith.constant 10 : index
    %c0_172 = arith.constant 0 : index
    %c0_173 = arith.constant 0 : index
    %276 = vector.load %arg7[%c10_171, %c0_172, %c0_173] : memref<12x1x32xf32, #tpu.memory_space<vmem>>, vector<1x1x32xf32>
    %277 = vector.shape_cast %276 : vector<1x1x32xf32> to vector<1x32xf32>
    %c11_174 = arith.constant 11 : index
    %c0_175 = arith.constant 0 : index
    %c0_176 = arith.constant 0 : index
    %278 = vector.load %arg7[%c11_174, %c0_175, %c0_176] : memref<12x1x32xf32, #tpu.memory_space<vmem>>, vector<1x1x32xf32>
    %279 = vector.shape_cast %278 : vector<1x1x32xf32> to vector<1x32xf32>
    %cst_177 = arith.constant dense<0.000000e+00> : vector<32xf32>
    %280 = vector.multi_reduction <add>, %267, %cst_177 [1] : vector<32x32xf32> to vector<32xf32>
    %281 = vector.shape_cast %280 : vector<32xf32> to vector<32x1xf32>
    %cst_178 = arith.constant 3.200000e+01 : f32
    %282 = vector.broadcast %cst_178 : f32 to vector<32x1xf32>
    %283 = arith.divf %281, %282 : vector<32x1xf32>
    %284 = arith.mulf %267, %267 : vector<32x32xf32>
    %cst_179 = arith.constant dense<0.000000e+00> : vector<32xf32>
    %285 = vector.multi_reduction <add>, %284, %cst_179 [1] : vector<32x32xf32> to vector<32xf32>
    %286 = vector.shape_cast %285 : vector<32xf32> to vector<32x1xf32>
    %cst_180 = arith.constant 3.200000e+01 : f32
    %287 = vector.broadcast %cst_180 : f32 to vector<32x1xf32>
    %288 = arith.divf %286, %287 : vector<32x1xf32>
    %289 = arith.mulf %283, %283 : vector<32x1xf32>
    %290 = arith.subf %288, %289 : vector<32x1xf32>
    %291 = vector.broadcast %283 : vector<32x1xf32> to vector<32x32xf32>
    %292 = arith.subf %267, %291 : vector<32x32xf32>
    %cst_181 = arith.constant 9.99999974E-6 : f32
    %293 = vector.broadcast %cst_181 : f32 to vector<32x1xf32>
    %294 = arith.addf %290, %293 : vector<32x1xf32>
    %295 = math.rsqrt %294 : vector<32x1xf32>
    %296 = vector.broadcast %295 : vector<32x1xf32> to vector<32x32xf32>
    %297 = arith.mulf %292, %296 : vector<32x32xf32>
    %298 = vector.broadcast %269 : vector<1x32xf32> to vector<32x32xf32>
    %299 = arith.mulf %297, %298 : vector<32x32xf32>
    %300 = vector.broadcast %271 : vector<1x32xf32> to vector<32x32xf32>
    %301 = arith.addf %299, %300 : vector<32x32xf32>
    %302 = arith.truncf %301 : vector<32x32xf32> to vector<32x32xbf16>
    %cst_182 = arith.constant 0.000000e+00 : f32
    %303 = vector.broadcast %cst_182 : f32 to vector<32x32xf32>
    %c12 = arith.constant 12 : index
    %c0_183 = arith.constant 0 : index
    %c0_184 = arith.constant 0 : index
    %304 = vector.load %arg4[%c12, %c0_183, %c0_184] : memref<24x32x8xbf16, #tpu.memory_space<vmem>>, vector<1x32x8xbf16>
    %305 = vector.shape_cast %304 : vector<1x32x8xbf16> to vector<32x8xbf16>
    %cst_185 = arith.constant dense<0.000000e+00> : vector<32x8xf32>
    %306 = tpu.matmul %302, %305, %cst_185 {dimension_numbers = #tpu.dot_dimension_numbers<[1], [0], [0], [1], [0, 0, 1, 1], [], []>} : vector<32x32xbf16>, vector<32x8xbf16>, vector<32x8xf32> -> vector<32x8xf32>
    %c12_186 = arith.constant 12 : index
    %c0_187 = arith.constant 0 : index
    %c0_188 = arith.constant 0 : index
    %307 = vector.load %arg5[%c12_186, %c0_187, %c0_188] : memref<24x1x8xf32, #tpu.memory_space<vmem>>, vector<1x1x8xf32>
    %308 = vector.shape_cast %307 : vector<1x1x8xf32> to vector<1x8xf32>
    %309 = vector.broadcast %308 : vector<1x8xf32> to vector<32x8xf32>
    %310 = arith.addf %306, %309 : vector<32x8xf32>
    %c16 = arith.constant 16 : index
    %c0_189 = arith.constant 0 : index
    %c0_190 = arith.constant 0 : index
    %311 = vector.load %arg4[%c16, %c0_189, %c0_190] : memref<24x32x8xbf16, #tpu.memory_space<vmem>>, vector<1x32x8xbf16>
    %312 = vector.shape_cast %311 : vector<1x32x8xbf16> to vector<32x8xbf16>
    %cst_191 = arith.constant dense<0.000000e+00> : vector<32x8xf32>
    %313 = tpu.matmul %302, %312, %cst_191 {dimension_numbers = #tpu.dot_dimension_numbers<[1], [0], [0], [1], [0, 0, 1, 1], [], []>} : vector<32x32xbf16>, vector<32x8xbf16>, vector<32x8xf32> -> vector<32x8xf32>
    %c16_192 = arith.constant 16 : index
    %c0_193 = arith.constant 0 : index
    %c0_194 = arith.constant 0 : index
    %314 = vector.load %arg5[%c16_192, %c0_193, %c0_194] : memref<24x1x8xf32, #tpu.memory_space<vmem>>, vector<1x1x8xf32>
    %315 = vector.shape_cast %314 : vector<1x1x8xf32> to vector<1x8xf32>
    %316 = vector.broadcast %315 : vector<1x8xf32> to vector<32x8xf32>
    %317 = arith.addf %313, %316 : vector<32x8xf32>
    %c20 = arith.constant 20 : index
    %c0_195 = arith.constant 0 : index
    %c0_196 = arith.constant 0 : index
    %318 = vector.load %arg4[%c20, %c0_195, %c0_196] : memref<24x32x8xbf16, #tpu.memory_space<vmem>>, vector<1x32x8xbf16>
    %319 = vector.shape_cast %318 : vector<1x32x8xbf16> to vector<32x8xbf16>
    %cst_197 = arith.constant dense<0.000000e+00> : vector<32x8xf32>
    %320 = tpu.matmul %302, %319, %cst_197 {dimension_numbers = #tpu.dot_dimension_numbers<[1], [0], [0], [1], [0, 0, 1, 1], [], []>} : vector<32x32xbf16>, vector<32x8xbf16>, vector<32x8xf32> -> vector<32x8xf32>
    %c20_198 = arith.constant 20 : index
    %c0_199 = arith.constant 0 : index
    %c0_200 = arith.constant 0 : index
    %321 = vector.load %arg5[%c20_198, %c0_199, %c0_200] : memref<24x1x8xf32, #tpu.memory_space<vmem>>, vector<1x1x8xf32>
    %322 = vector.shape_cast %321 : vector<1x1x8xf32> to vector<1x8xf32>
    %323 = vector.broadcast %322 : vector<1x8xf32> to vector<32x8xf32>
    %324 = arith.addf %320, %323 : vector<32x8xf32>
    %325 = vector.shape_cast %310 : vector<32x8xf32> to vector<2x16x8xf32>
    %326 = vector.shape_cast %317 : vector<32x8xf32> to vector<2x16x8xf32>
    %327 = vector.shape_cast %324 : vector<32x8xf32> to vector<2x16x8xf32>
    "tpu.trace_start"() <{level = 10 : i32, message = "btd,bsd->bts"}> : () -> ()
    %cst_201 = arith.constant dense<0.000000e+00> : vector<2x16x16xf32>
    %328 = tpu.matmul %325, %326, %cst_201 {dimension_numbers = #tpu.dot_dimension_numbers<[2], [2], [1], [1], [0, 0, 0, 1, 1, 1], [0], [0]>} : vector<2x16x8xf32>, vector<2x16x8xf32>, vector<2x16x16xf32> -> vector<2x16x16xf32>
    "tpu.trace_stop"() : () -> ()
    %cst_202 = arith.constant 0.353553385 : f32
    %329 = vector.broadcast %cst_202 : f32 to vector<2x16x16xf32>
    %330 = arith.mulf %328, %329 : vector<2x16x16xf32>
    %cst_203 = arith.constant dense<0xFF800000> : vector<2x16xf32>
    %331 = vector.multi_reduction <maximumf>, %330, %cst_203 [2] : vector<2x16x16xf32> to vector<2x16xf32>
    %332 = vector.shape_cast %331 : vector<2x16xf32> to vector<2x16x1xf32>
    %333 = vector.broadcast %332 : vector<2x16x1xf32> to vector<2x16x16xf32>
    %334 = arith.subf %330, %333 : vector<2x16x16xf32>
    %335 = math.exp %334 : vector<2x16x16xf32>
    %cst_204 = arith.constant dense<0.000000e+00> : vector<2x16xf32>
    %336 = vector.multi_reduction <add>, %335, %cst_204 [2] : vector<2x16x16xf32> to vector<2x16xf32>
    %337 = vector.shape_cast %336 : vector<2x16xf32> to vector<2x16x1xf32>
    %338 = vector.broadcast %337 : vector<2x16x1xf32> to vector<2x16x16xf32>
    %339 = arith.divf %335, %338 : vector<2x16x16xf32>
    "tpu.trace_start"() <{level = 10 : i32, message = "bts,bsd->btd"}> : () -> ()
    %cst_205 = arith.constant dense<0.000000e+00> : vector<2x16x8xf32>
    %340 = tpu.matmul %339, %327, %cst_205 {dimension_numbers = #tpu.dot_dimension_numbers<[2], [1], [1], [2], [0, 0, 0, 1, 1, 2], [0], [0]>} : vector<2x16x16xf32>, vector<2x16x8xf32>, vector<2x16x8xf32> -> vector<2x16x8xf32>
    "tpu.trace_stop"() : () -> ()
    %341 = vector.shape_cast %340 : vector<2x16x8xf32> to vector<32x8xf32>
    %342 = arith.truncf %341 : vector<32x8xf32> to vector<32x8xbf16>
    %c4_206 = arith.constant 4 : index
    %c0_207 = arith.constant 0 : index
    %c0_208 = arith.constant 0 : index
    %343 = vector.load %arg6[%c4_206, %c0_207, %c0_208] : memref<8x8x32xbf16, #tpu.memory_space<vmem>>, vector<1x8x32xbf16>
    %344 = vector.shape_cast %343 : vector<1x8x32xbf16> to vector<8x32xbf16>
    %cst_209 = arith.constant dense<0.000000e+00> : vector<32x32xf32>
    %345 = tpu.matmul %342, %344, %cst_209 {dimension_numbers = #tpu.dot_dimension_numbers<[1], [0], [0], [1], [0, 0, 1, 1], [], []>} : vector<32x8xbf16>, vector<8x32xbf16>, vector<32x32xf32> -> vector<32x32xf32>
    %346 = arith.addf %303, %345 : vector<32x32xf32>
    %c13 = arith.constant 13 : index
    %c0_210 = arith.constant 0 : index
    %c0_211 = arith.constant 0 : index
    %347 = vector.load %arg4[%c13, %c0_210, %c0_211] : memref<24x32x8xbf16, #tpu.memory_space<vmem>>, vector<1x32x8xbf16>
    %348 = vector.shape_cast %347 : vector<1x32x8xbf16> to vector<32x8xbf16>
    %cst_212 = arith.constant dense<0.000000e+00> : vector<32x8xf32>
    %349 = tpu.matmul %302, %348, %cst_212 {dimension_numbers = #tpu.dot_dimension_numbers<[1], [0], [0], [1], [0, 0, 1, 1], [], []>} : vector<32x32xbf16>, vector<32x8xbf16>, vector<32x8xf32> -> vector<32x8xf32>
    %c13_213 = arith.constant 13 : index
    %c0_214 = arith.constant 0 : index
    %c0_215 = arith.constant 0 : index
    %350 = vector.load %arg5[%c13_213, %c0_214, %c0_215] : memref<24x1x8xf32, #tpu.memory_space<vmem>>, vector<1x1x8xf32>
    %351 = vector.shape_cast %350 : vector<1x1x8xf32> to vector<1x8xf32>
    %352 = vector.broadcast %351 : vector<1x8xf32> to vector<32x8xf32>
    %353 = arith.addf %349, %352 : vector<32x8xf32>
    %c17 = arith.constant 17 : index
    %c0_216 = arith.constant 0 : index
    %c0_217 = arith.constant 0 : index
    %354 = vector.load %arg4[%c17, %c0_216, %c0_217] : memref<24x32x8xbf16, #tpu.memory_space<vmem>>, vector<1x32x8xbf16>
    %355 = vector.shape_cast %354 : vector<1x32x8xbf16> to vector<32x8xbf16>
    %cst_218 = arith.constant dense<0.000000e+00> : vector<32x8xf32>
    %356 = tpu.matmul %302, %355, %cst_218 {dimension_numbers = #tpu.dot_dimension_numbers<[1], [0], [0], [1], [0, 0, 1, 1], [], []>} : vector<32x32xbf16>, vector<32x8xbf16>, vector<32x8xf32> -> vector<32x8xf32>
    %c17_219 = arith.constant 17 : index
    %c0_220 = arith.constant 0 : index
    %c0_221 = arith.constant 0 : index
    %357 = vector.load %arg5[%c17_219, %c0_220, %c0_221] : memref<24x1x8xf32, #tpu.memory_space<vmem>>, vector<1x1x8xf32>
    %358 = vector.shape_cast %357 : vector<1x1x8xf32> to vector<1x8xf32>
    %359 = vector.broadcast %358 : vector<1x8xf32> to vector<32x8xf32>
    %360 = arith.addf %356, %359 : vector<32x8xf32>
    %c21 = arith.constant 21 : index
    %c0_222 = arith.constant 0 : index
    %c0_223 = arith.constant 0 : index
    %361 = vector.load %arg4[%c21, %c0_222, %c0_223] : memref<24x32x8xbf16, #tpu.memory_space<vmem>>, vector<1x32x8xbf16>
    %362 = vector.shape_cast %361 : vector<1x32x8xbf16> to vector<32x8xbf16>
    %cst_224 = arith.constant dense<0.000000e+00> : vector<32x8xf32>
    %363 = tpu.matmul %302, %362, %cst_224 {dimension_numbers = #tpu.dot_dimension_numbers<[1], [0], [0], [1], [0, 0, 1, 1], [], []>} : vector<32x32xbf16>, vector<32x8xbf16>, vector<32x8xf32> -> vector<32x8xf32>
    %c21_225 = arith.constant 21 : index
    %c0_226 = arith.constant 0 : index
    %c0_227 = arith.constant 0 : index
    %364 = vector.load %arg5[%c21_225, %c0_226, %c0_227] : memref<24x1x8xf32, #tpu.memory_space<vmem>>, vector<1x1x8xf32>
    %365 = vector.shape_cast %364 : vector<1x1x8xf32> to vector<1x8xf32>
    %366 = vector.broadcast %365 : vector<1x8xf32> to vector<32x8xf32>
    %367 = arith.addf %363, %366 : vector<32x8xf32>
    %368 = vector.shape_cast %353 : vector<32x8xf32> to vector<2x16x8xf32>
    %369 = vector.shape_cast %360 : vector<32x8xf32> to vector<2x16x8xf32>
    %370 = vector.shape_cast %367 : vector<32x8xf32> to vector<2x16x8xf32>
    "tpu.trace_start"() <{level = 10 : i32, message = "btd,bsd->bts"}> : () -> ()
    %cst_228 = arith.constant dense<0.000000e+00> : vector<2x16x16xf32>
    %371 = tpu.matmul %368, %369, %cst_228 {dimension_numbers = #tpu.dot_dimension_numbers<[2], [2], [1], [1], [0, 0, 0, 1, 1, 1], [0], [0]>} : vector<2x16x8xf32>, vector<2x16x8xf32>, vector<2x16x16xf32> -> vector<2x16x16xf32>
    "tpu.trace_stop"() : () -> ()
    %cst_229 = arith.constant 0.353553385 : f32
    %372 = vector.broadcast %cst_229 : f32 to vector<2x16x16xf32>
    %373 = arith.mulf %371, %372 : vector<2x16x16xf32>
    %cst_230 = arith.constant dense<0xFF800000> : vector<2x16xf32>
    %374 = vector.multi_reduction <maximumf>, %373, %cst_230 [2] : vector<2x16x16xf32> to vector<2x16xf32>
    %375 = vector.shape_cast %374 : vector<2x16xf32> to vector<2x16x1xf32>
    %376 = vector.broadcast %375 : vector<2x16x1xf32> to vector<2x16x16xf32>
    %377 = arith.subf %373, %376 : vector<2x16x16xf32>
    %378 = math.exp %377 : vector<2x16x16xf32>
    %cst_231 = arith.constant dense<0.000000e+00> : vector<2x16xf32>
    %379 = vector.multi_reduction <add>, %378, %cst_231 [2] : vector<2x16x16xf32> to vector<2x16xf32>
    %380 = vector.shape_cast %379 : vector<2x16xf32> to vector<2x16x1xf32>
    %381 = vector.broadcast %380 : vector<2x16x1xf32> to vector<2x16x16xf32>
    %382 = arith.divf %378, %381 : vector<2x16x16xf32>
    "tpu.trace_start"() <{level = 10 : i32, message = "bts,bsd->btd"}> : () -> ()
    %cst_232 = arith.constant dense<0.000000e+00> : vector<2x16x8xf32>
    %383 = tpu.matmul %382, %370, %cst_232 {dimension_numbers = #tpu.dot_dimension_numbers<[2], [1], [1], [2], [0, 0, 0, 1, 1, 2], [0], [0]>} : vector<2x16x16xf32>, vector<2x16x8xf32>, vector<2x16x8xf32> -> vector<2x16x8xf32>
    "tpu.trace_stop"() : () -> ()
    %384 = vector.shape_cast %383 : vector<2x16x8xf32> to vector<32x8xf32>
    %385 = arith.truncf %384 : vector<32x8xf32> to vector<32x8xbf16>
    %c5_233 = arith.constant 5 : index
    %c0_234 = arith.constant 0 : index
    %c0_235 = arith.constant 0 : index
    %386 = vector.load %arg6[%c5_233, %c0_234, %c0_235] : memref<8x8x32xbf16, #tpu.memory_space<vmem>>, vector<1x8x32xbf16>
    %387 = vector.shape_cast %386 : vector<1x8x32xbf16> to vector<8x32xbf16>
    %cst_236 = arith.constant dense<0.000000e+00> : vector<32x32xf32>
    %388 = tpu.matmul %385, %387, %cst_236 {dimension_numbers = #tpu.dot_dimension_numbers<[1], [0], [0], [1], [0, 0, 1, 1], [], []>} : vector<32x8xbf16>, vector<8x32xbf16>, vector<32x32xf32> -> vector<32x32xf32>
    %389 = arith.addf %346, %388 : vector<32x32xf32>
    %c14 = arith.constant 14 : index
    %c0_237 = arith.constant 0 : index
    %c0_238 = arith.constant 0 : index
    %390 = vector.load %arg4[%c14, %c0_237, %c0_238] : memref<24x32x8xbf16, #tpu.memory_space<vmem>>, vector<1x32x8xbf16>
    %391 = vector.shape_cast %390 : vector<1x32x8xbf16> to vector<32x8xbf16>
    %cst_239 = arith.constant dense<0.000000e+00> : vector<32x8xf32>
    %392 = tpu.matmul %302, %391, %cst_239 {dimension_numbers = #tpu.dot_dimension_numbers<[1], [0], [0], [1], [0, 0, 1, 1], [], []>} : vector<32x32xbf16>, vector<32x8xbf16>, vector<32x8xf32> -> vector<32x8xf32>
    %c14_240 = arith.constant 14 : index
    %c0_241 = arith.constant 0 : index
    %c0_242 = arith.constant 0 : index
    %393 = vector.load %arg5[%c14_240, %c0_241, %c0_242] : memref<24x1x8xf32, #tpu.memory_space<vmem>>, vector<1x1x8xf32>
    %394 = vector.shape_cast %393 : vector<1x1x8xf32> to vector<1x8xf32>
    %395 = vector.broadcast %394 : vector<1x8xf32> to vector<32x8xf32>
    %396 = arith.addf %392, %395 : vector<32x8xf32>
    %c18 = arith.constant 18 : index
    %c0_243 = arith.constant 0 : index
    %c0_244 = arith.constant 0 : index
    %397 = vector.load %arg4[%c18, %c0_243, %c0_244] : memref<24x32x8xbf16, #tpu.memory_space<vmem>>, vector<1x32x8xbf16>
    %398 = vector.shape_cast %397 : vector<1x32x8xbf16> to vector<32x8xbf16>
    %cst_245 = arith.constant dense<0.000000e+00> : vector<32x8xf32>
    %399 = tpu.matmul %302, %398, %cst_245 {dimension_numbers = #tpu.dot_dimension_numbers<[1], [0], [0], [1], [0, 0, 1, 1], [], []>} : vector<32x32xbf16>, vector<32x8xbf16>, vector<32x8xf32> -> vector<32x8xf32>
    %c18_246 = arith.constant 18 : index
    %c0_247 = arith.constant 0 : index
    %c0_248 = arith.constant 0 : index
    %400 = vector.load %arg5[%c18_246, %c0_247, %c0_248] : memref<24x1x8xf32, #tpu.memory_space<vmem>>, vector<1x1x8xf32>
    %401 = vector.shape_cast %400 : vector<1x1x8xf32> to vector<1x8xf32>
    %402 = vector.broadcast %401 : vector<1x8xf32> to vector<32x8xf32>
    %403 = arith.addf %399, %402 : vector<32x8xf32>
    %c22 = arith.constant 22 : index
    %c0_249 = arith.constant 0 : index
    %c0_250 = arith.constant 0 : index
    %404 = vector.load %arg4[%c22, %c0_249, %c0_250] : memref<24x32x8xbf16, #tpu.memory_space<vmem>>, vector<1x32x8xbf16>
    %405 = vector.shape_cast %404 : vector<1x32x8xbf16> to vector<32x8xbf16>
    %cst_251 = arith.constant dense<0.000000e+00> : vector<32x8xf32>
    %406 = tpu.matmul %302, %405, %cst_251 {dimension_numbers = #tpu.dot_dimension_numbers<[1], [0], [0], [1], [0, 0, 1, 1], [], []>} : vector<32x32xbf16>, vector<32x8xbf16>, vector<32x8xf32> -> vector<32x8xf32>
    %c22_252 = arith.constant 22 : index
    %c0_253 = arith.constant 0 : index
    %c0_254 = arith.constant 0 : index
    %407 = vector.load %arg5[%c22_252, %c0_253, %c0_254] : memref<24x1x8xf32, #tpu.memory_space<vmem>>, vector<1x1x8xf32>
    %408 = vector.shape_cast %407 : vector<1x1x8xf32> to vector<1x8xf32>
    %409 = vector.broadcast %408 : vector<1x8xf32> to vector<32x8xf32>
    %410 = arith.addf %406, %409 : vector<32x8xf32>
    %411 = vector.shape_cast %396 : vector<32x8xf32> to vector<2x16x8xf32>
    %412 = vector.shape_cast %403 : vector<32x8xf32> to vector<2x16x8xf32>
    %413 = vector.shape_cast %410 : vector<32x8xf32> to vector<2x16x8xf32>
    "tpu.trace_start"() <{level = 10 : i32, message = "btd,bsd->bts"}> : () -> ()
    %cst_255 = arith.constant dense<0.000000e+00> : vector<2x16x16xf32>
    %414 = tpu.matmul %411, %412, %cst_255 {dimension_numbers = #tpu.dot_dimension_numbers<[2], [2], [1], [1], [0, 0, 0, 1, 1, 1], [0], [0]>} : vector<2x16x8xf32>, vector<2x16x8xf32>, vector<2x16x16xf32> -> vector<2x16x16xf32>
    "tpu.trace_stop"() : () -> ()
    %cst_256 = arith.constant 0.353553385 : f32
    %415 = vector.broadcast %cst_256 : f32 to vector<2x16x16xf32>
    %416 = arith.mulf %414, %415 : vector<2x16x16xf32>
    %cst_257 = arith.constant dense<0xFF800000> : vector<2x16xf32>
    %417 = vector.multi_reduction <maximumf>, %416, %cst_257 [2] : vector<2x16x16xf32> to vector<2x16xf32>
    %418 = vector.shape_cast %417 : vector<2x16xf32> to vector<2x16x1xf32>
    %419 = vector.broadcast %418 : vector<2x16x1xf32> to vector<2x16x16xf32>
    %420 = arith.subf %416, %419 : vector<2x16x16xf32>
    %421 = math.exp %420 : vector<2x16x16xf32>
    %cst_258 = arith.constant dense<0.000000e+00> : vector<2x16xf32>
    %422 = vector.multi_reduction <add>, %421, %cst_258 [2] : vector<2x16x16xf32> to vector<2x16xf32>
    %423 = vector.shape_cast %422 : vector<2x16xf32> to vector<2x16x1xf32>
    %424 = vector.broadcast %423 : vector<2x16x1xf32> to vector<2x16x16xf32>
    %425 = arith.divf %421, %424 : vector<2x16x16xf32>
    "tpu.trace_start"() <{level = 10 : i32, message = "bts,bsd->btd"}> : () -> ()
    %cst_259 = arith.constant dense<0.000000e+00> : vector<2x16x8xf32>
    %426 = tpu.matmul %425, %413, %cst_259 {dimension_numbers = #tpu.dot_dimension_numbers<[2], [1], [1], [2], [0, 0, 0, 1, 1, 2], [0], [0]>} : vector<2x16x16xf32>, vector<2x16x8xf32>, vector<2x16x8xf32> -> vector<2x16x8xf32>
    "tpu.trace_stop"() : () -> ()
    %427 = vector.shape_cast %426 : vector<2x16x8xf32> to vector<32x8xf32>
    %428 = arith.truncf %427 : vector<32x8xf32> to vector<32x8xbf16>
    %c6_260 = arith.constant 6 : index
    %c0_261 = arith.constant 0 : index
    %c0_262 = arith.constant 0 : index
    %429 = vector.load %arg6[%c6_260, %c0_261, %c0_262] : memref<8x8x32xbf16, #tpu.memory_space<vmem>>, vector<1x8x32xbf16>
    %430 = vector.shape_cast %429 : vector<1x8x32xbf16> to vector<8x32xbf16>
    %cst_263 = arith.constant dense<0.000000e+00> : vector<32x32xf32>
    %431 = tpu.matmul %428, %430, %cst_263 {dimension_numbers = #tpu.dot_dimension_numbers<[1], [0], [0], [1], [0, 0, 1, 1], [], []>} : vector<32x8xbf16>, vector<8x32xbf16>, vector<32x32xf32> -> vector<32x32xf32>
    %432 = arith.addf %389, %431 : vector<32x32xf32>
    %c15 = arith.constant 15 : index
    %c0_264 = arith.constant 0 : index
    %c0_265 = arith.constant 0 : index
    %433 = vector.load %arg4[%c15, %c0_264, %c0_265] : memref<24x32x8xbf16, #tpu.memory_space<vmem>>, vector<1x32x8xbf16>
    %434 = vector.shape_cast %433 : vector<1x32x8xbf16> to vector<32x8xbf16>
    %cst_266 = arith.constant dense<0.000000e+00> : vector<32x8xf32>
    %435 = tpu.matmul %302, %434, %cst_266 {dimension_numbers = #tpu.dot_dimension_numbers<[1], [0], [0], [1], [0, 0, 1, 1], [], []>} : vector<32x32xbf16>, vector<32x8xbf16>, vector<32x8xf32> -> vector<32x8xf32>
    %c15_267 = arith.constant 15 : index
    %c0_268 = arith.constant 0 : index
    %c0_269 = arith.constant 0 : index
    %436 = vector.load %arg5[%c15_267, %c0_268, %c0_269] : memref<24x1x8xf32, #tpu.memory_space<vmem>>, vector<1x1x8xf32>
    %437 = vector.shape_cast %436 : vector<1x1x8xf32> to vector<1x8xf32>
    %438 = vector.broadcast %437 : vector<1x8xf32> to vector<32x8xf32>
    %439 = arith.addf %435, %438 : vector<32x8xf32>
    %c19 = arith.constant 19 : index
    %c0_270 = arith.constant 0 : index
    %c0_271 = arith.constant 0 : index
    %440 = vector.load %arg4[%c19, %c0_270, %c0_271] : memref<24x32x8xbf16, #tpu.memory_space<vmem>>, vector<1x32x8xbf16>
    %441 = vector.shape_cast %440 : vector<1x32x8xbf16> to vector<32x8xbf16>
    %cst_272 = arith.constant dense<0.000000e+00> : vector<32x8xf32>
    %442 = tpu.matmul %302, %441, %cst_272 {dimension_numbers = #tpu.dot_dimension_numbers<[1], [0], [0], [1], [0, 0, 1, 1], [], []>} : vector<32x32xbf16>, vector<32x8xbf16>, vector<32x8xf32> -> vector<32x8xf32>
    %c19_273 = arith.constant 19 : index
    %c0_274 = arith.constant 0 : index
    %c0_275 = arith.constant 0 : index
    %443 = vector.load %arg5[%c19_273, %c0_274, %c0_275] : memref<24x1x8xf32, #tpu.memory_space<vmem>>, vector<1x1x8xf32>
    %444 = vector.shape_cast %443 : vector<1x1x8xf32> to vector<1x8xf32>
    %445 = vector.broadcast %444 : vector<1x8xf32> to vector<32x8xf32>
    %446 = arith.addf %442, %445 : vector<32x8xf32>
    %c23 = arith.constant 23 : index
    %c0_276 = arith.constant 0 : index
    %c0_277 = arith.constant 0 : index
    %447 = vector.load %arg4[%c23, %c0_276, %c0_277] : memref<24x32x8xbf16, #tpu.memory_space<vmem>>, vector<1x32x8xbf16>
    %448 = vector.shape_cast %447 : vector<1x32x8xbf16> to vector<32x8xbf16>
    %cst_278 = arith.constant dense<0.000000e+00> : vector<32x8xf32>
    %449 = tpu.matmul %302, %448, %cst_278 {dimension_numbers = #tpu.dot_dimension_numbers<[1], [0], [0], [1], [0, 0, 1, 1], [], []>} : vector<32x32xbf16>, vector<32x8xbf16>, vector<32x8xf32> -> vector<32x8xf32>
    %c23_279 = arith.constant 23 : index
    %c0_280 = arith.constant 0 : index
    %c0_281 = arith.constant 0 : index
    %450 = vector.load %arg5[%c23_279, %c0_280, %c0_281] : memref<24x1x8xf32, #tpu.memory_space<vmem>>, vector<1x1x8xf32>
    %451 = vector.shape_cast %450 : vector<1x1x8xf32> to vector<1x8xf32>
    %452 = vector.broadcast %451 : vector<1x8xf32> to vector<32x8xf32>
    %453 = arith.addf %449, %452 : vector<32x8xf32>
    %454 = vector.shape_cast %439 : vector<32x8xf32> to vector<2x16x8xf32>
    %455 = vector.shape_cast %446 : vector<32x8xf32> to vector<2x16x8xf32>
    %456 = vector.shape_cast %453 : vector<32x8xf32> to vector<2x16x8xf32>
    "tpu.trace_start"() <{level = 10 : i32, message = "btd,bsd->bts"}> : () -> ()
    %cst_282 = arith.constant dense<0.000000e+00> : vector<2x16x16xf32>
    %457 = tpu.matmul %454, %455, %cst_282 {dimension_numbers = #tpu.dot_dimension_numbers<[2], [2], [1], [1], [0, 0, 0, 1, 1, 1], [0], [0]>} : vector<2x16x8xf32>, vector<2x16x8xf32>, vector<2x16x16xf32> -> vector<2x16x16xf32>
    "tpu.trace_stop"() : () -> ()
    %cst_283 = arith.constant 0.353553385 : f32
    %458 = vector.broadcast %cst_283 : f32 to vector<2x16x16xf32>
    %459 = arith.mulf %457, %458 : vector<2x16x16xf32>
    %cst_284 = arith.constant dense<0xFF800000> : vector<2x16xf32>
    %460 = vector.multi_reduction <maximumf>, %459, %cst_284 [2] : vector<2x16x16xf32> to vector<2x16xf32>
    %461 = vector.shape_cast %460 : vector<2x16xf32> to vector<2x16x1xf32>
    %462 = vector.broadcast %461 : vector<2x16x1xf32> to vector<2x16x16xf32>
    %463 = arith.subf %459, %462 : vector<2x16x16xf32>
    %464 = math.exp %463 : vector<2x16x16xf32>
    %cst_285 = arith.constant dense<0.000000e+00> : vector<2x16xf32>
    %465 = vector.multi_reduction <add>, %464, %cst_285 [2] : vector<2x16x16xf32> to vector<2x16xf32>
    %466 = vector.shape_cast %465 : vector<2x16xf32> to vector<2x16x1xf32>
    %467 = vector.broadcast %466 : vector<2x16x1xf32> to vector<2x16x16xf32>
    %468 = arith.divf %464, %467 : vector<2x16x16xf32>
    "tpu.trace_start"() <{level = 10 : i32, message = "bts,bsd->btd"}> : () -> ()
    %cst_286 = arith.constant dense<0.000000e+00> : vector<2x16x8xf32>
    %469 = tpu.matmul %468, %456, %cst_286 {dimension_numbers = #tpu.dot_dimension_numbers<[2], [1], [1], [2], [0, 0, 0, 1, 1, 2], [0], [0]>} : vector<2x16x16xf32>, vector<2x16x8xf32>, vector<2x16x8xf32> -> vector<2x16x8xf32>
    "tpu.trace_stop"() : () -> ()
    %470 = vector.shape_cast %469 : vector<2x16x8xf32> to vector<32x8xf32>
    %471 = arith.truncf %470 : vector<32x8xf32> to vector<32x8xbf16>
    %c7_287 = arith.constant 7 : index
    %c0_288 = arith.constant 0 : index
    %c0_289 = arith.constant 0 : index
    %472 = vector.load %arg6[%c7_287, %c0_288, %c0_289] : memref<8x8x32xbf16, #tpu.memory_space<vmem>>, vector<1x8x32xbf16>
    %473 = vector.shape_cast %472 : vector<1x8x32xbf16> to vector<8x32xbf16>
    %cst_290 = arith.constant dense<0.000000e+00> : vector<32x32xf32>
    %474 = tpu.matmul %471, %473, %cst_290 {dimension_numbers = #tpu.dot_dimension_numbers<[1], [0], [0], [1], [0, 0, 1, 1], [], []>} : vector<32x8xbf16>, vector<8x32xbf16>, vector<32x32xf32> -> vector<32x32xf32>
    %475 = arith.addf %432, %474 : vector<32x32xf32>
    %476 = arith.addf %267, %475 : vector<32x32xf32>
    %477 = vector.broadcast %273 : vector<1x32xf32> to vector<32x32xf32>
    %478 = arith.addf %476, %477 : vector<32x32xf32>
    %cst_291 = arith.constant dense<0.000000e+00> : vector<32xf32>
    %479 = vector.multi_reduction <add>, %478, %cst_291 [1] : vector<32x32xf32> to vector<32xf32>
    %480 = vector.shape_cast %479 : vector<32xf32> to vector<32x1xf32>
    %cst_292 = arith.constant 3.200000e+01 : f32
    %481 = vector.broadcast %cst_292 : f32 to vector<32x1xf32>
    %482 = arith.divf %480, %481 : vector<32x1xf32>
    %483 = arith.mulf %478, %478 : vector<32x32xf32>
    %cst_293 = arith.constant dense<0.000000e+00> : vector<32xf32>
    %484 = vector.multi_reduction <add>, %483, %cst_293 [1] : vector<32x32xf32> to vector<32xf32>
    %485 = vector.shape_cast %484 : vector<32xf32> to vector<32x1xf32>
    %cst_294 = arith.constant 3.200000e+01 : f32
    %486 = vector.broadcast %cst_294 : f32 to vector<32x1xf32>
    %487 = arith.divf %485, %486 : vector<32x1xf32>
    %488 = arith.mulf %482, %482 : vector<32x1xf32>
    %489 = arith.subf %487, %488 : vector<32x1xf32>
    %490 = vector.broadcast %482 : vector<32x1xf32> to vector<32x32xf32>
    %491 = arith.subf %478, %490 : vector<32x32xf32>
    %cst_295 = arith.constant 9.99999974E-6 : f32
    %492 = vector.broadcast %cst_295 : f32 to vector<32x1xf32>
    %493 = arith.addf %489, %492 : vector<32x1xf32>
    %494 = math.rsqrt %493 : vector<32x1xf32>
    %495 = vector.broadcast %494 : vector<32x1xf32> to vector<32x32xf32>
    %496 = arith.mulf %491, %495 : vector<32x32xf32>
    %497 = vector.broadcast %275 : vector<1x32xf32> to vector<32x32xf32>
    %498 = arith.mulf %496, %497 : vector<32x32xf32>
    %499 = vector.broadcast %277 : vector<1x32xf32> to vector<32x32xf32>
    %500 = arith.addf %498, %499 : vector<32x32xf32>
    %501 = arith.truncf %500 : vector<32x32xf32> to vector<32x32xbf16>
    %c2_296 = arith.constant 2 : index
    %c0_297 = arith.constant 0 : index
    %c0_298 = arith.constant 0 : index
    %502 = vector.load %arg9[%c2_296, %c0_297, %c0_298] : memref<4x32x128xbf16, #tpu.memory_space<vmem>>, vector<1x32x128xbf16>
    %503 = vector.shape_cast %502 : vector<1x32x128xbf16> to vector<32x128xbf16>
    %cst_299 = arith.constant dense<0.000000e+00> : vector<32x128xf32>
    %504 = tpu.matmul %501, %503, %cst_299 {dimension_numbers = #tpu.dot_dimension_numbers<[1], [0], [0], [1], [0, 0, 1, 1], [], []>} : vector<32x32xbf16>, vector<32x128xbf16>, vector<32x128xf32> -> vector<32x128xf32>
    %c1_300 = arith.constant 1 : index
    %c0_301 = arith.constant 0 : index
    %c0_302 = arith.constant 0 : index
    %505 = vector.load %arg8[%c1_300, %c0_301, %c0_302] : memref<2x1x128xf32, #tpu.memory_space<vmem>>, vector<1x1x128xf32>
    %506 = vector.shape_cast %505 : vector<1x1x128xf32> to vector<1x128xf32>
    %507 = vector.broadcast %506 : vector<1x128xf32> to vector<32x128xf32>
    %508 = arith.addf %504, %507 : vector<32x128xf32>
    %509 = arith.mulf %508, %508 : vector<32x128xf32>
    %510 = arith.mulf %508, %509 : vector<32x128xf32>
    %cst_303 = arith.constant 4.471500e-02 : f32
    %511 = vector.broadcast %cst_303 : f32 to vector<32x128xf32>
    %512 = arith.mulf %511, %510 : vector<32x128xf32>
    %513 = arith.addf %508, %512 : vector<32x128xf32>
    %cst_304 = arith.constant 0.797884583 : f32
    %514 = vector.broadcast %cst_304 : f32 to vector<32x128xf32>
    %515 = arith.mulf %514, %513 : vector<32x128xf32>
    %516 = math.tanh %515 : vector<32x128xf32>
    %cst_305 = arith.constant 1.000000e+00 : f32
    %517 = vector.broadcast %cst_305 : f32 to vector<32x128xf32>
    %518 = arith.addf %517, %516 : vector<32x128xf32>
    %cst_306 = arith.constant 5.000000e-01 : f32
    %519 = vector.broadcast %cst_306 : f32 to vector<32x128xf32>
    %520 = arith.mulf %519, %518 : vector<32x128xf32>
    %521 = arith.mulf %508, %520 : vector<32x128xf32>
    %522 = arith.truncf %521 : vector<32x128xf32> to vector<32x128xbf16>
    %c3_307 = arith.constant 3 : index
    %c0_308 = arith.constant 0 : index
    %c0_309 = arith.constant 0 : index
    %523 = vector.load %arg9[%c3_307, %c0_308, %c0_309] : memref<4x32x128xbf16, #tpu.memory_space<vmem>>, vector<1x32x128xbf16>
    %524 = vector.shape_cast %523 : vector<1x32x128xbf16> to vector<32x128xbf16>
    %cst_310 = arith.constant dense<0.000000e+00> : vector<32x32xf32>
    %525 = tpu.matmul %522, %524, %cst_310 {dimension_numbers = #tpu.dot_dimension_numbers<[1], [1], [0], [0], [0, 0, 1, 0], [], []>} : vector<32x128xbf16>, vector<32x128xbf16>, vector<32x32xf32> -> vector<32x32xf32>
    %526 = arith.addf %478, %525 : vector<32x32xf32>
    %527 = vector.broadcast %279 : vector<1x32xf32> to vector<32x32xf32>
    %528 = arith.addf %526, %527 : vector<32x32xf32>
    %c0_311 = arith.constant 0 : index
    %c0_312 = arith.constant 0 : index
    %c0_313 = arith.constant 0 : index
    %529 = vector.load %arg10[%c0_311, %c0_312, %c0_313] : memref<2x1x32xf32, #tpu.memory_space<vmem>>, vector<1x1x32xf32>
    %530 = vector.shape_cast %529 : vector<1x1x32xf32> to vector<1x32xf32>
    %c1_314 = arith.constant 1 : index
    %c0_315 = arith.constant 0 : index
    %c0_316 = arith.constant 0 : index
    %531 = vector.load %arg10[%c1_314, %c0_315, %c0_316] : memref<2x1x32xf32, #tpu.memory_space<vmem>>, vector<1x1x32xf32>
    %532 = vector.shape_cast %531 : vector<1x1x32xf32> to vector<1x32xf32>
    %cst_317 = arith.constant dense<0.000000e+00> : vector<32xf32>
    %533 = vector.multi_reduction <add>, %528, %cst_317 [1] : vector<32x32xf32> to vector<32xf32>
    %534 = vector.shape_cast %533 : vector<32xf32> to vector<32x1xf32>
    %cst_318 = arith.constant 3.200000e+01 : f32
    %535 = vector.broadcast %cst_318 : f32 to vector<32x1xf32>
    %536 = arith.divf %534, %535 : vector<32x1xf32>
    %537 = arith.mulf %528, %528 : vector<32x32xf32>
    %cst_319 = arith.constant dense<0.000000e+00> : vector<32xf32>
    %538 = vector.multi_reduction <add>, %537, %cst_319 [1] : vector<32x32xf32> to vector<32xf32>
    %539 = vector.shape_cast %538 : vector<32xf32> to vector<32x1xf32>
    %cst_320 = arith.constant 3.200000e+01 : f32
    %540 = vector.broadcast %cst_320 : f32 to vector<32x1xf32>
    %541 = arith.divf %539, %540 : vector<32x1xf32>
    %542 = arith.mulf %536, %536 : vector<32x1xf32>
    %543 = arith.subf %541, %542 : vector<32x1xf32>
    %544 = vector.broadcast %536 : vector<32x1xf32> to vector<32x32xf32>
    %545 = arith.subf %528, %544 : vector<32x32xf32>
    %cst_321 = arith.constant 9.99999974E-6 : f32
    %546 = vector.broadcast %cst_321 : f32 to vector<32x1xf32>
    %547 = arith.addf %543, %546 : vector<32x1xf32>
    %548 = math.rsqrt %547 : vector<32x1xf32>
    %549 = vector.broadcast %548 : vector<32x1xf32> to vector<32x32xf32>
    %550 = arith.mulf %545, %549 : vector<32x32xf32>
    %551 = vector.broadcast %530 : vector<1x32xf32> to vector<32x32xf32>
    %552 = arith.mulf %550, %551 : vector<32x32xf32>
    %553 = vector.broadcast %532 : vector<1x32xf32> to vector<32x32xf32>
    %554 = arith.addf %552, %553 : vector<32x32xf32>
    %555 = arith.truncf %554 : vector<32x32xf32> to vector<32x32xbf16>
    %c0_322 = arith.constant 0 : index
    %c0_323 = arith.constant 0 : index
    %556 = vector.load %arg11[%c0_322, %c0_323] : memref<32x128xbf16, #tpu.memory_space<vmem>>, vector<32x128xbf16>
    %cst_324 = arith.constant dense<0.000000e+00> : vector<32x128xf32>
    %557 = tpu.matmul %555, %556, %cst_324 {dimension_numbers = #tpu.dot_dimension_numbers<[1], [0], [0], [1], [0, 0, 1, 1], [], []>} : vector<32x32xbf16>, vector<32x128xbf16>, vector<32x128xf32> -> vector<32x128xf32>
    %558 = vector.shape_cast %557 : vector<32x128xf32> to vector<2x16x128xf32>
    %c0_325 = arith.constant 0 : index
    %c0_326 = arith.constant 0 : index
    %c0_327 = arith.constant 0 : index
    %559 = vector.load %arg12[%c0_325, %c0_326, %c0_327] : memref<2x16x128xf32, #tpu.memory_space<vmem>>, vector<2x16x128xf32>
    tpu.vector_store %arg12[%c0_325, %c0_326, %c0_327], %558 {strides = array<i32>} : memref<2x16x128xf32, #tpu.memory_space<vmem>>, vector<2x16x128xf32>,
    return
  }
  func.func @transform_0(%arg0: i32) -> (i32, i32, i32) {
    %c0_i32 = arith.constant 0 : i32
    %c0_i32_0 = arith.constant 0 : i32
    %c0_i32_1 = arith.constant 0 : i32
    return %arg0, %c0_i32, %c0_i32_0 : i32, i32, i32
  }
  func.func @transform_1(%arg0: i32) -> (i32, i32) {
    %c0_i32 = arith.constant 0 : i32
    %c0_i32_0 = arith.constant 0 : i32
    %c0_i32_1 = arith.constant 0 : i32
    return %c0_i32, %c0_i32_0 : i32, i32
  }
  func.func @transform_2(%arg0: i32) -> (i32, i32) {
    %c0_i32 = arith.constant 0 : i32
    %c0_i32_0 = arith.constant 0 : i32
    %c0_i32_1 = arith.constant 0 : i32
    return %c0_i32, %c0_i32_0 : i32, i32
  }
  func.func @transform_3(%arg0: i32) -> (i32, i32, i32) {
    %c0_i32 = arith.constant 0 : i32
    %c0_i32_0 = arith.constant 0 : i32
    %c0_i32_1 = arith.constant 0 : i32
    %c0_i32_2 = arith.constant 0 : i32
    return %c0_i32, %c0_i32_0, %c0_i32_1 : i32, i32, i32
  }
  func.func @transform_4(%arg0: i32) -> (i32, i32, i32) {
    %c0_i32 = arith.constant 0 : i32
    %c0_i32_0 = arith.constant 0 : i32
    %c0_i32_1 = arith.constant 0 : i32
    %c0_i32_2 = arith.constant 0 : i32
    return %c0_i32, %c0_i32_0, %c0_i32_1 : i32, i32, i32
  }
  func.func @transform_5(%arg0: i32) -> (i32, i32, i32) {
    %c0_i32 = arith.constant 0 : i32
    %c0_i32_0 = arith.constant 0 : i32
    %c0_i32_1 = arith.constant 0 : i32
    %c0_i32_2 = arith.constant 0 : i32
    return %c0_i32, %c0_i32_0, %c0_i32_1 : i32, i32, i32
  }
  func.func @transform_6(%arg0: i32) -> (i32, i32, i32) {
    %c0_i32 = arith.constant 0 : i32
    %c0_i32_0 = arith.constant 0 : i32
    %c0_i32_1 = arith.constant 0 : i32
    %c0_i32_2 = arith.constant 0 : i32
    return %c0_i32, %c0_i32_0, %c0_i32_1 : i32, i32, i32
  }
  func.func @transform_7(%arg0: i32) -> (i32, i32, i32) {
    %c0_i32 = arith.constant 0 : i32
    %c0_i32_0 = arith.constant 0 : i32
    %c0_i32_1 = arith.constant 0 : i32
    %c0_i32_2 = arith.constant 0 : i32
    return %c0_i32, %c0_i32_0, %c0_i32_1 : i32, i32, i32
  }
  func.func @transform_8(%arg0: i32) -> (i32, i32, i32) {
    %c0_i32 = arith.constant 0 : i32
    %c0_i32_0 = arith.constant 0 : i32
    %c0_i32_1 = arith.constant 0 : i32
    %c0_i32_2 = arith.constant 0 : i32
    return %c0_i32, %c0_i32_0, %c0_i32_1 : i32, i32, i32
  }
  func.func @transform_9(%arg0: i32) -> (i32, i32, i32) {
    %c0_i32 = arith.constant 0 : i32
    %c0_i32_0 = arith.constant 0 : i32
    %c0_i32_1 = arith.constant 0 : i32
    %c0_i32_2 = arith.constant 0 : i32
    return %c0_i32, %c0_i32_0, %c0_i32_1 : i32, i32, i32
  }
  func.func @transform_10(%arg0: i32) -> (i32, i32) {
    %c0_i32 = arith.constant 0 : i32
    %c0_i32_0 = arith.constant 0 : i32
    %c0_i32_1 = arith.constant 0 : i32
    return %c0_i32, %c0_i32_0 : i32, i32
  }
  func.func @transform_11(%arg0: i32) -> (i32, i32, i32) {
    %c0_i32 = arith.constant 0 : i32
    %c0_i32_0 = arith.constant 0 : i32
    %c0_i32_1 = arith.constant 0 : i32
    return %arg0, %c0_i32, %c0_i32_0 : i32, i32, i32
  }
}

</mosaic_0001>

<bundles_post_ra>
// kernel: bert_forward.1
= control target key start
LH: loop header
LB: loop body
LE: loop exit
PB: predicated region body
PF: predicated region fallthrough
CT: control target
= control target key end

     0   :  { %vm57_vm0 = vcmask 1043456   ;;  %vm50_vm1 = vcmask 64512   ;;  %vm121_vm2 = vcmask 261120   ;;  %vm609_vm4 = vcmask 130048   ;;  %s9054_s1 = inlined_call_operand.vmem [shape: bf16[8,32], index: 1, kind: input, shape index: {}]   ;;  %s9055_s0 = inlined_call_operand.vmem [shape: f32[2,16,8], index: 0, kind: input, shape index: {}]   ;;  %s9056_s2 = inlined_call_operand.vmem [shape: f32[32,32], index: 2, kind: input, shape index: {}]   ;;  %s9057_s3 = inlined_call_operand.vmem [shape: bf16[24,32,8], index: 3, kind: input, shape index: {}]   ;;  %s9058_s6 = inlined_call_operand.vmem [shape: f32[12,1,32], index: 6, kind: input, shape index: {}]   ;;  %s9059_s4 = inlined_call_operand.vmem [shape: f32[24,1,8], index: 4, kind: input, shape index: {}]   ;;  %s9060_s5 = inlined_call_operand.vmem [shape: bf16[8,8,32], index: 5, kind: input, shape index: {}]   ;;  %s9061_s8 = inlined_call_operand.vmem [shape: bf16[4,32,128], index: 8, kind: input, shape index: {}]   ;;  %s9062_s7 = inlined_call_operand.vmem [shape: f32[2,1,128], index: 7, kind: input, shape index: {}]   ;;  %s9063_s10 = inlined_call_operand.vmem [shape: bf16[32,128], index: 10, kind: input, shape index: {}]   ;;  %s9064_s9 = inlined_call_operand.vmem [shape: f32[2,1,32], index: 9, kind: input, shape index: {}]   ;;  %s9065_s11 = inlined_call_operand.vmem [shape: f32[2,16,128], index: 11, kind: output, shape index: {}]  }
   0x1   :  { %v45_v0 = vld [vmem:[%s9054_s1] sm:$0xf]  ;;  %v40_v2 = vld [vmem:[%s9055_s0 + $0x8] sm:$0xff]  ;;  %v41_v5 = vld [vmem:[%s9055_s0 + $0x10] sm:$0xff] }
   0x2   :  { %v39_v1 = vld [vmem:[%s9055_s0] sm:$0xff]  ;;  %7797 = vmatprep.subr.msk.bf16.mxu0 %vm57_vm0, %v45_v0  ;;  %v59_v3 = vsel %vm57_vm0, %v45_v0, 0  ;;  %v42_v6 = vld [vmem:[%s9055_s0 + $0x18] sm:$0xff]  ;;  %v48_v8 = vld [vmem:[%s9056_s2 + $0x10] sm:$0xff] }
   0x3   :  { %v43_v4 = vpack.c.bf16 %v40_v2, %v39_v1  ;;  %7104 = vmatpush3.bf16.msra.mxu0 %v59_v3  ;;  %v44_v7 = vpack.c.bf16 %v42_v6, %v41_v5  ;;  %v46_v9 = vld [vmem:[%s9056_s2] sm:$0xff]  ;;  %v49_v11 = vld [vmem:[%s9056_s2 + $0x18] sm:$0xff]  ;;  %v47_v14 = vld [vmem:[%s9056_s2 + $0x8] sm:$0xff] }
   0x4   :  { %v7806_v32 = vld [vmem:[%s9057_s3] sm:$0xff]   ;;  %v7808_v34 = vld [vmem:[%s9057_s3 + $0x8] sm:$0xff]   ;;  %vm8225_vm3 = vmpackc.low %vm50_vm1, %vm50_vm1 }
   0x5   :  { %7105 = vmatprep.mubr.msk.bf16.mxu0 %vm50_vm1, %v43_v4  ;;  %v7807_v33 = vld [vmem:[%s9057_s3 + $0x40] sm:$0xff]   ;;  %7109 = vmatprep.subr.bf16.mxu1 %v7806_v32  ;;  %v7809_v35 = vld [vmem:[%s9057_s3 + $0x48] sm:$0xff]  }
   0x6   :  { %7106 = vmatmul.mubr.msk.bf16.vlgmr.msra.gmra.mrb[0].mxu0 %vm50_vm1, %v44_v7  ;;  %7117 = vmatprep.subr.bf16.mxu0 %v7807_v33  ;;  %v8182_v36 = vld [vmem:[%s9057_s3 + $0x80] sm:$0xff]  }
   0x7   :  { %7110 = vmatpush3.bf16.msra.mxu1 %v7806_v32  ;;  %7118 = vmatpush3.bf16.msra.mxu0 %v7807_v33  ;;  %v6426_v4 = vld [vmem:[%s9058_s6] ss:$0 sm:$0xff]  ;;  %v6427_v7 = vld [vmem:[%s9058_s6 + $0x1] ss:$0 sm:$0xff]  ;;  %v6438_v33 = vld [vmem:[%s9059_s4 + $0x4] ss:$0 sm:$0xff] }
   0x8   :  { %7111 = vmatprep.subr.bf16.mxu1 %v7808_v34  ;;  %7119 = vmatprep.subr.bf16.mxu0 %v7809_v35 }
   0xb   :  { %7112 = vmatpush3.bf16.msra.mxu1 %v7808_v34  ;;  %7120 = vmatpush3.bf16.msra.mxu0 %v7809_v35 }
   0xc   :  { %7125 = vmatprep.subr.bf16.mxu1 %v8182_v36 }
  0xd9   :  { %v7107_v10 = vpop.f32.mrb[0].mxu0 }
  0xda   :  { %v8136_v12 = vadd.f32 %v7107_v10, %v48_v8  ;;  %v95_v13 = vpop.f32.mrb[1].mxu0 }
  0xdb   :  { %v8141_v15 = vadd.f32 %v95_v13, %v46_v9  ;;  %v7108_v16 = vpop.f32.mrb[2].mxu0 }
  0xdc   :  { %v8143_v17 = vadd.f32 %v7108_v16, %v49_v11  ;;  %v98_v18 = vpop.f32.mrb[3].mxu0  ;;  %v128_v19 = vsel %vm121_vm2, %v8136_v12, 0.0  ;;  %v141_v29 = vmul.f32 %v8136_v12, %v8136_v12 }
  0xdd   :  { %v8147_v20 = vadd.f32 %v98_v18, %v47_v14  ;;  %129 = vadd.xlane.f32.xlu1 %v128_v19  ;;  %v122_v21 = vsel %vm121_vm2, %v8141_v15, 0.0  ;;  %v139_v25 = vmul.f32 %v8141_v15, %v8141_v15 }
  0xde   :  { %123 = vadd.xlane.f32.xlu0 %v122_v21  ;;  %v131_v22 = vsel %vm121_vm2, %v8143_v17, 0.0  ;;  %v142_v27 = vmul.f32 %v8143_v17, %v8143_v17  ;;  %v149_v31 = vsel %vm121_vm2, %v141_v29, 0.0  ;;  %v7811_v29 = vld [vmem:[%s9057_s3 + $0x88] sm:$0xff]  }
  0xdf   :  { %v140_v23 = vmul.f32 %v8147_v20, %v8147_v20  ;;  %v125_v24 = vsel %vm121_vm2, %v8147_v20, 0.0  ;;  %v143_v28 = vsel %vm121_vm2, %v139_v25, 0.0 }
  0xe0   :  { %v152_v30 = vsel %vm121_vm2, %v142_v27, 0.0 }
  0xe1   :  { %132 = vadd.xlane.f32.xlu1 %v131_v22  ;;  %v146_v26 = vsel %vm121_vm2, %v140_v23, 0.0 }
  0xe2   :  { %126 = vadd.xlane.f32.xlu0 %v125_v24 }
  0xe5   :  { %147 = vadd.xlane.f32.xlu1 %v146_v26 }
  0xe6   :  { %144 = vadd.xlane.f32.xlu0 %v143_v28 }
  0xe9   :  { %153 = vadd.xlane.f32.xlu1 %v152_v30  ;;  %v6428_v30 = vld [vmem:[%s9059_s4] ss:$0 sm:$0xff] }
  0xea   :  { %150 = vadd.xlane.f32.xlu0 %v149_v31 }
 0x16a   :  { %v130_v37 = vpop.xlane.xlu1 %129 }
 0x16b   :  { %v124_v38 = vpop.xlane.xlu0 %123  ;;  %v137_v48 = vmul.f32 0.03125, %v130_v37 }
 0x16c   :  { %v135_v41 = vmul.f32 0.03125, %v124_v38 }
 0x16d   :  { %v161_v58 = vmul.f32 %v137_v48, %v137_v48  ;;  %v169_v13 = vsub.f32 %v8136_v12, %v137_v48  ;;  %v7812_v48 = vld [vmem:[%s9057_s3 + $0x10] sm:$0xff]  }
 0x16e   :  { %v133_v39 = vpop.xlane.xlu1 %132  ;;  %v159_v49 = vmul.f32 %v135_v41, %v135_v41  ;;  %v167_v3 = vsub.f32 %v8141_v15, %v135_v41 }
 0x16f   :  { %v127_v40 = vpop.xlane.xlu0 %126  ;;  %v138_v45 = vmul.f32 0.03125, %v133_v39 }
 0x170   :  { %v136_v42 = vmul.f32 0.03125, %v127_v40 }
 0x171   :  { %v162_v54 = vmul.f32 %v138_v45, %v138_v45  ;;  %v170_v9 = vsub.f32 %v8143_v17, %v138_v45 }
 0x172   :  { %v160_v43 = vmul.f32 %v136_v42, %v136_v42  ;;  %v148_v44 = vpop.xlane.xlu1 %147  ;;  %v168_v1 = vsub.f32 %v8147_v20, %v136_v42 }
 0x173   :  { %v156_v46 = vmul.f32 0.03125, %v148_v44  ;;  %v145_v47 = vpop.xlane.xlu0 %144 }
 0x174   :  { %v155_v50 = vmul.f32 0.03125, %v145_v47 }
 0x175   :  { %v164_v51 = vsub.f32 %v156_v46, %v160_v43 }
 0x176   :  { %v163_v52 = vsub.f32 %v155_v50, %v159_v49  ;;  %v154_v53 = vpop.xlane.xlu1 %153 }
 0x177   :  { %v172_v55 = vadd.f32 1e-05, %v164_v51  ;;  %v158_v56 = vmul.f32 0.03125, %v154_v53  ;;  %v151_v57 = vpop.xlane.xlu0 %150  ;;  %v6448_v51 = vld [vmem:[%s9059_s4 + $0x8] ss:$0 sm:$0xff] }
 0x178   :  { %v171_v59 = vadd.f32 1e-05, %v163_v52  ;;  %v157_v60 = vmul.f32 0.03125, %v151_v57 }
 0x179   :  { %7864 = vrsqrt.f32 %v172_v55  ;;  %v166_v61 = vsub.f32 %v158_v56, %v162_v54 }
 0x17a   :  { %7866 = vrsqrt.f32 %v171_v59  ;;  %v165_v62 = vsub.f32 %v157_v60, %v161_v58 }
 0x17b   :  { %v174_v63 = vadd.f32 1e-05, %v166_v61 }
 0x17c   :  { %v173_v0 = vadd.f32 1e-05, %v165_v62 }
 0x17d   :  { %7868 = vrsqrt.f32 %v174_v63  ;;  %v7813_v63 = vld [vmem:[%s9057_s3 + $0x18] sm:$0xff]  }
 0x17e   :  { %7870 = vrsqrt.f32 %v173_v0  ;;  %v7814_v0 = vld [vmem:[%s9057_s3 + $0x90] sm:$0xff]  }
 0x183   :  { %v7865_v2 = vpop.eup %7864 }
 0x184   :  { %v7867_v5 = vpop.eup %7866  ;;  %v180_v6 = vmul.f32 %v7865_v2, %v168_v1  ;;  %v7815_v1 = vld [vmem:[%s9057_s3 + $0x98] sm:$0xff]  }
 0x185   :  { %v179_v8 = vmul.f32 %v7867_v5, %v167_v3 }
 0x186   :  { %v190_v10 = vmul.f32 %v6426_v4, %v180_v6 }
 0x187   :  { %v7869_v11 = vpop.eup %7868  ;;  %v189_v14 = vmul.f32 %v6426_v4, %v179_v8 }
 0x188   :  { %v7871_v16 = vpop.eup %7870  ;;  %v200_v18 = vadd.f32 %v6427_v7, %v190_v10  ;;  %v182_v19 = vmul.f32 %v7869_v11, %v170_v9 }
 0x189   :  { %v199_v21 = vadd.f32 %v6427_v7, %v189_v14  ;;  %v181_v22 = vmul.f32 %v7871_v16, %v169_v13  ;;  %v6470_v13 = vld [vmem:[%s9059_s4 + $0x1] ss:$0 sm:$0xff] }
 0x18a   :  { %v192_v23 = vmul.f32 %v6426_v4, %v182_v19 }
 0x18b   :  { %v8195_v24 = vpack.c.bf16 %v200_v18, %v199_v21  ;;  %v191_v25 = vmul.f32 %v6426_v4, %v181_v22 }
 0x18c   :  { %v202_v26 = vadd.f32 %v6427_v7, %v192_v23 }
 0x18d   :  { %v201_v27 = vadd.f32 %v6427_v7, %v191_v25  ;;  %7113 = vmatprep.mubr.msk.bf16.mxu1 %vm121_vm2, %v8195_v24  ;;  %7121 = vmatprep.mubr.msk.bf16.mxu0 %vm121_vm2, %v8195_v24 }
 0x18f   :  { %v8201_v28 = vpack.c.bf16 %v202_v26, %v201_v27 }
 0x191   :  { %7114 = vmatmul.mubr.msk.bf16.vlgmr.msra.gmra.mrb[0].mxu1 %vm121_vm2, %v8201_v28  ;;  %7122 = vmatmul.mubr.msk.bf16.vlgmr.msra.gmra.mrb[4].mxu0 %vm121_vm2, %v8201_v28 }
 0x192   :  { %7126 = vmatpush3.bf16.msra.mxu1 %v8182_v36  ;;  %7129 = vmatprep.mubr.msk.bf16.mxu1 %vm121_vm2, %v8195_v24 }
 0x193   :  { %7127 = vmatprep.subr.bf16.mxu1 %v7811_v29 }
 0x196   :  { %7128 = vmatpush3.bf16.msra.mxu1 %v7811_v29 }
 0x199   :  { %7130 = vmatmul.mubr.msk.bf16.vlgmr.msra.gmra.mrb[4].mxu1 %vm121_vm2, %v8201_v28 }
 0x264   :  { %v7115_v31 = vpop.f32.mrb[0].mxu1  ;;  %v7123_v32 = vpop.f32.mrb[4].mxu0 }
 0x265   :  { %v277_v34 = vadd.f32 %v7115_v31, %v6428_v30  ;;  %v268_v35 = vpop.f32.mrb[1].mxu1  ;;  %v342_v36 = vpop.f32.mrb[5].mxu0  ;;  %v351_v40 = vadd.f32 %v7123_v32, %v6438_v33 }
 0x266   :  { %v269_v37 = vadd.f32 %v6428_v30, %v268_v35  ;;  %v7116_v38 = vpop.f32.mrb[2].mxu1  ;;  %v7124_v39 = vpop.f32.mrb[6].mxu0  ;;  %v343_v44 = vadd.f32 %v6438_v33, %v342_v36 }
 0x267   :  { %v354_v41 = vadd.f32 %v7124_v39, %v6438_v33  ;;  %v271_v42 = vpop.f32.mrb[3].mxu1  ;;  %v345_v43 = vpop.f32.mrb[7].mxu0  ;;  %7144 = vmatprep.mubr.msk.f32.mxu1 %vm50_vm1, %v277_v34  ;;  %v280_v59 = vadd.f32 %v7116_v38, %v6428_v30 }
 0x268   :  { %v346_v45 = vadd.f32 %v6438_v33, %v345_v43  ;;  %7137 = vmatprep.mubr.msk.f32.mxu0 %vm50_vm1, %v269_v37  ;;  %v272_v61 = vadd.f32 %v6428_v30, %v271_v42  ;;  %v6490_v30 = vld [vmem:[%s9059_s4 + $0x9] ss:$0 sm:$0xff] }
 0x269   :  { %v7619_v47 = vpack.c.bf16 %v354_v41, %v351_v40 }
 0x26a   :  { %v7613_v49 = vpack.c.bf16 %v346_v45, %v343_v44 }
 0x26b   :  { %7621 = vmatprep.subr.msk.bf16.mxu1 %vm8225_vm3, %v7619_v47 }
 0x26c   :  { %v7131_v50 = vpop.f32.mrb[4].mxu1  ;;  %7615 = vmatprep.subr.msk.bf16.mxu0 %vm8225_vm3, %v7613_v49  ;;  %7624 = vmatpush3.bf16.xpose.msk.msra.mxu1 %vm8225_vm3, %v7619_v47 }
 0x26d   :  { %v416_v52 = vpop.f32.mrb[5].mxu1  ;;  %7618 = vmatpush3.bf16.xpose.msk.msra.mxu0 %vm8225_vm3, %v7613_v49  ;;  %7161 = vmatprep.subr.bf16.mxu1 %v7812_v48  ;;  %v425_v54 = vadd.f32 %v7131_v50, %v6448_v51 }
 0x26e   :  { %v7132_v53 = vpop.f32.mrb[6].mxu1  ;;  %v417_v57 = vadd.f32 %v6448_v51, %v416_v52 }
 0x26f   :  { %v428_v55 = vadd.f32 %v7132_v53, %v6448_v51  ;;  %v419_v56 = vpop.f32.mrb[7].mxu1 }
 0x270   :  { %v420_v58 = vadd.f32 %v6448_v51, %v419_v56 }
 0x271   :  { %v8243_v60 = vpack.c.bf16 %v428_v55, %v425_v54 }
 0x272   :  { %v7625_v62 = vpack.c.bf16 %v420_v58, %v417_v57 }
 0x273   :  { %7145 = vmatmul.mubr.msk.f32.vlgmr.msra.gmra.mrb[8].mxu1 %vm50_vm1, %v280_v59 }
 0x274   :  { %7138 = vmatmul.mubr.msk.f32.vlgmr.msra.gmra.mrb[8].mxu0 %vm50_vm1, %v272_v61  ;;  %7626 = vmatprep.subr.bf16.mxu0 %v7625_v62 }
 0x275   :  { %7162 = vmatpush3.bf16.msra.mxu1 %v7812_v48  ;;  %7165 = vmatprep.mubr.msk.bf16.mxu1 %vm121_vm2, %v8195_v24 }
 0x276   :  { %7628 = vmatpush3.bf16.msra.mxu0 %v7625_v62  ;;  %7163 = vmatprep.subr.bf16.mxu1 %v7813_v63 }
 0x277   :  { %7630 = vmatprep.subr.bf16.mxu0 %v8243_v60 }
 0x279   :  { %7164 = vmatpush3.bf16.msra.mxu1 %v7813_v63 }
 0x27a   :  { %7177 = vmatprep.subr.bf16.mxu1 %v7814_v0 }
 0x27c   :  { %7166 = vmatmul.mubr.msk.bf16.vlgmr.msra.gmra.mrb[12].mxu1 %vm121_vm2, %v8201_v28 }
 0x27d   :  { %7178 = vmatpush3.bf16.msra.mxu1 %v7814_v0  ;;  %7181 = vmatprep.mubr.msk.bf16.mxu1 %vm121_vm2, %v8195_v24 }
 0x27e   :  { %7179 = vmatprep.subr.bf16.mxu1 %v7815_v1 }
 0x281   :  { %7180 = vmatpush3.bf16.msra.mxu1 %v7815_v1 }
 0x284   :  { %7182 = vmatmul.mubr.msk.bf16.vlgmr.msra.gmra.mrb[16].mxu1 %vm121_vm2, %v8201_v28 }
 0x346   :  { %v7146_v2 = vpop.f32.mrb[8].mxu1 }
 0x347   :  { %v7139_v3 = vpop.f32.mrb[8].mxu0  ;;  %v596_v4 = vpop.f32.mrb[9].mxu1  ;;  %v608_v8 = vmul.f32 0.35355338, %v7146_v2 }
 0x348   :  { %v606_v5 = vmul.f32 0.35355338, %v7139_v3  ;;  %v509_v6 = vpop.f32.mrb[9].mxu0  ;;  %v607_v10 = vmul.f32 0.35355338, %v596_v4 }
 0x349   :  { %v605_v7 = vmul.f32 0.35355338, %v509_v6  ;;  %v619_v14 = vsel %vm609_vm4, %v608_v8, -inf  ;;  %v7816_v6 = vld [vmem:[%s9057_s3 + $0x50] sm:$0xff]  }
 0x34a   :  { %v613_v9 = vsel %vm609_vm4, %v606_v5, -inf  ;;  %v616_v18 = vsel %vm609_vm4, %v607_v10, -inf }
 0x34b   :  { %614 = vmax.xlane.f32.xlu1 %v613_v9  ;;  %v610_v11 = vsel %vm609_vm4, %v605_v7, -inf }
 0x34c   :  { %611 = vmax.xlane.f32.xlu0 %v610_v11  ;;  %v7817_v11 = vld [vmem:[%s9057_s3 + $0x58] sm:$0xff]  }
 0x34f   :  { %v7167_v16 = vpop.f32.mrb[12].mxu1  ;;  %620 = vmax.xlane.f32.xlu1 %v619_v14 }
 0x350   :  { %v887_v19 = vadd.f32 %v7167_v16, %v6470_v13  ;;  %v878_v21 = vpop.f32.mrb[13].mxu1  ;;  %617 = vmax.xlane.f32.xlu0 %v616_v18 }
 0x351   :  { %v8272_v22 = vadd.f32 %v6470_v13, %v878_v21  ;;  %v7168_v23 = vpop.f32.mrb[14].mxu1 }
 0x352   :  { %v8274_v25 = vadd.f32 %v7168_v23, %v6470_v13  ;;  %v881_v26 = vpop.f32.mrb[15].mxu1  ;;  %7196 = vmatprep.mubr.msk.f32.mxu1 %vm50_vm1, %v887_v19  ;;  %v6480_v23 = vld [vmem:[%s9059_s4 + $0x5] ss:$0 sm:$0xff] }
 0x353   :  { %v8277_v27 = vadd.f32 %v6470_v13, %v881_v26 }
 0x357   :  { %v7183_v29 = vpop.f32.mrb[16].mxu1 }
 0x358   :  { %v1026_v31 = vpop.f32.mrb[17].mxu1  ;;  %v1035_v33 = vadd.f32 %v7183_v29, %v6490_v30 }
 0x359   :  { %v7184_v32 = vpop.f32.mrb[18].mxu1  ;;  %v1027_v36 = vadd.f32 %v6490_v30, %v1026_v31 }
 0x35a   :  { %v1038_v34 = vadd.f32 %v7184_v32, %v6490_v30  ;;  %v1029_v35 = vpop.f32.mrb[19].mxu1 }
 0x35b   :  { %v1030_v37 = vadd.f32 %v6490_v30, %v1029_v35 }
 0x35c   :  { %v8282_v38 = vpack.c.bf16 %v1038_v34, %v1035_v33 }
 0x35d   :  { %v8284_v39 = vpack.c.bf16 %v1030_v37, %v1027_v36 }
 0x3d8   :  { %v615_v40 = vpop.xlane.xlu1 %614 }
 0x3d9   :  { %v623_v41 = vsub.f32 %v606_v5, %v615_v40  ;;  %v612_v42 = vpop.xlane.xlu0 %611 }
 0x3da   :  { %v622_v43 = vsub.f32 %v605_v7, %v612_v42 }
 0x3db   :  { %v628_v44 = vmul.f32 1.442695, %v623_v41 }
 0x3dc   :  { %v626_v45 = vmul.f32 1.442695, %v622_v43  ;;  %v621_v47 = vpop.xlane.xlu1 %620 }
 0x3dd   :  { %7872 = vpow2.f32 %v628_v44  ;;  %v625_v48 = vsub.f32 %v608_v8, %v621_v47  ;;  %v618_v49 = vpop.xlane.xlu0 %617 }
 0x3de   :  { %7874 = vpow2.f32 %v626_v45  ;;  %v624_v50 = vsub.f32 %v607_v10, %v618_v49 }
 0x3df   :  { %v632_v51 = vmul.f32 1.442695, %v625_v48 }
 0x3e0   :  { %v630_v52 = vmul.f32 1.442695, %v624_v50 }
 0x3e1   :  { %7876 = vpow2.f32 %v632_v51 }
 0x3e2   :  { %7878 = vpow2.f32 %v630_v52 }
 0x3e7   :  { %v7873_v53 = vpop.eup %7872 }
 0x3e8   :  { %v7875_v54 = vpop.eup %7874  ;;  %v637_v55 = vsel %vm609_vm4, %v7873_v53, 0.0 }
 0x3e9   :  { %638 = vadd.xlane.f32.xlu1 %v637_v55  ;;  %v634_v56 = vsel %vm609_vm4, %v7875_v54, 0.0 }
 0x3ea   :  { %635 = vadd.xlane.f32.xlu0 %v634_v56 }
 0x3eb   :  { %v7877_v57 = vpop.eup %7876 }
 0x3ec   :  { %v7879_v58 = vpop.eup %7878  ;;  %v643_v59 = vsel %vm609_vm4, %v7877_v57, 0.0 }
 0x3ed   :  { %644 = vadd.xlane.f32.xlu1 %v643_v59  ;;  %v640_v61 = vsel %vm609_vm4, %v7879_v58, 0.0 }
 0x3ee   :  { %641 = vadd.xlane.f32.xlu0 %v640_v61 }
 0x476   :  { %v639_v62 = vpop.xlane.xlu1 %638 }
 0x477   :  { %7880 = vrcp.f32 %v639_v62  ;;  %v636_v63 = vpop.xlane.xlu0 %635 }
 0x478   :  { %7882 = vrcp.f32 %v636_v63 }
 0x47a   :  { %v645_v0 = vpop.xlane.xlu1 %644 }
 0x47b   :  { %7884 = vrcp.f32 %v645_v0  ;;  %v642_v1 = vpop.xlane.xlu0 %641 }
 0x47c   :  { %7886 = vrcp.f32 %v642_v1 }
 0x481   :  { %v7881_v2 = vpop.eup %7880 }
 0x482   :  { %v7883_v3 = vpop.eup %7882  ;;  %v649_v5 = vmul.f32 %v7881_v2, %v7873_v53 }
 0x483   :  { %v647_v4 = vmul.f32 %v7883_v3, %v7875_v54 }
 0x485   :  { %v7885_v7 = vpop.eup %7884  ;;  %7151 = vmatprep.mubr.msk.f32.mxu0 %vm609_vm4, %v647_v4 }
 0x486   :  { %v7887_v8 = vpop.eup %7886  ;;  %7152 = vmatmul.mubr.msk.f32.vlgmr.msra.gmra.mrb[10].mxu0 %vm609_vm4, %v649_v5  ;;  %v653_v10 = vmul.f32 %v7885_v7, %v7877_v57 }
 0x487   :  { %7632 = vmatpush3.bf16.msra.mxu0 %v8243_v60  ;;  %v651_v9 = vmul.f32 %v7887_v8, %v7879_v58 }
 0x488   :  { %7169 = vmatprep.subr.bf16.mxu0 %v7816_v6 }
 0x489   :  { %7158 = vmatprep.mubr.msk.f32.mxu0 %vm609_vm4, %v651_v9 }
 0x48a   :  { %7159 = vmatmul.mubr.msk.f32.vlgmr.msra.gmra.mrb[12].mxu0 %vm609_vm4, %v653_v10 }
 0x48b   :  { %7170 = vmatpush3.bf16.msra.mxu0 %v7816_v6  ;;  %7173 = vmatprep.mubr.msk.bf16.mxu0 %vm121_vm2, %v8195_v24 }
 0x48c   :  { %7171 = vmatprep.subr.bf16.mxu0 %v7817_v11 }
 0x48f   :  { %7172 = vmatpush3.bf16.msra.mxu0 %v7817_v11 }
 0x492   :  { %7174 = vmatmul.mubr.msk.bf16.vlgmr.msra.gmra.mrb[16].mxu0 %vm121_vm2, %v8201_v28 }
 0x493   :  { %7189 = vmatprep.mubr.msk.f32.mxu0 %vm50_vm1, %v8272_v22 }
 0x559   :  { %v8307_v60 = vpop.f32.mrb[10].mxu0 }
 0x55a   :  { %v8309_v13 = vpop.f32.mrb[11].mxu0 }
 0x55b   :  { %v816_v14 = vpack.c.bf16 %v8307_v60, %v8309_v13  ;;  %v6527_v60 = vld [vmem:[%s9059_s4 + $0x6] ss:$0 sm:$0xff] }
 0x55d   :  { %v8313_v16 = vpop.f32.mrb[12].mxu0 }
 0x55e   :  { %v8315_v18 = vpop.f32.mrb[13].mxu0 }
 0x55f   :  { %v817_v19 = vpack.c.bf16 %v8313_v16, %v8315_v18 }
 0x565   :  { %v7175_v21 = vpop.f32.mrb[16].mxu0 }
 0x566   :  { %v952_v22 = vpop.f32.mrb[17].mxu0  ;;  %v961_v29 = vadd.f32 %v7175_v21, %v6480_v23 }
 0x567   :  { %v7176_v26 = vpop.f32.mrb[18].mxu0  ;;  %v953_v32 = vadd.f32 %v6480_v23, %v952_v22 }
 0x568   :  { %v964_v30 = vadd.f32 %v7176_v26, %v6480_v23  ;;  %v955_v31 = vpop.f32.mrb[19].mxu0 }
 0x569   :  { %v956_v33 = vadd.f32 %v6480_v23, %v955_v31  ;;  %v7818_v23 = vld [vmem:[%s9057_s3 + $0x20] sm:$0xff]   ;;  %v7819_v31 = vld [vmem:[%s9057_s3 + $0x28] sm:$0xff]  }
 0x56a   :  { %v7639_v34 = vpack.c.bf16 %v964_v30, %v961_v29 }
 0x56b   :  { %v7633_v35 = vpack.c.bf16 %v956_v33, %v953_v32  ;;  %v7821_v32 = vld [vmem:[%s9057_s3 + $0x68] sm:$0xff]   ;;  %v6507_v33 = vld [vmem:[%s9060_s5 + $0x4] sm:$0xf] }
 0x56c   :  { %7641 = vmatprep.subr.msk.bf16.mxu1 %vm8225_vm3, %v7639_v34 }
 0x56d   :  { %7635 = vmatprep.subr.msk.bf16.mxu0 %vm8225_vm3, %v7633_v35  ;;  %7644 = vmatpush3.bf16.xpose.msk.msra.mxu1 %vm8225_vm3, %v7639_v34  ;;  %v1436_v34 = vsel %vm57_vm0, %v6507_v33, 0 }
 0x56e   :  { %7638 = vmatpush3.bf16.xpose.msk.msra.mxu0 %vm8225_vm3, %v7633_v35  ;;  %7798 = vmatprep.subr.msk.bf16.mxu1 %vm57_vm0, %v6507_v33  ;;  %v818_v35 = vld [vmem:[%s9060_s5] sm:$0xf] }
 0x56f   :  { %7646 = vmatprep.subr.bf16.mxu0 %v8284_v39 }
 0x574   :  { %7197 = vmatmul.mubr.msk.f32.vlgmr.msra.gmra.mrb[10].mxu1 %vm50_vm1, %v8274_v25 }
 0x575   :  { %7190 = vmatmul.mubr.msk.f32.vlgmr.msra.gmra.mrb[14].mxu0 %vm50_vm1, %v8277_v27  ;;  %7214 = vmatpush3.bf16.msra.mxu1 %v1436_v34 }
 0x576   :  { %7648 = vmatpush3.bf16.msra.mxu0 %v8284_v39  ;;  %7799 = vmatprep.subr.msk.bf16.mxu1 %vm57_vm0, %v818_v35 }
 0x577   :  { %7650 = vmatprep.subr.bf16.mxu0 %v8282_v38 }
 0x647   :  { %v7198_v36 = vpop.f32.mrb[10].mxu1 }
 0x648   :  { %v7191_v37 = vpop.f32.mrb[14].mxu0  ;;  %v1206_v40 = vpop.f32.mrb[11].mxu1  ;;  %v1218_v44 = vmul.f32 0.35355338, %v7198_v36 }
 0x649   :  { %v1216_v41 = vmul.f32 0.35355338, %v7191_v37  ;;  %v1119_v42 = vpop.f32.mrb[15].mxu0  ;;  %v1217_v47 = vmul.f32 0.35355338, %v1206_v40 }
 0x64a   :  { %v1215_v43 = vmul.f32 0.35355338, %v1119_v42  ;;  %v1228_v27 = vsel %vm609_vm4, %v1218_v44, -inf }
 0x64b   :  { %v1222_v45 = vsel %vm609_vm4, %v1216_v41, -inf  ;;  %v1225_v39 = vsel %vm609_vm4, %v1217_v47, -inf }
 0x64c   :  { %1223 = vmax.xlane.f32.xlu1 %v1222_v45  ;;  %v1219_v25 = vsel %vm609_vm4, %v1215_v43, -inf  ;;  %v7822_v45 = vld [vmem:[%s9057_s3 + $0xa0] sm:$0xff]  }
 0x64d   :  { %1220 = vmax.xlane.f32.xlu0 %v1219_v25 }
 0x650   :  { %1229 = vmax.xlane.f32.xlu1 %v1228_v27 }
 0x651   :  { %1226 = vmax.xlane.f32.xlu0 %v1225_v39 }
 0x6d9   :  { %v1224_v48 = vpop.xlane.xlu1 %1223 }
 0x6da   :  { %v1232_v49 = vsub.f32 %v1216_v41, %v1224_v48  ;;  %v1221_v50 = vpop.xlane.xlu0 %1220 }
 0x6db   :  { %v1231_v51 = vsub.f32 %v1215_v43, %v1221_v50  ;;  %v7823_v50 = vld [vmem:[%s9057_s3 + $0xa8] sm:$0xff]  }
 0x6dc   :  { %v1237_v52 = vmul.f32 1.442695, %v1232_v49 }
 0x6dd   :  { %v1235_v53 = vmul.f32 1.442695, %v1231_v51  ;;  %v1230_v54 = vpop.xlane.xlu1 %1229 }
 0x6de   :  { %7888 = vpow2.f32 %v1237_v52  ;;  %v1234_v55 = vsub.f32 %v1218_v44, %v1230_v54  ;;  %v1227_v56 = vpop.xlane.xlu0 %1226  ;;  %v1494_v44 = vsel %vm57_vm0, %v818_v35, 0 }
 0x6df   :  { %7890 = vpow2.f32 %v1235_v53  ;;  %v1233_v57 = vsub.f32 %v1217_v47, %v1227_v56  ;;  %v6517_v47 = vld [vmem:[%s9059_s4 + $0x2] ss:$0 sm:$0xff] }
 0x6e0   :  { %v1241_v58 = vmul.f32 1.442695, %v1234_v55 }
 0x6e1   :  { %v1239_v59 = vmul.f32 1.442695, %v1233_v57 }
 0x6e2   :  { %7892 = vpow2.f32 %v1241_v58 }
 0x6e3   :  { %7894 = vpow2.f32 %v1239_v59 }
 0x6e8   :  { %v7889_v61 = vpop.eup %7888 }
 0x6e9   :  { %v7891_v62 = vpop.eup %7890  ;;  %v1246_v63 = vsel %vm609_vm4, %v7889_v61, 0.0 }
 0x6ea   :  { %1247 = vadd.xlane.f32.xlu1 %v1246_v63  ;;  %v1243_v0 = vsel %vm609_vm4, %v7891_v62, 0.0 }
 0x6eb   :  { %1244 = vadd.xlane.f32.xlu0 %v1243_v0 }
 0x6ec   :  { %v7893_v1 = vpop.eup %7892 }
 0x6ed   :  { %v7895_v2 = vpop.eup %7894  ;;  %v1252_v3 = vsel %vm609_vm4, %v7893_v1, 0.0 }
 0x6ee   :  { %1253 = vadd.xlane.f32.xlu1 %v1252_v3  ;;  %v1249_v4 = vsel %vm609_vm4, %v7895_v2, 0.0 }
 0x6ef   :  { %1250 = vadd.xlane.f32.xlu0 %v1249_v4 }
 0x777   :  { %v1248_v5 = vpop.xlane.xlu1 %1247 }
 0x778   :  { %7896 = vrcp.f32 %v1248_v5  ;;  %v1245_v6 = vpop.xlane.xlu0 %1244 }
 0x779   :  { %7898 = vrcp.f32 %v1245_v6 }
 0x77b   :  { %v1254_v7 = vpop.xlane.xlu1 %1253 }
 0x77c   :  { %7900 = vrcp.f32 %v1254_v7  ;;  %v1251_v8 = vpop.xlane.xlu0 %1250 }
 0x77d   :  { %7902 = vrcp.f32 %v1251_v8 }
 0x782   :  { %v7897_v9 = vpop.eup %7896 }
 0x783   :  { %v7899_v10 = vpop.eup %7898  ;;  %v1258_v21 = vmul.f32 %v7897_v9, %v7889_v61  ;;  %v6537_v61 = vld [vmem:[%s9059_s4 + $0xa] ss:$0 sm:$0xff] }
 0x784   :  { %v1256_v11 = vmul.f32 %v7899_v10, %v7891_v62 }
 0x786   :  { %v7901_v22 = vpop.eup %7900  ;;  %7203 = vmatprep.mubr.msk.f32.mxu0 %vm609_vm4, %v1256_v11 }
 0x787   :  { %v7903_v26 = vpop.eup %7902  ;;  %7204 = vmatmul.mubr.msk.f32.vlgmr.msra.gmra.mrb[20].mxu0 %vm609_vm4, %v1258_v21  ;;  %v1262_v30 = vmul.f32 %v7901_v22, %v7893_v1 }
 0x788   :  { %7652 = vmatpush3.bf16.msra.mxu0 %v8282_v38  ;;  %v1260_v29 = vmul.f32 %v7903_v26, %v7895_v2  ;;  %v7820_v38 = vld [vmem:[%s9057_s3 + $0x60] sm:$0xff]  }
 0x789   :  { %7225 = vmatprep.subr.bf16.mxu0 %v7818_v23 }
 0x78a   :  { %7210 = vmatprep.mubr.msk.f32.mxu0 %vm609_vm4, %v1260_v29 }
 0x78b   :  { %7211 = vmatmul.mubr.msk.f32.vlgmr.msra.gmra.mrb[22].mxu0 %vm609_vm4, %v1262_v30 }
 0x78c   :  { %7226 = vmatpush3.bf16.msra.mxu0 %v7818_v23  ;;  %7229 = vmatprep.mubr.msk.bf16.mxu0 %vm121_vm2, %v8195_v24 }
 0x78d   :  { %7227 = vmatprep.subr.bf16.mxu0 %v7819_v31 }
 0x790   :  { %7228 = vmatpush3.bf16.msra.mxu0 %v7819_v31 }
 0x791   :  { %7233 = vmatprep.subr.bf16.mxu0 %v7820_v38 }
 0x793   :  { %7230 = vmatmul.mubr.msk.bf16.vlgmr.msra.gmra.mrb[24].mxu0 %vm121_vm2, %v8201_v28 }
 0x794   :  { %7234 = vmatpush3.bf16.msra.mxu0 %v7820_v38  ;;  %7237 = vmatprep.mubr.msk.bf16.mxu0 %vm121_vm2, %v8195_v24 }
 0x795   :  { %7235 = vmatprep.subr.bf16.mxu0 %v7821_v32 }
 0x798   :  { %7236 = vmatpush3.bf16.msra.mxu0 %v7821_v32 }
 0x79b   :  { %7238 = vmatmul.mubr.msk.bf16.vlgmr.msra.gmra.mrb[28].mxu0 %vm121_vm2, %v8201_v28 }
 0x85a   :  { %v7205_v36 = vpop.f32.mrb[20].mxu0 }
 0x85b   :  { %v1335_v37 = vpop.f32.mrb[21].mxu0 }
 0x85c   :  { %v1425_v40 = vpack.c.bf16 %v7205_v36, %v1335_v37 }
 0x85e   :  { %v7212_v41 = vpop.f32.mrb[22].mxu0  ;;  %7215 = vmatprep.mubr.msk.bf16.mxu1 %vm50_vm1, %v1425_v40 }
 0x85f   :  { %v1416_v42 = vpop.f32.mrb[23].mxu0 }
 0x860   :  { %v1426_v43 = vpack.c.bf16 %v7212_v41, %v1416_v42 }
 0x862   :  { %7216 = vmatmul.mubr.msk.bf16.vlgmr.msra.gmra.mrb[20].mxu1 %vm50_vm1, %v1426_v43 }
 0x863   :  { %7220 = vmatpush3.bf16.msra.mxu1 %v1494_v44  ;;  %7221 = vmatprep.mubr.msk.bf16.mxu1 %vm50_vm1, %v816_v14 }
 0x864   :  { %7241 = vmatprep.subr.bf16.mxu1 %v7822_v45 }
 0x866   :  { %v7231_v25 = vpop.f32.mrb[24].mxu0 }
 0x867   :  { %v1604_v27 = vpop.f32.mrb[25].mxu0  ;;  %v1613_v59 = vadd.f32 %v7231_v25, %v6517_v47 }
 0x868   :  { %v1605_v39 = vadd.f32 %v6517_v47, %v1604_v27  ;;  %v7232_v48 = vpop.f32.mrb[26].mxu0 }
 0x869   :  { %v1607_v49 = vpop.f32.mrb[27].mxu0  ;;  %v1616_v18 = vadd.f32 %v7232_v48, %v6517_v47 }
 0x86a   :  { %7253 = vmatprep.mubr.msk.f32.mxu0 %vm50_vm1, %v1605_v39  ;;  %v1608_v16 = vadd.f32 %v6517_v47, %v1607_v49 }
 0x86e   :  { %v7239_v51 = vpop.f32.mrb[28].mxu0  ;;  %7222 = vmatmul.mubr.msk.bf16.vlgmr.msra.gmra.mrb[20].mxu1 %vm50_vm1, %v817_v19 }
 0x86f   :  { %v1678_v13 = vpop.f32.mrb[29].mxu0  ;;  %7242 = vmatpush3.bf16.msra.mxu1 %v7822_v45  ;;  %7245 = vmatprep.mubr.msk.bf16.mxu1 %vm121_vm2, %v8195_v24  ;;  %v1687_v52 = vadd.f32 %v7239_v51, %v6527_v60  ;;  %v7824_v51 = vld [vmem:[%s9057_s3 + $0x30] sm:$0xff]  }
 0x870   :  { %v7240_v14 = vpop.f32.mrb[30].mxu0  ;;  %7243 = vmatprep.subr.bf16.mxu1 %v7823_v50  ;;  %v1679_v55 = vadd.f32 %v6527_v60, %v1678_v13 }
 0x871   :  { %v1690_v53 = vadd.f32 %v7240_v14, %v6527_v60  ;;  %v1681_v54 = vpop.f32.mrb[31].mxu0 }
 0x872   :  { %v1682_v56 = vadd.f32 %v6527_v60, %v1681_v54 }
 0x873   :  { %v7659_v57 = vpack.c.bf16 %v1690_v53, %v1687_v52  ;;  %7244 = vmatpush3.bf16.msra.mxu1 %v7823_v50 }
 0x874   :  { %v7653_v58 = vpack.c.bf16 %v1682_v56, %v1679_v55 }
 0x875   :  { %7661 = vmatprep.subr.msk.bf16.mxu1 %vm8225_vm3, %v7659_v57 }
 0x876   :  { %7655 = vmatprep.subr.msk.bf16.mxu0 %vm8225_vm3, %v7653_v58  ;;  %7246 = vmatmul.mubr.msk.bf16.vlgmr.msra.gmra.mrb[24].mxu1 %vm121_vm2, %v8201_v28 }
 0x877   :  { %7658 = vmatpush3.bf16.xpose.msk.msra.mxu0 %vm8225_vm3, %v7653_v58  ;;  %7260 = vmatprep.mubr.msk.f32.mxu1 %vm50_vm1, %v1613_v59 }
 0x87c   :  { %7664 = vmatpush3.bf16.xpose.msk.msra.mxu1 %vm8225_vm3, %v7659_v57  ;;  %v7825_v57 = vld [vmem:[%s9057_s3 + $0x38] sm:$0xff]  }
 0x87e   :  { %7254 = vmatmul.mubr.msk.f32.vlgmr.msra.gmra.mrb[32].mxu0 %vm50_vm1, %v1608_v16 }
 0x883   :  { %7261 = vmatmul.mubr.msk.f32.vlgmr.msra.gmra.mrb[28].mxu1 %vm50_vm1, %v1616_v18  ;;  %v7826_v18 = vld [vmem:[%s9057_s3 + $0xb0] sm:$0xff]  }
 0x949   :  { %v7247_v19 = vpop.f32.mrb[24].mxu1 }
 0x94a   :  { %v1752_v62 = vpop.f32.mrb[25].mxu1  ;;  %v1761_v0 = vadd.f32 %v7247_v19, %v6537_v61 }
 0x94b   :  { %v7248_v63 = vpop.f32.mrb[26].mxu1  ;;  %v1753_v3 = vadd.f32 %v6537_v61, %v1752_v62  ;;  %v6554_v62 = vld [vmem:[%s9060_s5 + $0x8] sm:$0xf] }
 0x94c   :  { %v1764_v1 = vadd.f32 %v7248_v63, %v6537_v61  ;;  %v1755_v2 = vpop.f32.mrb[27].mxu1  ;;  %v2162_v63 = vsel %vm57_vm0, %v6554_v62, 0 }
 0x94d   :  { %v1756_v4 = vadd.f32 %v6537_v61, %v1755_v2  ;;  %v7827_v61 = vld [vmem:[%s9057_s3 + $0xb8] sm:$0xff]  }
 0x94e   :  { %v7669_v5 = vpack.c.bf16 %v1764_v1, %v1761_v0  ;;  %v7828_v0 = vld [vmem:[%s9057_s3 + $0x70] sm:$0xff]  }
 0x94f   :  { %v7665_v6 = vpack.c.bf16 %v1756_v4, %v1753_v3 }
 0x950   :  { %7670 = vmatprep.subr.bf16.mxu1 %v7669_v5 }
 0x951   :  { %v7255_v7 = vpop.f32.mrb[32].mxu0  ;;  %7666 = vmatprep.subr.bf16.mxu0 %v7665_v6  ;;  %7672 = vmatpush3.bf16.msra.mxu1 %v7669_v5 }
 0x952   :  { %v1942_v8 = vmul.f32 0.35355338, %v7255_v7  ;;  %v1845_v9 = vpop.f32.mrb[33].mxu0  ;;  %7668 = vmatpush3.bf16.msra.mxu0 %v7665_v6  ;;  %7800 = vmatprep.subr.msk.bf16.mxu1 %vm57_vm0, %v6554_v62  ;;  %v6562_v6 = vld [vmem:[%s9059_s4 + $0x3] ss:$0 sm:$0xff] }
 0x953   :  { %v1941_v10 = vmul.f32 0.35355338, %v1845_v9  ;;  %7283 = vmatprep.subr.bf16.mxu0 %v7824_v51 }
 0x954   :  { %v1948_v11 = vsel %vm609_vm4, %v1942_v8, -inf }
 0x955   :  { %1949 = vmax.xlane.f32.xlu1 %v1948_v11  ;;  %v1945_v21 = vsel %vm609_vm4, %v1941_v10, -inf }
 0x956   :  { %1946 = vmax.xlane.f32.xlu0 %v1945_v21  ;;  %v7262_v23 = vpop.f32.mrb[28].mxu1 }
 0x957   :  { %v1944_v22 = vmul.f32 0.35355338, %v7262_v23  ;;  %v1932_v26 = vpop.f32.mrb[29].mxu1 }
 0x958   :  { %v1943_v29 = vmul.f32 0.35355338, %v1932_v26 }
 0x959   :  { %v1954_v30 = vsel %vm609_vm4, %v1944_v22, -inf }
 0x95a   :  { %1955 = vmax.xlane.f32.xlu1 %v1954_v30  ;;  %v1951_v31 = vsel %vm609_vm4, %v1943_v29, -inf }
 0x95b   :  { %1952 = vmax.xlane.f32.xlu0 %v1951_v31  ;;  %v6582_v31 = vld [vmem:[%s9059_s4 + $0xb] ss:$0 sm:$0xff] }
 0x9e2   :  { %v1950_v38 = vpop.xlane.xlu1 %1949 }
 0x9e3   :  { %v1958_v32 = vsub.f32 %v1942_v8, %v1950_v38  ;;  %v1947_v33 = vpop.xlane.xlu0 %1946  ;;  %v7829_v8 = vld [vmem:[%s9057_s3 + $0x78] sm:$0xff]  }
 0x9e4   :  { %v1957_v34 = vsub.f32 %v1941_v10, %v1947_v33 }
 0x9e5   :  { %v1963_v35 = vmul.f32 1.442695, %v1958_v32 }
 0x9e6   :  { %v1961_v36 = vmul.f32 1.442695, %v1957_v34 }
 0x9e7   :  { %7904 = vpow2.f32 %v1963_v35  ;;  %v1956_v37 = vpop.xlane.xlu1 %1955 }
 0x9e8   :  { %7906 = vpow2.f32 %v1961_v36  ;;  %v1960_v40 = vsub.f32 %v1944_v22, %v1956_v37  ;;  %v1953_v41 = vpop.xlane.xlu0 %1952 }
 0x9e9   :  { %v1959_v42 = vsub.f32 %v1943_v29, %v1953_v41 }
 0x9ea   :  { %v1967_v43 = vmul.f32 1.442695, %v1960_v40 }
 0x9eb   :  { %v1965_v44 = vmul.f32 1.442695, %v1959_v42  ;;  %v6572_v42 = vld [vmem:[%s9059_s4 + $0x7] ss:$0 sm:$0xff] }
 0x9ec   :  { %7908 = vpow2.f32 %v1967_v43 }
 0x9ed   :  { %7910 = vpow2.f32 %v1965_v44 }
 0x9f1   :  { %v7905_v45 = vpop.eup %7904 }
 0x9f2   :  { %v7907_v47 = vpop.eup %7906  ;;  %v1972_v25 = vsel %vm609_vm4, %v7905_v45, 0.0 }
 0x9f3   :  { %1973 = vadd.xlane.f32.xlu1 %v1972_v25  ;;  %v1969_v27 = vsel %vm609_vm4, %v7907_v47, 0.0 }
 0x9f4   :  { %1970 = vadd.xlane.f32.xlu0 %v1969_v27 }
 0x9f6   :  { %v7909_v39 = vpop.eup %7908 }
 0x9f7   :  { %v7911_v48 = vpop.eup %7910  ;;  %v1978_v49 = vsel %vm609_vm4, %v7909_v39, 0.0 }
 0x9f8   :  { %1979 = vadd.xlane.f32.xlu1 %v1978_v49  ;;  %v1975_v50 = vsel %vm609_vm4, %v7911_v48, 0.0 }
 0x9f9   :  { %1976 = vadd.xlane.f32.xlu0 %v1975_v50 }
 0xa80   :  { %v1974_v60 = vpop.xlane.xlu1 %1973 }
 0xa81   :  { %7912 = vrcp.f32 %v1974_v60  ;;  %v1971_v13 = vpop.xlane.xlu0 %1970 }
 0xa82   :  { %7914 = vrcp.f32 %v1971_v13 }
 0xa85   :  { %v1980_v14 = vpop.xlane.xlu1 %1979 }
 0xa86   :  { %7916 = vrcp.f32 %v1980_v14  ;;  %v1977_v52 = vpop.xlane.xlu0 %1976 }
 0xa87   :  { %7918 = vrcp.f32 %v1977_v52 }
 0xa8b   :  { %v7913_v53 = vpop.eup %7912 }
 0xa8c   :  { %v7915_v54 = vpop.eup %7914  ;;  %v1984_v56 = vmul.f32 %v7913_v53, %v7905_v45 }
 0xa8d   :  { %v1982_v55 = vmul.f32 %v7915_v54, %v7907_v47 }
 0xa8f   :  { %7267 = vmatprep.mubr.msk.f32.mxu0 %vm609_vm4, %v1982_v55 }
 0xa90   :  { %v7917_v58 = vpop.eup %7916  ;;  %7268 = vmatmul.mubr.msk.f32.vlgmr.msra.gmra.mrb[34].mxu0 %vm609_vm4, %v1984_v56 }
 0xa91   :  { %v7919_v59 = vpop.eup %7918  ;;  %7284 = vmatpush3.bf16.msra.mxu0 %v7824_v51  ;;  %7287 = vmatprep.mubr.msk.bf16.mxu0 %vm121_vm2, %v8195_v24  ;;  %v1988_v19 = vmul.f32 %v7917_v58, %v7909_v39 }
 0xa92   :  { %7285 = vmatprep.subr.bf16.mxu0 %v7825_v57  ;;  %v1986_v16 = vmul.f32 %v7919_v59, %v7911_v48 }
 0xa94   :  { %7274 = vmatprep.mubr.msk.f32.mxu1 %vm609_vm4, %v1986_v16 }
 0xa95   :  { %7286 = vmatpush3.bf16.msra.mxu0 %v7825_v57  ;;  %7275 = vmatmul.mubr.msk.f32.vlgmr.msra.gmra.mrb[30].mxu1 %vm609_vm4, %v1988_v19 }
 0xa96   :  { %7299 = vmatprep.subr.bf16.mxu0 %v7826_v18  ;;  %7278 = vmatpush3.bf16.msra.mxu1 %v2162_v63 }
 0xa97   :  { %7291 = vmatprep.subr.bf16.mxu1 %v7828_v0 }
 0xa98   :  { %7288 = vmatmul.mubr.msk.bf16.vlgmr.msra.gmra.mrb[36].mxu0 %vm121_vm2, %v8201_v28 }
 0xa99   :  { %7300 = vmatpush3.bf16.msra.mxu0 %v7826_v18  ;;  %7303 = vmatprep.mubr.msk.bf16.mxu0 %vm121_vm2, %v8195_v24 }
 0xa9a   :  { %7301 = vmatprep.subr.bf16.mxu0 %v7827_v61 }
 0xa9d   :  { %7302 = vmatpush3.bf16.msra.mxu0 %v7827_v61 }
 0xaa0   :  { %7304 = vmatmul.mubr.msk.bf16.vlgmr.msra.gmra.mrb[40].mxu0 %vm121_vm2, %v8201_v28 }
 0xb63   :  { %v7269_v1 = vpop.f32.mrb[34].mxu0 }
 0xb64   :  { %v2061_v2 = vpop.f32.mrb[35].mxu0 }
 0xb65   :  { %v2151_v3 = vpack.c.bf16 %v7269_v1, %v2061_v2 }
 0xb67   :  { %7279 = vmatprep.mubr.msk.bf16.mxu1 %vm50_vm1, %v2151_v3 }
 0xb68   :  { %v7276_v4 = vpop.f32.mrb[30].mxu1 }
 0xb69   :  { %v2142_v5 = vpop.f32.mrb[31].mxu1 }
 0xb6a   :  { %v2152_v7 = vpack.c.bf16 %v7276_v4, %v2142_v5 }
 0xb6b   :  { %v7289_v9 = vpop.f32.mrb[36].mxu0 }
 0xb6c   :  { %v2285_v10 = vadd.f32 %v7289_v9, %v6562_v6  ;;  %v2276_v11 = vpop.f32.mrb[37].mxu0  ;;  %7280 = vmatmul.mubr.msk.bf16.vlgmr.msra.gmra.mrb[20].mxu1 %vm50_vm1, %v2152_v7 }
 0xb6d   :  { %v7290_v21 = vpop.f32.mrb[38].mxu0  ;;  %7292 = vmatpush3.bf16.msra.mxu1 %v7828_v0  ;;  %7295 = vmatprep.mubr.msk.bf16.mxu1 %vm121_vm2, %v8195_v24  ;;  %v2277_v29 = vadd.f32 %v6562_v6, %v2276_v11 }
 0xb6e   :  { %v2288_v23 = vadd.f32 %v7290_v21, %v6562_v6  ;;  %v2279_v22 = vpop.f32.mrb[39].mxu0  ;;  %7318 = vmatprep.mubr.msk.f32.mxu0 %vm50_vm1, %v2285_v10  ;;  %7293 = vmatprep.subr.bf16.mxu1 %v7829_v8 }
 0xb6f   :  { %v2280_v26 = vadd.f32 %v6562_v6, %v2279_v22 }
 0xb71   :  { %7294 = vmatpush3.bf16.msra.mxu1 %v7829_v8 }
 0xb73   :  { %v7305_v30 = vpop.f32.mrb[40].mxu0 }
 0xb74   :  { %v2424_v38 = vpop.f32.mrb[41].mxu0  ;;  %7296 = vmatmul.mubr.msk.bf16.vlgmr.msra.gmra.mrb[32].mxu1 %vm121_vm2, %v8201_v28  ;;  %v2433_v24 = vadd.f32 %v7305_v30, %v6582_v31 }
 0xb75   :  { %v7306_v32 = vpop.f32.mrb[42].mxu0  ;;  %7311 = vmatprep.mubr.msk.f32.mxu1 %vm50_vm1, %v2277_v29  ;;  %v2425_v35 = vadd.f32 %v6582_v31, %v2424_v38 }
 0xb76   :  { %v2436_v33 = vadd.f32 %v7306_v32, %v6582_v31  ;;  %v2427_v34 = vpop.f32.mrb[43].mxu0 }
 0xb77   :  { %v2428_v36 = vadd.f32 %v6582_v31, %v2427_v34 }
 0xb78   :  { %v7689_v37 = vpack.c.bf16 %v2436_v33, %v2433_v24 }
 0xb79   :  { %v7685_v40 = vpack.c.bf16 %v2428_v36, %v2425_v35  ;;  %v6599_v35 = vld [vmem:[%s9060_s5 + $0xc] sm:$0xf] }
 0xb7a   :  { %v2834_v36 = vsel %vm57_vm0, %v6599_v35, 0 }
 0xc47   :  { %v7297_v41 = vpop.f32.mrb[32].mxu1 }
 0xc48   :  { %v2350_v43 = vpop.f32.mrb[33].mxu1  ;;  %v2359_v45 = vadd.f32 %v7297_v41, %v6572_v42 }
 0xc49   :  { %v7298_v44 = vpop.f32.mrb[34].mxu1  ;;  %v2351_v25 = vadd.f32 %v6572_v42, %v2350_v43 }
 0xc4a   :  { %v2362_v47 = vadd.f32 %v7298_v44, %v6572_v42  ;;  %v2353_v28 = vpop.f32.mrb[35].mxu1 }
 0xc4b   :  { %v2354_v27 = vadd.f32 %v6572_v42, %v2353_v28 }
 0xc4c   :  { %v7679_v39 = vpack.c.bf16 %v2362_v47, %v2359_v45  ;;  %v6602_v45 = vld [vmem:[%s9058_s6 + $0x2] ss:$0 sm:$0xff] }
 0xc4d   :  { %v7673_v48 = vpack.c.bf16 %v2354_v27, %v2351_v25 }
 0xc4e   :  { %7681 = vmatprep.subr.msk.bf16.mxu0 %vm8225_vm3, %v7679_v39 }
 0xc4f   :  { %7675 = vmatprep.subr.msk.bf16.mxu1 %vm8225_vm3, %v7673_v48  ;;  %7684 = vmatpush3.bf16.xpose.msk.msra.mxu0 %vm8225_vm3, %v7679_v39 }
 0xc50   :  { %7678 = vmatpush3.bf16.xpose.msk.msra.mxu1 %vm8225_vm3, %v7673_v48  ;;  %7690 = vmatprep.subr.bf16.mxu0 %v7689_v37 }
 0xc51   :  { %7686 = vmatprep.subr.bf16.mxu1 %v7685_v40 }
 0xc56   :  { %7319 = vmatmul.mubr.msk.f32.vlgmr.msra.gmra.mrb[44].mxu0 %vm50_vm1, %v2288_v23 }
 0xc57   :  { %7312 = vmatmul.mubr.msk.f32.vlgmr.msra.gmra.mrb[36].mxu1 %vm50_vm1, %v2280_v26  ;;  %7692 = vmatpush3.bf16.msra.mxu0 %v7689_v37 }
 0xc58   :  { %7688 = vmatpush3.bf16.msra.mxu1 %v7685_v40 }
 0xc59   :  { %7801 = vmatprep.subr.msk.bf16.mxu1 %vm57_vm0, %v6599_v35 }
 0xd29   :  { %v7320_v49 = vpop.f32.mrb[44].mxu0 }
 0xd2a   :  { %v7313_v50 = vpop.f32.mrb[36].mxu1  ;;  %v2604_v51 = vpop.f32.mrb[45].mxu0  ;;  %v2616_v52 = vmul.f32 0.35355338, %v7320_v49 }
 0xd2b   :  { %v2614_v60 = vmul.f32 0.35355338, %v7313_v50  ;;  %v2517_v13 = vpop.f32.mrb[37].mxu1  ;;  %v2615_v54 = vmul.f32 0.35355338, %v2604_v51 }
 0xd2c   :  { %v2613_v14 = vmul.f32 0.35355338, %v2517_v13  ;;  %v2626_v56 = vsel %vm609_vm4, %v2616_v52, -inf }
 0xd2d   :  { %v2620_v53 = vsel %vm609_vm4, %v2614_v60, -inf  ;;  %v2623_v57 = vsel %vm609_vm4, %v2615_v54, -inf }
 0xd2e   :  { %2621 = vmax.xlane.f32.xlu1 %v2620_v53  ;;  %v2617_v55 = vsel %vm609_vm4, %v2613_v14, -inf }
 0xd2f   :  { %2618 = vmax.xlane.f32.xlu0 %v2617_v55 }
 0xd32   :  { %2627 = vmax.xlane.f32.xlu1 %v2626_v56 }
 0xd33   :  { %2624 = vmax.xlane.f32.xlu0 %v2623_v57 }
 0xdbb   :  { %v2622_v58 = vpop.xlane.xlu1 %2621 }
 0xdbc   :  { %v2630_v59 = vsub.f32 %v2614_v60, %v2622_v58  ;;  %v2619_v16 = vpop.xlane.xlu0 %2618 }
 0xdbd   :  { %v2629_v18 = vsub.f32 %v2613_v14, %v2619_v16  ;;  %v7830_v16 = vld [vmem:[%s9061_s8] sm:$0xff]  }
 0xdbe   :  { %v2635_v19 = vmul.f32 1.442695, %v2630_v59  ;;  %7341 = vmatprep.subr.bf16.mxu0 %v7830_v16 }
 0xdbf   :  { %v2633_v61 = vmul.f32 1.442695, %v2629_v18  ;;  %v2628_v62 = vpop.xlane.xlu1 %2627  ;;  %v7831_v18 = vld [vmem:[%s9061_s8 + $0x8] sm:$0xff]  }
 0xdc0   :  { %7920 = vpow2.f32 %v2635_v19  ;;  %v2632_v63 = vsub.f32 %v2616_v52, %v2628_v62  ;;  %v2625_v0 = vpop.xlane.xlu0 %2624 }
 0xdc1   :  { %7922 = vpow2.f32 %v2633_v61  ;;  %v2631_v1 = vsub.f32 %v2615_v54, %v2625_v0 }
 0xdc2   :  { %v2639_v2 = vmul.f32 1.442695, %v2632_v63 }
 0xdc3   :  { %v2637_v3 = vmul.f32 1.442695, %v2631_v1 }
 0xdc4   :  { %7924 = vpow2.f32 %v2639_v2 }
 0xdc5   :  { %7926 = vpow2.f32 %v2637_v3 }
 0xdca   :  { %v7921_v4 = vpop.eup %7920 }
 0xdcb   :  { %v7923_v5 = vpop.eup %7922  ;;  %v2644_v6 = vsel %vm609_vm4, %v7921_v4, 0.0 }
 0xdcc   :  { %2645 = vadd.xlane.f32.xlu1 %v2644_v6  ;;  %v2641_v7 = vsel %vm609_vm4, %v7923_v5, 0.0 }
 0xdcd   :  { %2642 = vadd.xlane.f32.xlu0 %v2641_v7 }
 0xdce   :  { %v7925_v8 = vpop.eup %7924 }
 0xdcf   :  { %v7927_v9 = vpop.eup %7926  ;;  %v2650_v10 = vsel %vm609_vm4, %v7925_v8, 0.0 }
 0xdd0   :  { %2651 = vadd.xlane.f32.xlu1 %v2650_v10  ;;  %v2647_v11 = vsel %vm609_vm4, %v7927_v9, 0.0 }
 0xdd1   :  { %2648 = vadd.xlane.f32.xlu0 %v2647_v11 }
 0xe59   :  { %v2646_v21 = vpop.xlane.xlu1 %2645 }
 0xe5a   :  { %7928 = vrcp.f32 %v2646_v21  ;;  %v2643_v23 = vpop.xlane.xlu0 %2642 }
 0xe5b   :  { %7930 = vrcp.f32 %v2643_v23 }
 0xe5d   :  { %v2652_v22 = vpop.xlane.xlu1 %2651 }
 0xe5e   :  { %7932 = vrcp.f32 %v2652_v22  ;;  %v2649_v26 = vpop.xlane.xlu0 %2648 }
 0xe5f   :  { %7934 = vrcp.f32 %v2649_v26 }
 0xe64   :  { %v7929_v29 = vpop.eup %7928 }
 0xe65   :  { %v7931_v30 = vpop.eup %7930  ;;  %v2656_v38 = vmul.f32 %v7929_v29, %v7921_v4 }
 0xe66   :  { %v2654_v31 = vmul.f32 %v7931_v30, %v7923_v5 }
 0xe68   :  { %v7933_v32 = vpop.eup %7932  ;;  %7325 = vmatprep.mubr.msk.f32.mxu1 %vm609_vm4, %v2654_v31 }
 0xe69   :  { %v7935_v24 = vpop.eup %7934  ;;  %7326 = vmatmul.mubr.msk.f32.vlgmr.msra.gmra.mrb[38].mxu1 %vm609_vm4, %v2656_v38  ;;  %v2660_v34 = vmul.f32 %v7933_v32, %v7925_v8 }
 0xe6a   :  { %v2658_v33 = vmul.f32 %v7935_v24, %v7927_v9  ;;  %7336 = vmatpush3.bf16.msra.mxu1 %v2834_v36 }
 0xe6c   :  { %7332 = vmatprep.mubr.msk.f32.mxu0 %vm609_vm4, %v2658_v33 }
 0xe6d   :  { %7333 = vmatmul.mubr.msk.f32.vlgmr.msra.gmra.mrb[46].mxu0 %vm609_vm4, %v2660_v34 }
 0xe6e   :  { %7342 = vmatpush3.bf16.msra.mxu0 %v7830_v16 }
 0xe6f   :  { %7343 = vmatprep.subr.bf16.mxu0 %v7831_v18 }
 0xe72   :  { %7344 = vmatpush3.bf16.msra.mxu0 %v7831_v18 }
 0xf3c   :  { %v7327_v37 = vpop.f32.mrb[38].mxu1 }
 0xf3d   :  { %v2733_v40 = vpop.f32.mrb[39].mxu1 }
 0xf3e   :  { %v2823_v41 = vpack.c.bf16 %v7327_v37, %v2733_v40  ;;  %v6603_v37 = vld [vmem:[%s9058_s6 + $0x3] ss:$0 sm:$0xff] }
 0xf40   :  { %v7334_v42 = vpop.f32.mrb[46].mxu0  ;;  %7337 = vmatprep.mubr.msk.bf16.mxu1 %vm50_vm1, %v2823_v41 }
 0xf41   :  { %v2814_v43 = vpop.f32.mrb[47].mxu0 }
 0xf42   :  { %v2824_v44 = vpack.c.bf16 %v7334_v42, %v2814_v43 }
 0xf44   :  { %7338 = vmatmul.mubr.msk.bf16.vlgmr.msra.gmra.mrb[20].mxu1 %vm50_vm1, %v2824_v44 }
0x1017   :  { %v7339_v47 = vpop.f32.mrb[20].mxu1 }
0x1018   :  { %v2891_v28 = vadd.f32 %v7339_v47, %v8136_v12  ;;  %v2870_v25 = vpop.f32.mrb[21].mxu1 }
0x1019   :  { %v2889_v27 = vadd.f32 %v2870_v25, %v8141_v15  ;;  %v7340_v39 = vpop.f32.mrb[22].mxu1 }
0x101a   :  { %v8515_v48 = vadd.f32 %v6602_v45, %v2891_v28  ;;  %v2892_v49 = vadd.f32 %v7340_v39, %v8143_v17  ;;  %v2873_v50 = vpop.f32.mrb[23].mxu1  ;;  %v6604_v28 = vld [vmem:[%s9058_s6 + $0x4] ss:$0 sm:$0xff] }
0x101b   :  { %v2890_v51 = vadd.f32 %v2873_v50, %v8147_v20  ;;  %v8519_v60 = vadd.f32 %v6602_v45, %v2889_v27 }
0x101c   :  { %v8521_v13 = vadd.f32 %v6602_v45, %v2892_v49  ;;  %v2909_v14 = vsel %vm121_vm2, %v8515_v48, 0.0  ;;  %v2921_v55 = vmul.f32 %v8515_v48, %v8515_v48 }
0x101d   :  { %2910 = vadd.xlane.f32.xlu0 %v2909_v14  ;;  %v8525_v12 = vadd.f32 %v6602_v45, %v2890_v51  ;;  %v2903_v17 = vsel %vm121_vm2, %v8519_v60, 0.0  ;;  %v2919_v20 = vmul.f32 %v8519_v60, %v8519_v60 }
0x101e   :  { %v2912_v15 = vsel %vm121_vm2, %v8521_v13, 0.0  ;;  %v2922_v57 = vmul.f32 %v8521_v13, %v8521_v13  ;;  %v2929_v58 = vsel %vm121_vm2, %v2921_v55, 0.0  ;;  %v7832_v55 = vld [vmem:[%s9061_s8 + $0x10] sm:$0xff]  }
0x101f   :  { %2913 = vadd.xlane.f32.xlu1 %v2912_v15  ;;  %v2906_v52 = vsel %vm121_vm2, %v8525_v12, 0.0  ;;  %v2920_v53 = vmul.f32 %v8525_v12, %v8525_v12  ;;  %v2923_v54 = vsel %vm121_vm2, %v2919_v20, 0.0  ;;  %7349 = vmatprep.subr.bf16.mxu1 %v7832_v55 }
0x1020   :  { %v2932_v59 = vsel %vm121_vm2, %v2922_v57, 0.0  ;;  %7350 = vmatpush3.bf16.xpose.msra.mxu1 %v7832_v55  ;;  %v6605_v57 = vld [vmem:[%s9062_s7] ss:$0 sm:$0xff] }
0x1021   :  { %2904 = vadd.xlane.f32.xlu0 %v2903_v17  ;;  %v2926_v56 = vsel %vm121_vm2, %v2920_v53, 0.0 }
0x1023   :  { %2907 = vadd.xlane.f32.xlu1 %v2906_v52 }
0x1025   :  { %2924 = vadd.xlane.f32.xlu0 %v2923_v54 }
0x1027   :  { %2927 = vadd.xlane.f32.xlu1 %v2926_v56  ;;  %v7833_v56 = vld [vmem:[%s9061_s8 + $0x18] sm:$0xff]  }
0x1028   :  { %7351 = vmatprep.subr.bf16.mxu1 %v7833_v56 }
0x1029   :  { %2930 = vadd.xlane.f32.xlu0 %v2929_v58  ;;  %7352 = vmatpush3.bf16.xpose.msra.mxu1 %v7833_v56 }
0x102b   :  { %2933 = vadd.xlane.f32.xlu1 %v2932_v59 }
0x10aa   :  { %v2911_v19 = vpop.xlane.xlu0 %2910 }
0x10ab   :  { %v2917_v3 = vmul.f32 0.03125, %v2911_v19 }
0x10ac   :  { %v2914_v61 = vpop.xlane.xlu1 %2913 }
0x10ad   :  { %v2918_v6 = vmul.f32 0.03125, %v2914_v61  ;;  %v2941_v21 = vmul.f32 %v2917_v3, %v2917_v3  ;;  %v2949_v43 = vsub.f32 %v8515_v48, %v2917_v3 }
0x10ae   :  { %v2905_v62 = vpop.xlane.xlu0 %2904 }
0x10af   :  { %v2915_v63 = vmul.f32 0.03125, %v2905_v62  ;;  %v2942_v29 = vmul.f32 %v2918_v6, %v2918_v6  ;;  %v2950_v25 = vsub.f32 %v8521_v13, %v2918_v6 }
0x10b0   :  { %v2908_v0 = vpop.xlane.xlu1 %2907 }
0x10b1   :  { %v2916_v1 = vmul.f32 0.03125, %v2908_v0  ;;  %v2939_v4 = vmul.f32 %v2915_v63, %v2915_v63  ;;  %v2947_v35 = vsub.f32 %v8519_v60, %v2915_v63 }
0x10b2   :  { %v2925_v2 = vpop.xlane.xlu0 %2924 }
0x10b3   :  { %v2935_v5 = vmul.f32 0.03125, %v2925_v2  ;;  %v2940_v8 = vmul.f32 %v2916_v1, %v2916_v1  ;;  %v2948_v40 = vsub.f32 %v8525_v12, %v2916_v1 }
0x10b4   :  { %v2928_v7 = vpop.xlane.xlu1 %2927 }
0x10b5   :  { %v2943_v9 = vsub.f32 %v2935_v5, %v2939_v4  ;;  %v2936_v10 = vmul.f32 0.03125, %v2928_v7 }
0x10b6   :  { %v2931_v11 = vpop.xlane.xlu0 %2930 }
0x10b7   :  { %v2951_v23 = vadd.f32 1e-05, %v2943_v9  ;;  %v2944_v22 = vsub.f32 %v2936_v10, %v2940_v8  ;;  %v2937_v26 = vmul.f32 0.03125, %v2931_v11 }
0x10b8   :  { %v2934_v30 = vpop.xlane.xlu1 %2933 }
0x10b9   :  { %7936 = vrsqrt.f32 %v2951_v23  ;;  %v2952_v31 = vadd.f32 1e-05, %v2944_v22  ;;  %v2945_v38 = vsub.f32 %v2937_v26, %v2941_v21  ;;  %v2938_v32 = vmul.f32 0.03125, %v2934_v30 }
0x10bb   :  { %7938 = vrsqrt.f32 %v2952_v31  ;;  %v2953_v24 = vadd.f32 1e-05, %v2945_v38  ;;  %v2946_v33 = vsub.f32 %v2938_v32, %v2942_v29 }
0x10bd   :  { %7940 = vrsqrt.f32 %v2953_v24  ;;  %v2954_v34 = vadd.f32 1e-05, %v2946_v33 }
0x10bf   :  { %7942 = vrsqrt.f32 %v2954_v34 }
0x10c3   :  { %v7937_v36 = vpop.eup %7936 }
0x10c4   :  { %v2959_v41 = vmul.f32 %v7937_v36, %v2947_v35 }
0x10c5   :  { %v7939_v42 = vpop.eup %7938 }
0x10c6   :  { %v2960_v44 = vmul.f32 %v7939_v42, %v2948_v40  ;;  %v2969_v45 = vmul.f32 %v6603_v37, %v2959_v41 }
0x10c7   :  { %v7941_v47 = vpop.eup %7940 }
0x10c8   :  { %v2961_v27 = vmul.f32 %v7941_v47, %v2949_v43  ;;  %v2970_v39 = vmul.f32 %v6603_v37, %v2960_v44  ;;  %v2979_v51 = vadd.f32 %v6604_v28, %v2969_v45 }
0x10c9   :  { %v7943_v49 = vpop.eup %7942 }
0x10ca   :  { %v2962_v50 = vmul.f32 %v7943_v49, %v2950_v25  ;;  %v2980_v14 = vadd.f32 %v6604_v28, %v2970_v39  ;;  %v2971_v15 = vmul.f32 %v6603_v37, %v2961_v27  ;;  %v6616_v49 = vld [vmem:[%s9058_s6 + $0x5] ss:$0 sm:$0xff] }
0x10cc   :  { %v2983_v17 = vpack.c.bf16 %v2980_v14, %v2979_v51  ;;  %v2972_v20 = vmul.f32 %v6603_v37, %v2962_v50  ;;  %v2981_v52 = vadd.f32 %v6604_v28, %v2971_v15 }
0x10ce   :  { %7345 = vmatprep.mubr.msk.bf16.mxu0 %vm121_vm2, %v2983_v17  ;;  %v2982_v53 = vadd.f32 %v6604_v28, %v2972_v20 }
0x10d0   :  { %v2984_v54 = vpack.c.bf16 %v2982_v53, %v2981_v52 }
0x10d2   :  { %7346 = vmatmul.mubr.msk.bf16.vlgmr.msra.gmra.mrb[48].mxu0 %vm121_vm2, %v2984_v54 }
0x11a5   :  { %v7347_v58 = vpop.f32.mrb[48].mxu0 }
0x11a6   :  { %v3057_v59 = vadd.f32 %v7347_v58, %v6605_v57  ;;  %v3048_v16 = vpop.f32.mrb[49].mxu0 }
0x11a7   :  { %v3049_v18 = vadd.f32 %v6605_v57, %v3048_v16  ;;  %v7348_v19 = vpop.f32.mrb[50].mxu0 }
0x11a8   :  { %v3065_v61 = vmul.f32 %v3057_v59, %v3057_v59  ;;  %v3060_v62 = vadd.f32 %v7348_v19, %v6605_v57  ;;  %v3051_v63 = vpop.f32.mrb[51].mxu0 }
0x11a9   :  { %v3063_v0 = vmul.f32 %v3049_v18, %v3049_v18  ;;  %v3052_v1 = vadd.f32 %v6605_v57, %v3051_v63 }
0x11aa   :  { %v3069_v2 = vmul.f32 %v3065_v61, %v3057_v59  ;;  %v3066_v3 = vmul.f32 %v3060_v62, %v3060_v62 }
0x11ab   :  { %v3067_v4 = vmul.f32 %v3063_v0, %v3049_v18  ;;  %v3064_v5 = vmul.f32 %v3052_v1, %v3052_v1  ;;  %v7834_v0 = vld [vmem:[%s9057_s3 + $0xc0] sm:$0xff]  }
0x11ac   :  { %v3073_v6 = vmul.f32 0.044715, %v3069_v2  ;;  %v3070_v7 = vmul.f32 %v3066_v3, %v3060_v62  ;;  %7357 = vmatprep.subr.bf16.mxu0 %v7834_v0  ;;  %v7836_v2 = vld [vmem:[%s9057_s3 + $0xc8] sm:$0xff]  }
0x11ad   :  { %v3071_v8 = vmul.f32 0.044715, %v3067_v4  ;;  %v3068_v9 = vmul.f32 %v3064_v5, %v3052_v1  ;;  %7358 = vmatpush3.bf16.msra.mxu0 %v7834_v0  ;;  %v7837_v3 = vld [vmem:[%s9057_s3 + $0x148] sm:$0xff]   ;;  %v8622_v4 = vld [vmem:[%s9057_s3 + $0x100] sm:$0xff]  }
0x11ae   :  { %v3077_v10 = vadd.f32 %v3073_v6, %v3057_v59  ;;  %v3074_v11 = vmul.f32 0.044715, %v3070_v7  ;;  %7359 = vmatprep.subr.bf16.mxu0 %v7836_v2 }
0x11af   :  { %v3075_v21 = vadd.f32 %v3071_v8, %v3049_v18  ;;  %v3072_v23 = vmul.f32 0.044715, %v3068_v9 }
0x11b0   :  { %v3081_v22 = vmul.f32 0.7978846, %v3077_v10  ;;  %v3078_v26 = vadd.f32 %v3074_v11, %v3060_v62 }
0x11b1   :  { %v3079_v29 = vmul.f32 0.7978846, %v3075_v21  ;;  %v3076_v30 = vadd.f32 %v3072_v23, %v3052_v1  ;;  %7360 = vmatpush3.bf16.msra.mxu0 %v7836_v2  ;;  %v6650_v2 = vld [vmem:[%s9059_s4 + $0x14] ss:$0 sm:$0xff] }
0x11b2   :  { %7944 = vtanh.f32 %v3081_v22  ;;  %v3082_v31 = vmul.f32 0.7978846, %v3078_v26  ;;  %7365 = vmatprep.subr.bf16.mxu0 %v8622_v4 }
0x11b3   :  { %7946 = vtanh.f32 %v3079_v29  ;;  %v3080_v38 = vmul.f32 0.7978846, %v3076_v30 }
0x11b4   :  { %7948 = vtanh.f32 %v3082_v31 }
0x11b5   :  { %7950 = vtanh.f32 %v3080_v38 }
0x11bc   :  { %v7945_v32 = vpop.eup %7944 }
0x11bd   :  { %v7947_v24 = vpop.eup %7946  ;;  %v3089_v33 = vadd.f32 1.0, %v7945_v32 }
0x11be   :  { %v7949_v34 = vpop.eup %7948  ;;  %v3087_v35 = vadd.f32 1.0, %v7947_v24 }
0x11bf   :  { %v7951_v36 = vpop.eup %7950  ;;  %v3093_v37 = vmul.f32 0.5, %v3089_v33  ;;  %v3090_v40 = vadd.f32 1.0, %v7949_v34 }
0x11c0   :  { %v3088_v41 = vadd.f32 1.0, %v7951_v36  ;;  %v3091_v42 = vmul.f32 0.5, %v3087_v35 }
0x11c1   :  { %v3094_v43 = vmul.f32 0.5, %v3090_v40  ;;  %v3097_v45 = vmul.f32 %v3093_v37, %v3057_v59 }
0x11c2   :  { %v3092_v44 = vmul.f32 0.5, %v3088_v41  ;;  %v3095_v28 = vmul.f32 %v3091_v42, %v3049_v18 }
0x11c3   :  { %v3098_v47 = vmul.f32 %v3094_v43, %v3060_v62 }
0x11c4   :  { %v3096_v25 = vmul.f32 %v3092_v44, %v3052_v1  ;;  %v7835_v1 = vld [vmem:[%s9057_s3 + $0x140] sm:$0xff]  }
0x11c5   :  { %v3100_v27 = vpack.c.bf16 %v3098_v47, %v3097_v45  ;;  %7373 = vmatprep.subr.bf16.mxu1 %v7835_v1 }
0x11c6   :  { %v3099_v39 = vpack.c.bf16 %v3096_v25, %v3095_v28  ;;  %v6623_v25 = vld [vmem:[%s9058_s6 + $0x6] ss:$0 sm:$0xff] }
0x11c8   :  { %7353 = vmatprep.mubr.bf16.mxu1 %v3099_v39 }
0x11c9   :  { %7354 = vmatmul.mubr.bf16.vlgmr.msra.gmra.mrb[40].mxu1 %v3100_v27 }
0x11ca   :  { %7374 = vmatpush3.bf16.msra.mxu1 %v7835_v1 }
0x11cb   :  { %7375 = vmatprep.subr.bf16.mxu1 %v7837_v3 }
0x11ce   :  { %7376 = vmatpush3.bf16.msra.mxu1 %v7837_v3 }
0x129c   :  { %v7355_v50 = vpop.f32.mrb[40].mxu1 }
0x129d   :  { %v3169_v51 = vadd.f32 %v7355_v50, %v8515_v48  ;;  %v3152_v14 = vpop.f32.mrb[41].mxu1 }
0x129e   :  { %v3167_v15 = vadd.f32 %v3152_v14, %v8519_v60  ;;  %v7356_v17 = vpop.f32.mrb[42].mxu1 }
0x129f   :  { %v8577_v20 = vadd.f32 %v6616_v49, %v3169_v51  ;;  %v3170_v52 = vadd.f32 %v7356_v17, %v8521_v13  ;;  %v3155_v53 = vpop.f32.mrb[43].mxu1  ;;  %v6624_v17 = vld [vmem:[%s9058_s6 + $0x7] ss:$0 sm:$0xff] }
0x12a0   :  { %v3168_v54 = vadd.f32 %v3155_v53, %v8525_v12  ;;  %v8581_v55 = vadd.f32 %v6616_v49, %v3167_v15 }
0x12a1   :  { %v8583_v56 = vadd.f32 %v6616_v49, %v3170_v52  ;;  %v3199_v57 = vsel %vm121_vm2, %v8577_v20, 0.0  ;;  %v3211_v18 = vmul.f32 %v8577_v20, %v8577_v20 }
0x12a2   :  { %3200 = vadd.xlane.f32.xlu0 %v3199_v57  ;;  %v8587_v48 = vadd.f32 %v6616_v49, %v3168_v54  ;;  %v3193_v13 = vsel %vm121_vm2, %v8581_v55, 0.0  ;;  %v3209_v12 = vmul.f32 %v8581_v55, %v8581_v55 }
0x12a3   :  { %v3202_v60 = vsel %vm121_vm2, %v8583_v56, 0.0  ;;  %v3212_v61 = vmul.f32 %v8583_v56, %v8583_v56  ;;  %v3219_v62 = vsel %vm121_vm2, %v3211_v18, 0.0 }
0x12a4   :  { %3203 = vadd.xlane.f32.xlu1 %v3202_v60  ;;  %v3196_v58 = vsel %vm121_vm2, %v8587_v48, 0.0  ;;  %v3210_v59 = vmul.f32 %v8587_v48, %v8587_v48  ;;  %v3213_v16 = vsel %vm121_vm2, %v3209_v12, 0.0 }
0x12a5   :  { %v3222_v63 = vsel %vm121_vm2, %v3212_v61, 0.0 }
0x12a6   :  { %3194 = vadd.xlane.f32.xlu0 %v3193_v13  ;;  %v3216_v19 = vsel %vm121_vm2, %v3210_v59, 0.0 }
0x12a8   :  { %3197 = vadd.xlane.f32.xlu1 %v3196_v58 }
0x12aa   :  { %3214 = vadd.xlane.f32.xlu0 %v3213_v16 }
0x12ac   :  { %3217 = vadd.xlane.f32.xlu1 %v3216_v19 }
0x12ae   :  { %3220 = vadd.xlane.f32.xlu0 %v3219_v62  ;;  %v7839_v62 = vld [vmem:[%s9057_s3 + $0x108] sm:$0xff]  }
0x12b0   :  { %3223 = vadd.xlane.f32.xlu1 %v3222_v63  ;;  %v6630_v63 = vld [vmem:[%s9059_s4 + $0xc] ss:$0 sm:$0xff] }
0x132f   :  { %v3201_v5 = vpop.xlane.xlu0 %3200 }
0x1330   :  { %v3207_v21 = vmul.f32 0.03125, %v3201_v5 }
0x1331   :  { %v3204_v6 = vpop.xlane.xlu1 %3203 }
0x1332   :  { %v3208_v26 = vmul.f32 0.03125, %v3204_v6  ;;  %v3231_v24 = vmul.f32 %v3207_v21, %v3207_v21  ;;  %v3239_v50 = vsub.f32 %v8577_v20, %v3207_v21 }
0x1333   :  { %v3195_v7 = vpop.xlane.xlu0 %3194 }
0x1334   :  { %v3205_v8 = vmul.f32 0.03125, %v3195_v7  ;;  %v3232_v36 = vmul.f32 %v3208_v26, %v3208_v26  ;;  %v3240_v52 = vsub.f32 %v8583_v56, %v3208_v26 }
0x1335   :  { %v3198_v9 = vpop.xlane.xlu1 %3197 }
0x1336   :  { %v3206_v10 = vmul.f32 0.03125, %v3198_v9  ;;  %v3229_v23 = vmul.f32 %v3205_v8, %v3205_v8  ;;  %v3237_v47 = vsub.f32 %v8581_v55, %v3205_v8 }
0x1337   :  { %v3215_v11 = vpop.xlane.xlu0 %3214 }
0x1338   :  { %v3225_v22 = vmul.f32 0.03125, %v3215_v11  ;;  %v3230_v30 = vmul.f32 %v3206_v10, %v3206_v10  ;;  %v3238_v27 = vsub.f32 %v8587_v48, %v3206_v10 }
0x1339   :  { %v3218_v29 = vpop.xlane.xlu1 %3217 }
0x133a   :  { %v3233_v31 = vsub.f32 %v3225_v22, %v3229_v23  ;;  %v3226_v38 = vmul.f32 0.03125, %v3218_v29 }
0x133b   :  { %v3221_v32 = vpop.xlane.xlu0 %3220 }
0x133c   :  { %v3241_v33 = vadd.f32 1e-05, %v3233_v31  ;;  %v3234_v34 = vsub.f32 %v3226_v38, %v3230_v30  ;;  %v3227_v35 = vmul.f32 0.03125, %v3221_v32  ;;  %v6640_v31 = vld [vmem:[%s9059_s4 + $0x10] ss:$0 sm:$0xff] }
0x133d   :  { %v3224_v37 = vpop.xlane.xlu1 %3223 }
0x133e   :  { %7952 = vrsqrt.f32 %v3241_v33  ;;  %v3242_v40 = vadd.f32 1e-05, %v3234_v34  ;;  %v3235_v41 = vsub.f32 %v3227_v35, %v3231_v24  ;;  %v3228_v42 = vmul.f32 0.03125, %v3224_v37 }
0x1340   :  { %7954 = vrsqrt.f32 %v3242_v40  ;;  %v3243_v43 = vadd.f32 1e-05, %v3235_v41  ;;  %v3236_v44 = vsub.f32 %v3228_v42, %v3232_v36 }
0x1342   :  { %7956 = vrsqrt.f32 %v3243_v43  ;;  %v3244_v45 = vadd.f32 1e-05, %v3236_v44 }
0x1344   :  { %7958 = vrsqrt.f32 %v3244_v45 }
0x1348   :  { %v7953_v28 = vpop.eup %7952 }
0x1349   :  { %v3249_v39 = vmul.f32 %v7953_v28, %v3237_v47 }
0x134a   :  { %v7955_v49 = vpop.eup %7954 }
0x134b   :  { %v3259_v51 = vmul.f32 %v6623_v25, %v3249_v39  ;;  %v3250_v14 = vmul.f32 %v7955_v49, %v3238_v27 }
0x134c   :  { %v7957_v15 = vpop.eup %7956 }
0x134d   :  { %v3260_v53 = vmul.f32 %v6623_v25, %v3250_v14  ;;  %v3251_v54 = vmul.f32 %v7957_v15, %v3239_v50  ;;  %v3269_v60 = vadd.f32 %v6624_v17, %v3259_v51 }
0x134e   :  { %v7959_v57 = vpop.eup %7958 }
0x134f   :  { %v3270_v13 = vadd.f32 %v6624_v17, %v3260_v53  ;;  %v3261_v12 = vmul.f32 %v6623_v25, %v3251_v54  ;;  %v3252_v58 = vmul.f32 %v7959_v57, %v3240_v52 }
0x1351   :  { %v8635_v59 = vpack.c.bf16 %v3270_v13, %v3269_v60  ;;  %v3262_v16 = vmul.f32 %v6623_v25, %v3252_v58  ;;  %v3271_v18 = vadd.f32 %v6624_v17, %v3261_v12 }
0x1353   :  { %v3272_v19 = vadd.f32 %v6624_v17, %v3262_v16  ;;  %7361 = vmatprep.mubr.msk.bf16.mxu0 %vm121_vm2, %v8635_v59  ;;  %7377 = vmatprep.mubr.msk.bf16.mxu1 %vm121_vm2, %v8635_v59 }
0x1355   :  { %v8641_v61 = vpack.c.bf16 %v3272_v19, %v3271_v18 }
0x1357   :  { %7362 = vmatmul.mubr.msk.bf16.vlgmr.msra.gmra.mrb[52].mxu0 %vm121_vm2, %v8641_v61  ;;  %7378 = vmatmul.mubr.msk.bf16.vlgmr.msra.gmra.mrb[44].mxu1 %vm121_vm2, %v8641_v61 }
0x1358   :  { %7366 = vmatpush3.bf16.msra.mxu0 %v8622_v4  ;;  %7369 = vmatprep.mubr.msk.bf16.mxu0 %vm121_vm2, %v8635_v59 }
0x1359   :  { %7367 = vmatprep.subr.bf16.mxu0 %v7839_v62 }
0x135c   :  { %7368 = vmatpush3.bf16.msra.mxu0 %v7839_v62 }
0x135f   :  { %7370 = vmatmul.mubr.msk.bf16.vlgmr.msra.gmra.mrb[56].mxu0 %vm121_vm2, %v8641_v61 }
0x142a   :  { %v7363_v0 = vpop.f32.mrb[52].mxu0  ;;  %v7379_v1 = vpop.f32.mrb[44].mxu1 }
0x142b   :  { %v3349_v3 = vadd.f32 %v7363_v0, %v6630_v63  ;;  %v3340_v4 = vpop.f32.mrb[53].mxu0  ;;  %v3488_v5 = vpop.f32.mrb[45].mxu1  ;;  %v3497_v9 = vadd.f32 %v7379_v1, %v6650_v2 }
0x142c   :  { %v3341_v6 = vadd.f32 %v6630_v63, %v3340_v4  ;;  %v7364_v7 = vpop.f32.mrb[54].mxu0  ;;  %v7380_v8 = vpop.f32.mrb[46].mxu1  ;;  %v3489_v23 = vadd.f32 %v6650_v2, %v3488_v5  ;;  %v7840_v5 = vld [vmem:[%s9057_s3 + $0x110] sm:$0xff]  }
0x142d   :  { %v3500_v10 = vadd.f32 %v7380_v8, %v6650_v2  ;;  %v3343_v11 = vpop.f32.mrb[55].mxu0  ;;  %v3491_v21 = vpop.f32.mrb[47].mxu1  ;;  %7392 = vmatprep.mubr.msk.f32.mxu1 %vm50_vm1, %v3349_v3  ;;  %v3352_v41 = vadd.f32 %v7364_v7, %v6630_v63 }
0x142e   :  { %v3492_v22 = vadd.f32 %v6650_v2, %v3491_v21  ;;  %7385 = vmatprep.mubr.msk.f32.mxu0 %vm50_vm1, %v3341_v6  ;;  %v3344_v42 = vadd.f32 %v6630_v63, %v3343_v11  ;;  %v7841_v6 = vld [vmem:[%s9057_s3 + $0xd0] sm:$0xff]  }
0x142f   :  { %v7709_v26 = vpack.c.bf16 %v3500_v10, %v3497_v9 }
0x1430   :  { %v7705_v29 = vpack.c.bf16 %v3492_v22, %v3489_v23 }
0x1432   :  { %v7371_v30 = vpop.f32.mrb[56].mxu0 }
0x1433   :  { %v3414_v38 = vpop.f32.mrb[57].mxu0  ;;  %v3423_v24 = vadd.f32 %v7371_v30, %v6640_v31 }
0x1434   :  { %v7372_v32 = vpop.f32.mrb[58].mxu0  ;;  %v3415_v35 = vadd.f32 %v6640_v31, %v3414_v38 }
0x1435   :  { %v3426_v33 = vadd.f32 %v7372_v32, %v6640_v31  ;;  %v3417_v34 = vpop.f32.mrb[59].mxu0  ;;  %v7843_v32 = vld [vmem:[%s9057_s3 + $0xd8] sm:$0xff]  }
0x1436   :  { %v3418_v36 = vadd.f32 %v6640_v31, %v3417_v34 }
0x1437   :  { %v7699_v37 = vpack.c.bf16 %v3426_v33, %v3423_v24  ;;  %v7844_v24 = vld [vmem:[%s9057_s3 + $0x150] sm:$0xff]   ;;  %v7845_v33 = vld [vmem:[%s9057_s3 + $0x158] sm:$0xff]  }
0x1438   :  { %v7693_v40 = vpack.c.bf16 %v3418_v36, %v3415_v35 }
0x1439   :  { %7701 = vmatprep.subr.msk.bf16.mxu1 %vm8225_vm3, %v7699_v37 }
0x143a   :  { %7695 = vmatprep.subr.msk.bf16.mxu0 %vm8225_vm3, %v7693_v40  ;;  %7704 = vmatpush3.bf16.xpose.msk.msra.mxu1 %vm8225_vm3, %v7699_v37 }
0x143b   :  { %7698 = vmatpush3.bf16.xpose.msk.msra.mxu0 %vm8225_vm3, %v7693_v40  ;;  %7710 = vmatprep.subr.bf16.mxu1 %v7709_v26 }
0x143c   :  { %7706 = vmatprep.subr.bf16.mxu0 %v7705_v29 }
0x1441   :  { %7393 = vmatmul.mubr.msk.f32.vlgmr.msra.gmra.mrb[48].mxu1 %vm50_vm1, %v3352_v41 }
0x1442   :  { %7386 = vmatmul.mubr.msk.f32.vlgmr.msra.gmra.mrb[60].mxu0 %vm50_vm1, %v3344_v42  ;;  %7712 = vmatpush3.bf16.msra.mxu1 %v7709_v26  ;;  %v7842_v26 = vld [vmem:[%s9057_s3 + $0x118] sm:$0xff]  }
0x1443   :  { %7708 = vmatpush3.bf16.msra.mxu0 %v7705_v29  ;;  %7417 = vmatprep.subr.bf16.mxu1 %v7840_v5 }
0x1444   :  { %7409 = vmatprep.subr.bf16.mxu0 %v7841_v6 }
0x1514   :  { %v7394_v43 = vpop.f32.mrb[48].mxu1 }
0x1515   :  { %v3680_v44 = vmul.f32 0.35355338, %v7394_v43  ;;  %v7387_v45 = vpop.f32.mrb[60].mxu0  ;;  %v3668_v47 = vpop.f32.mrb[49].mxu1  ;;  %v6683_v43 = vld [vmem:[%s9059_s4 + $0x11] ss:$0 sm:$0xff] }
0x1516   :  { %v3679_v28 = vmul.f32 0.35355338, %v3668_v47  ;;  %v3581_v25 = vpop.f32.mrb[61].mxu0  ;;  %v3678_v27 = vmul.f32 0.35355338, %v7387_v45 }
0x1517   :  { %v3690_v39 = vsel %vm609_vm4, %v3680_v44, -inf  ;;  %v3677_v49 = vmul.f32 0.35355338, %v3581_v25  ;;  %v6673_v47 = vld [vmem:[%s9059_s4 + $0xd] ss:$0 sm:$0xff] }
0x1518   :  { %3691 = vmax.xlane.f32.xlu1 %v3690_v39  ;;  %v3687_v50 = vsel %vm609_vm4, %v3679_v28, -inf  ;;  %v3684_v51 = vsel %vm609_vm4, %v3678_v27, -inf }
0x1519   :  { %3688 = vmax.xlane.f32.xlu0 %v3687_v50  ;;  %v3681_v14 = vsel %vm609_vm4, %v3677_v49, -inf }
0x151c   :  { %3685 = vmax.xlane.f32.xlu1 %v3684_v51 }
0x151d   :  { %3682 = vmax.xlane.f32.xlu0 %v3681_v14 }
0x15a5   :  { %v3692_v15 = vpop.xlane.xlu1 %3691 }
0x15a6   :  { %v3696_v17 = vsub.f32 %v3680_v44, %v3692_v15  ;;  %v3689_v52 = vpop.xlane.xlu0 %3688 }
0x15a7   :  { %v3695_v53 = vsub.f32 %v3679_v28, %v3689_v52 }
0x15a8   :  { %v3703_v54 = vmul.f32 1.442695, %v3696_v17 }
0x15a9   :  { %v3701_v57 = vmul.f32 1.442695, %v3695_v53  ;;  %v3686_v60 = vpop.xlane.xlu1 %3685 }
0x15aa   :  { %7960 = vpow2.f32 %v3703_v54  ;;  %v3694_v13 = vsub.f32 %v3678_v27, %v3686_v60  ;;  %v3683_v12 = vpop.xlane.xlu0 %3682  ;;  %v6693_v60 = vld [vmem:[%s9059_s4 + $0x15] ss:$0 sm:$0xff] }
0x15ab   :  { %7962 = vpow2.f32 %v3701_v57  ;;  %v3693_v58 = vsub.f32 %v3677_v49, %v3683_v12 }
0x15ac   :  { %v3699_v16 = vmul.f32 1.442695, %v3694_v13 }
0x15ad   :  { %v3697_v18 = vmul.f32 1.442695, %v3693_v58 }
0x15ae   :  { %7964 = vpow2.f32 %v3699_v16 }
0x15af   :  { %7966 = vpow2.f32 %v3697_v18 }
0x15b4   :  { %v7961_v19 = vpop.eup %7960 }
0x15b5   :  { %v7963_v62 = vpop.eup %7962  ;;  %v3714_v63 = vsel %vm609_vm4, %v7961_v19, 0.0 }
0x15b6   :  { %3715 = vadd.xlane.f32.xlu1 %v3714_v63  ;;  %v3711_v0 = vsel %vm609_vm4, %v7963_v62, 0.0 }
0x15b7   :  { %3712 = vadd.xlane.f32.xlu0 %v3711_v0 }
0x15b8   :  { %v7965_v1 = vpop.eup %7964 }
0x15b9   :  { %v7967_v2 = vpop.eup %7966  ;;  %v3708_v3 = vsel %vm609_vm4, %v7965_v1, 0.0 }
0x15ba   :  { %3709 = vadd.xlane.f32.xlu1 %v3708_v3  ;;  %v3705_v4 = vsel %vm609_vm4, %v7967_v2, 0.0 }
0x15bb   :  { %3706 = vadd.xlane.f32.xlu0 %v3705_v4 }
0x1643   :  { %v3716_v7 = vpop.xlane.xlu1 %3715 }
0x1644   :  { %7968 = vrcp.f32 %v3716_v7  ;;  %v3713_v8 = vpop.xlane.xlu0 %3712 }
0x1645   :  { %7970 = vrcp.f32 %v3713_v8 }
0x1647   :  { %v3710_v9 = vpop.xlane.xlu1 %3709 }
0x1648   :  { %7972 = vrcp.f32 %v3710_v9  ;;  %v3707_v10 = vpop.xlane.xlu0 %3706 }
0x1649   :  { %7974 = vrcp.f32 %v3707_v10 }
0x164e   :  { %v7969_v11 = vpop.eup %7968 }
0x164f   :  { %v7971_v21 = vpop.eup %7970  ;;  %v3724_v22 = vmul.f32 %v7969_v11, %v7961_v19 }
0x1650   :  { %v3722_v23 = vmul.f32 %v7971_v21, %v7963_v62 }
0x1652   :  { %v7973_v29 = vpop.eup %7972  ;;  %7406 = vmatprep.mubr.msk.f32.mxu1 %vm609_vm4, %v3722_v23 }
0x1653   :  { %v7975_v30 = vpop.eup %7974  ;;  %7407 = vmatmul.mubr.msk.f32.vlgmr.msra.gmra.mrb[50].mxu1 %vm609_vm4, %v3724_v22  ;;  %v3720_v38 = vmul.f32 %v7973_v29, %v7965_v1 }
0x1654   :  { %7418 = vmatpush3.bf16.msra.mxu1 %v7840_v5  ;;  %7421 = vmatprep.mubr.msk.bf16.mxu1 %vm121_vm2, %v8635_v59  ;;  %v3718_v31 = vmul.f32 %v7975_v30, %v7967_v2 }
0x1655   :  { %7419 = vmatprep.subr.bf16.mxu1 %v7842_v26 }
0x1656   :  { %7399 = vmatprep.mubr.msk.f32.mxu0 %vm609_vm4, %v3718_v31 }
0x1657   :  { %7400 = vmatmul.mubr.msk.f32.vlgmr.msra.gmra.mrb[62].mxu0 %vm609_vm4, %v3720_v38 }
0x1658   :  { %7410 = vmatpush3.bf16.msra.mxu0 %v7841_v6  ;;  %7420 = vmatpush3.bf16.msra.mxu1 %v7842_v26 }
0x1659   :  { %7413 = vmatprep.mubr.msk.bf16.mxu0 %vm121_vm2, %v8635_v59  ;;  %7411 = vmatprep.subr.bf16.mxu0 %v7843_v32 }
0x165b   :  { %7422 = vmatmul.mubr.msk.bf16.vlgmr.msra.gmra.mrb[52].mxu1 %vm121_vm2, %v8641_v61 }
0x165c   :  { %7412 = vmatpush3.bf16.msra.mxu0 %v7843_v32 }
0x165d   :  { %7425 = vmatprep.subr.bf16.mxu0 %v7844_v24 }
0x165f   :  { %7414 = vmatmul.mubr.msk.bf16.vlgmr.msra.gmra.mrb[64].mxu0 %vm121_vm2, %v8641_v61 }
0x1660   :  { %7426 = vmatpush3.bf16.msra.mxu0 %v7844_v24  ;;  %7429 = vmatprep.mubr.msk.bf16.mxu0 %vm121_vm2, %v8635_v59 }
0x1661   :  { %7427 = vmatprep.subr.bf16.mxu0 %v7845_v33 }
0x1664   :  { %7428 = vmatpush3.bf16.msra.mxu0 %v7845_v33 }
0x1667   :  { %7430 = vmatmul.mubr.msk.bf16.vlgmr.msra.gmra.mrb[68].mxu0 %vm121_vm2, %v8641_v61 }
0x1726   :  { %v8718_v34 = vpop.f32.mrb[50].mxu1 }
0x1727   :  { %v8720_v35 = vpop.f32.mrb[51].mxu1 }
0x1728   :  { %v3888_v36 = vpack.c.bf16 %v8718_v34, %v8720_v35 }
0x172a   :  { %v8724_v37 = vpop.f32.mrb[62].mxu0 }
0x172b   :  { %v8726_v40 = vpop.f32.mrb[63].mxu0 }
0x172c   :  { %v3887_v41 = vpack.c.bf16 %v8724_v37, %v8726_v40  ;;  %v6730_v37 = vld [vmem:[%s9059_s4 + $0x12] ss:$0 sm:$0xff] }
0x172e   :  { %v7423_v42 = vpop.f32.mrb[52].mxu1 }
0x172f   :  { %v4024_v44 = vpop.f32.mrb[53].mxu1  ;;  %v4033_v28 = vadd.f32 %v7423_v42, %v6683_v43 }
0x1730   :  { %v7424_v45 = vpop.f32.mrb[54].mxu1  ;;  %v4025_v39 = vadd.f32 %v6683_v43, %v4024_v44 }
0x1731   :  { %v4036_v25 = vadd.f32 %v7424_v45, %v6683_v43  ;;  %v4027_v27 = vpop.f32.mrb[55].mxu1 }
0x1732   :  { %v4028_v49 = vadd.f32 %v6683_v43, %v4027_v27  ;;  %v7415_v50 = vpop.f32.mrb[64].mxu0 }
0x1733   :  { %v7719_v51 = vpack.c.bf16 %v4036_v25, %v4033_v28  ;;  %v3959_v14 = vadd.f32 %v7415_v50, %v6673_v47  ;;  %v3950_v15 = vpop.f32.mrb[65].mxu0 }
0x1734   :  { %v7713_v17 = vpack.c.bf16 %v4028_v49, %v4025_v39  ;;  %v3951_v52 = vadd.f32 %v6673_v47, %v3950_v15  ;;  %v7416_v53 = vpop.f32.mrb[66].mxu0 }
0x1735   :  { %v3953_v54 = vpop.f32.mrb[67].mxu0  ;;  %7721 = vmatprep.subr.msk.bf16.mxu0 %vm8225_vm3, %v7719_v51  ;;  %7444 = vmatprep.mubr.msk.f32.mxu0 %vm50_vm1, %v3959_v14  ;;  %v3962_v12 = vadd.f32 %v7416_v53, %v6673_v47 }
0x1736   :  { %7715 = vmatprep.subr.msk.bf16.mxu1 %vm8225_vm3, %v7713_v17  ;;  %7437 = vmatprep.mubr.msk.f32.mxu1 %vm50_vm1, %v3951_v52  ;;  %v3954_v58 = vadd.f32 %v6673_v47, %v3953_v54 }
0x1737   :  { %7724 = vmatpush3.bf16.xpose.msk.msra.mxu0 %vm8225_vm3, %v7719_v51  ;;  %7718 = vmatpush3.bf16.xpose.msk.msra.mxu1 %vm8225_vm3, %v7713_v17 }
0x173a   :  { %v7431_v57 = vpop.f32.mrb[68].mxu0 }
0x173b   :  { %v4098_v13 = vpop.f32.mrb[69].mxu0  ;;  %v4107_v18 = vadd.f32 %v7431_v57, %v6693_v60 }
0x173c   :  { %v7432_v16 = vpop.f32.mrb[70].mxu0  ;;  %v4099_v63 = vadd.f32 %v6693_v60, %v4098_v13  ;;  %v7846_v13 = vld [vmem:[%s9057_s3 + $0xe0] sm:$0xff]  }
0x173d   :  { %v4110_v19 = vadd.f32 %v7432_v16, %v6693_v60  ;;  %v4101_v62 = vpop.f32.mrb[71].mxu0 }
0x173e   :  { %v4102_v0 = vadd.f32 %v6693_v60, %v4101_v62  ;;  %7445 = vmatmul.mubr.msk.f32.vlgmr.msra.gmra.mrb[72].mxu0 %vm50_vm1, %v3962_v12  ;;  %7438 = vmatmul.mubr.msk.f32.vlgmr.msra.gmra.mrb[56].mxu1 %vm50_vm1, %v3954_v58  ;;  %v7848_v62 = vld [vmem:[%s9057_s3 + $0x120] sm:$0xff]  }
0x173f   :  { %v8751_v1 = vpack.c.bf16 %v4110_v19, %v4107_v18  ;;  %v7847_v19 = vld [vmem:[%s9057_s3 + $0xe8] sm:$0xff]  }
0x1740   :  { %v7725_v2 = vpack.c.bf16 %v4102_v0, %v4099_v63  ;;  %v7849_v63 = vld [vmem:[%s9057_s3 + $0x128] sm:$0xff]   ;;  %v6710_v0 = vld [vmem:[%s9060_s5 + $0x14] sm:$0xf] }
0x1741   :  { %7802 = vmatprep.subr.msk.bf16.mxu0 %vm57_vm0, %v6710_v0 }
0x1742   :  { %7726 = vmatprep.subr.bf16.mxu1 %v7725_v2 }
0x1743   :  { %7728 = vmatpush3.bf16.msra.mxu1 %v7725_v2  ;;  %v6667_v2 = vld [vmem:[%s9060_s5 + $0x10] sm:$0xf] }
0x1744   :  { %7730 = vmatprep.subr.bf16.mxu1 %v8751_v1 }
0x1811   :  { %v7446_v3 = vpop.f32.mrb[72].mxu0  ;;  %v7439_v4 = vpop.f32.mrb[56].mxu1 }
0x1812   :  { %v4288_v5 = vmul.f32 0.35355338, %v7439_v4  ;;  %v4278_v6 = vpop.f32.mrb[73].mxu0  ;;  %v4191_v7 = vpop.f32.mrb[57].mxu1  ;;  %v4290_v9 = vmul.f32 0.35355338, %v7446_v3 }
0x1813   :  { %v4287_v8 = vmul.f32 0.35355338, %v4191_v7  ;;  %v4289_v11 = vmul.f32 0.35355338, %v4278_v6 }
0x1814   :  { %v4294_v10 = vsel %vm609_vm4, %v4288_v5, -inf  ;;  %v4300_v23 = vsel %vm609_vm4, %v4290_v9, -inf }
0x1815   :  { %4295 = vmax.xlane.f32.xlu1 %v4294_v10  ;;  %v4291_v21 = vsel %vm609_vm4, %v4287_v8, -inf  ;;  %v4297_v22 = vsel %vm609_vm4, %v4289_v11, -inf  ;;  %v7850_v10 = vld [vmem:[%s9057_s3 + $0x160] sm:$0xff]  }
0x1816   :  { %4292 = vmax.xlane.f32.xlu0 %v4291_v21 }
0x1819   :  { %4301 = vmax.xlane.f32.xlu1 %v4300_v23 }
0x181a   :  { %4298 = vmax.xlane.f32.xlu0 %v4297_v22 }
0x18a2   :  { %v4296_v26 = vpop.xlane.xlu1 %4295 }
0x18a3   :  { %v4304_v29 = vsub.f32 %v4288_v5, %v4296_v26  ;;  %v4293_v30 = vpop.xlane.xlu0 %4292 }
0x18a4   :  { %v4303_v31 = vsub.f32 %v4287_v8, %v4293_v30  ;;  %v7851_v30 = vld [vmem:[%s9057_s3 + $0x168] sm:$0xff]  }
0x18a5   :  { %v4309_v38 = vmul.f32 1.442695, %v4304_v29 }
0x18a6   :  { %v4307_v32 = vmul.f32 1.442695, %v4303_v31  ;;  %v4302_v24 = vpop.xlane.xlu1 %4301 }
0x18a7   :  { %7976 = vpow2.f32 %v4309_v38  ;;  %v4306_v33 = vsub.f32 %v4290_v9, %v4302_v24  ;;  %v4299_v42 = vpop.xlane.xlu0 %4298  ;;  %v4566_v9 = vsel %vm57_vm0, %v6667_v2, 0 }
0x18a8   :  { %7978 = vpow2.f32 %v4307_v32  ;;  %v4305_v43 = vsub.f32 %v4289_v11, %v4299_v42  ;;  %v6720_v11 = vld [vmem:[%s9059_s4 + $0xe] ss:$0 sm:$0xff] }
0x18a9   :  { %v4313_v44 = vmul.f32 1.442695, %v4306_v33 }
0x18aa   :  { %v4311_v45 = vmul.f32 1.442695, %v4305_v43 }
0x18ab   :  { %7980 = vpow2.f32 %v4313_v44 }
0x18ac   :  { %7982 = vpow2.f32 %v4311_v45 }
0x18b1   :  { %v7977_v47 = vpop.eup %7976 }
0x18b2   :  { %v7979_v28 = vpop.eup %7978  ;;  %v4318_v25 = vsel %vm609_vm4, %v7977_v47, 0.0 }
0x18b3   :  { %4319 = vadd.xlane.f32.xlu1 %v4318_v25  ;;  %v4315_v27 = vsel %vm609_vm4, %v7979_v28, 0.0 }
0x18b4   :  { %4316 = vadd.xlane.f32.xlu0 %v4315_v27 }
0x18b5   :  { %v7981_v39 = vpop.eup %7980 }
0x18b6   :  { %v7983_v49 = vpop.eup %7982  ;;  %v4324_v50 = vsel %vm609_vm4, %v7981_v39, 0.0 }
0x18b7   :  { %4325 = vadd.xlane.f32.xlu1 %v4324_v50  ;;  %v4321_v51 = vsel %vm609_vm4, %v7983_v49, 0.0 }
0x18b8   :  { %4322 = vadd.xlane.f32.xlu0 %v4321_v51 }
0x1940   :  { %v4320_v14 = vpop.xlane.xlu1 %4319 }
0x1941   :  { %7984 = vrcp.f32 %v4320_v14  ;;  %v4317_v15 = vpop.xlane.xlu0 %4316 }
0x1942   :  { %7986 = vrcp.f32 %v4317_v15 }
0x1944   :  { %v4326_v17 = vpop.xlane.xlu1 %4325 }
0x1945   :  { %7988 = vrcp.f32 %v4326_v17  ;;  %v4323_v52 = vpop.xlane.xlu0 %4322 }
0x1946   :  { %7990 = vrcp.f32 %v4323_v52 }
0x194b   :  { %v7985_v53 = vpop.eup %7984 }
0x194c   :  { %v7987_v54 = vpop.eup %7986  ;;  %v4330_v60 = vmul.f32 %v7985_v53, %v7977_v47  ;;  %v6740_v47 = vld [vmem:[%s9059_s4 + $0x16] ss:$0 sm:$0xff] }
0x194d   :  { %v4328_v57 = vmul.f32 %v7987_v54, %v7979_v28 }
0x194f   :  { %v7989_v12 = vpop.eup %7988  ;;  %7451 = vmatprep.mubr.msk.f32.mxu1 %vm609_vm4, %v4328_v57 }
0x1950   :  { %v7991_v58 = vpop.eup %7990  ;;  %7452 = vmatmul.mubr.msk.f32.vlgmr.msra.gmra.mrb[58].mxu1 %vm609_vm4, %v4330_v60  ;;  %v4334_v18 = vmul.f32 %v7989_v12, %v7981_v39 }
0x1951   :  { %7732 = vmatpush3.bf16.msra.mxu1 %v8751_v1  ;;  %v4332_v16 = vmul.f32 %v7991_v58, %v7983_v49  ;;  %v4508_v1 = vsel %vm57_vm0, %v6710_v0, 0 }
0x1952   :  { %7473 = vmatprep.subr.bf16.mxu1 %v7846_v13  ;;  %7462 = vmatpush3.bf16.msra.mxu0 %v4508_v1 }
0x1953   :  { %7458 = vmatprep.mubr.msk.f32.mxu1 %vm609_vm4, %v4332_v16  ;;  %7803 = vmatprep.subr.msk.bf16.mxu0 %vm57_vm0, %v6667_v2 }
0x1954   :  { %7459 = vmatmul.mubr.msk.f32.vlgmr.msra.gmra.mrb[60].mxu1 %vm609_vm4, %v4334_v18 }
0x1955   :  { %7474 = vmatpush3.bf16.msra.mxu1 %v7846_v13  ;;  %7477 = vmatprep.mubr.msk.bf16.mxu1 %vm121_vm2, %v8635_v59 }
0x1956   :  { %7475 = vmatprep.subr.bf16.mxu1 %v7847_v19 }
0x1959   :  { %7476 = vmatpush3.bf16.msra.mxu1 %v7847_v19 }
0x195a   :  { %7481 = vmatprep.subr.bf16.mxu1 %v7848_v62 }
0x195c   :  { %7478 = vmatmul.mubr.msk.bf16.vlgmr.msra.gmra.mrb[64].mxu1 %vm121_vm2, %v8641_v61 }
0x195d   :  { %7482 = vmatpush3.bf16.msra.mxu1 %v7848_v62  ;;  %7485 = vmatprep.mubr.msk.bf16.mxu1 %vm121_vm2, %v8635_v59 }
0x195e   :  { %7483 = vmatprep.subr.bf16.mxu1 %v7849_v63 }
0x1961   :  { %7484 = vmatpush3.bf16.msra.mxu1 %v7849_v63 }
0x1964   :  { %7486 = vmatmul.mubr.msk.bf16.vlgmr.msra.gmra.mrb[68].mxu1 %vm121_vm2, %v8641_v61 }
0x1a23   :  { %v7453_v3 = vpop.f32.mrb[58].mxu1 }
0x1a24   :  { %v4407_v4 = vpop.f32.mrb[59].mxu1 }
0x1a25   :  { %v4497_v5 = vpack.c.bf16 %v7453_v3, %v4407_v4 }
0x1a27   :  { %v7460_v6 = vpop.f32.mrb[60].mxu1  ;;  %7463 = vmatprep.mubr.msk.bf16.mxu0 %vm50_vm1, %v4497_v5 }
0x1a28   :  { %v4488_v7 = vpop.f32.mrb[61].mxu1 }
0x1a29   :  { %v4498_v8 = vpack.c.bf16 %v7460_v6, %v4488_v7 }
0x1a2b   :  { %7464 = vmatmul.mubr.msk.bf16.vlgmr.msra.gmra.mrb[76].mxu0 %vm50_vm1, %v4498_v8 }
0x1a2c   :  { %7468 = vmatpush3.bf16.msra.mxu0 %v4566_v9  ;;  %7469 = vmatprep.mubr.msk.bf16.mxu0 %vm50_vm1, %v3887_v41 }
0x1a2d   :  { %7489 = vmatprep.subr.bf16.mxu0 %v7850_v10 }
0x1a2f   :  { %v7479_v21 = vpop.f32.mrb[64].mxu1 }
0x1a30   :  { %v4676_v23 = vpop.f32.mrb[65].mxu1  ;;  %v4685_v45 = vadd.f32 %v7479_v21, %v6720_v11 }
0x1a31   :  { %v4677_v22 = vadd.f32 %v6720_v11, %v4676_v23  ;;  %v7480_v26 = vpop.f32.mrb[66].mxu1 }
0x1a32   :  { %v4679_v29 = vpop.f32.mrb[67].mxu1  ;;  %v4688_v35 = vadd.f32 %v7480_v26, %v6720_v11 }
0x1a33   :  { %7501 = vmatprep.mubr.msk.f32.mxu1 %vm50_vm1, %v4677_v22  ;;  %v4680_v34 = vadd.f32 %v6720_v11, %v4679_v29 }
0x1a37   :  { %v7487_v31 = vpop.f32.mrb[68].mxu1  ;;  %7470 = vmatmul.mubr.msk.bf16.vlgmr.msra.gmra.mrb[76].mxu0 %vm50_vm1, %v3888_v36 }
0x1a38   :  { %v4750_v40 = vpop.f32.mrb[69].mxu1  ;;  %7490 = vmatpush3.bf16.msra.mxu0 %v7850_v10  ;;  %7493 = vmatprep.mubr.msk.bf16.mxu0 %vm121_vm2, %v8635_v59  ;;  %v4759_v38 = vadd.f32 %v7487_v31, %v6730_v37  ;;  %v7852_v31 = vld [vmem:[%s9057_s3 + $0xf0] sm:$0xff]  }
0x1a39   :  { %v7488_v41 = vpop.f32.mrb[70].mxu1  ;;  %7491 = vmatprep.subr.bf16.mxu0 %v7851_v30  ;;  %v4751_v33 = vadd.f32 %v6730_v37, %v4750_v40 }
0x1a3a   :  { %v4762_v32 = vadd.f32 %v7488_v41, %v6730_v37  ;;  %v4753_v24 = vpop.f32.mrb[71].mxu1 }
0x1a3b   :  { %v4754_v42 = vadd.f32 %v6730_v37, %v4753_v24 }
0x1a3c   :  { %v7739_v43 = vpack.c.bf16 %v4762_v32, %v4759_v38  ;;  %7492 = vmatpush3.bf16.msra.mxu0 %v7851_v30 }
0x1a3d   :  { %v7733_v44 = vpack.c.bf16 %v4754_v42, %v4751_v33 }
0x1a3e   :  { %7741 = vmatprep.subr.msk.bf16.mxu0 %vm8225_vm3, %v7739_v43 }
0x1a3f   :  { %7735 = vmatprep.subr.msk.bf16.mxu1 %vm8225_vm3, %v7733_v44  ;;  %7494 = vmatmul.mubr.msk.bf16.vlgmr.msra.gmra.mrb[80].mxu0 %vm121_vm2, %v8641_v61 }
0x1a40   :  { %7738 = vmatpush3.bf16.xpose.msk.msra.mxu1 %vm8225_vm3, %v7733_v44  ;;  %7508 = vmatprep.mubr.msk.f32.mxu0 %vm50_vm1, %v4685_v45 }
0x1a45   :  { %7744 = vmatpush3.bf16.xpose.msk.msra.mxu0 %vm8225_vm3, %v7739_v43  ;;  %v7853_v43 = vld [vmem:[%s9057_s3 + $0xf8] sm:$0xff]  }
0x1a47   :  { %7502 = vmatmul.mubr.msk.f32.vlgmr.msra.gmra.mrb[62].mxu1 %vm50_vm1, %v4680_v34 }
0x1a4c   :  { %7509 = vmatmul.mubr.msk.f32.vlgmr.msra.gmra.mrb[74].mxu0 %vm50_vm1, %v4688_v35  ;;  %v7854_v35 = vld [vmem:[%s9057_s3 + $0x170] sm:$0xff]  }
0x1b12   :  { %v7495_v36 = vpop.f32.mrb[80].mxu0 }
0x1b13   :  { %v4824_v28 = vpop.f32.mrb[81].mxu0  ;;  %v4833_v27 = vadd.f32 %v7495_v36, %v6740_v47 }
0x1b14   :  { %v7496_v25 = vpop.f32.mrb[82].mxu0  ;;  %v4825_v50 = vadd.f32 %v6740_v47, %v4824_v28  ;;  %v6757_v28 = vld [vmem:[%s9060_s5 + $0x18] sm:$0xf] }
0x1b15   :  { %v4836_v39 = vadd.f32 %v7496_v25, %v6740_v47  ;;  %v4827_v49 = vpop.f32.mrb[83].mxu0  ;;  %v5234_v25 = vsel %vm57_vm0, %v6757_v28, 0 }
0x1b16   :  { %v4828_v51 = vadd.f32 %v6740_v47, %v4827_v49  ;;  %v7855_v47 = vld [vmem:[%s9057_s3 + $0x178] sm:$0xff]  }
0x1b17   :  { %v7749_v14 = vpack.c.bf16 %v4836_v39, %v4833_v27  ;;  %v7856_v27 = vld [vmem:[%s9057_s3 + $0x130] sm:$0xff]  }
0x1b18   :  { %v7745_v15 = vpack.c.bf16 %v4828_v51, %v4825_v50 }
0x1b19   :  { %7750 = vmatprep.subr.bf16.mxu0 %v7749_v14 }
0x1b1a   :  { %v7503_v17 = vpop.f32.mrb[62].mxu1  ;;  %7746 = vmatprep.subr.bf16.mxu1 %v7745_v15  ;;  %7752 = vmatpush3.bf16.msra.mxu0 %v7749_v14 }
0x1b1b   :  { %v5014_v52 = vmul.f32 0.35355338, %v7503_v17  ;;  %v4917_v53 = vpop.f32.mrb[63].mxu1  ;;  %7748 = vmatpush3.bf16.msra.mxu1 %v7745_v15  ;;  %7804 = vmatprep.subr.msk.bf16.mxu0 %vm57_vm0, %v6757_v28  ;;  %v6765_v15 = vld [vmem:[%s9059_s4 + $0xf] ss:$0 sm:$0xff] }
0x1b1c   :  { %v5013_v54 = vmul.f32 0.35355338, %v4917_v53  ;;  %7531 = vmatprep.subr.bf16.mxu1 %v7852_v31 }
0x1b1d   :  { %v5020_v57 = vsel %vm609_vm4, %v5014_v52, -inf }
0x1b1e   :  { %5021 = vmax.xlane.f32.xlu1 %v5020_v57  ;;  %v5017_v60 = vsel %vm609_vm4, %v5013_v54, -inf }
0x1b1f   :  { %5018 = vmax.xlane.f32.xlu0 %v5017_v60  ;;  %v7510_v13 = vpop.f32.mrb[74].mxu0 }
0x1b20   :  { %v5016_v12 = vmul.f32 0.35355338, %v7510_v13  ;;  %v5004_v58 = vpop.f32.mrb[75].mxu0 }
0x1b21   :  { %v5015_v16 = vmul.f32 0.35355338, %v5004_v58 }
0x1b22   :  { %v5026_v18 = vsel %vm609_vm4, %v5016_v12, -inf }
0x1b23   :  { %5027 = vmax.xlane.f32.xlu1 %v5026_v18  ;;  %v5023_v19 = vsel %vm609_vm4, %v5015_v16, -inf }
0x1b24   :  { %5024 = vmax.xlane.f32.xlu0 %v5023_v19  ;;  %v6785_v19 = vld [vmem:[%s9059_s4 + $0x17] ss:$0 sm:$0xff] }
0x1bab   :  { %v5022_v62 = vpop.xlane.xlu1 %5021 }
0x1bac   :  { %v5030_v63 = vsub.f32 %v5014_v52, %v5022_v62  ;;  %v5019_v0 = vpop.xlane.xlu0 %5018  ;;  %v7857_v52 = vld [vmem:[%s9057_s3 + $0x138] sm:$0xff]  }
0x1bad   :  { %v5029_v1 = vsub.f32 %v5013_v54, %v5019_v0 }
0x1bae   :  { %v5035_v2 = vmul.f32 1.442695, %v5030_v63 }
0x1baf   :  { %v5033_v3 = vmul.f32 1.442695, %v5029_v1 }
0x1bb0   :  { %7992 = vpow2.f32 %v5035_v2  ;;  %v5028_v4 = vpop.xlane.xlu1 %5027 }
0x1bb1   :  { %7994 = vpow2.f32 %v5033_v3  ;;  %v5032_v5 = vsub.f32 %v5016_v12, %v5028_v4  ;;  %v5025_v6 = vpop.xlane.xlu0 %5024 }
0x1bb2   :  { %v5031_v7 = vsub.f32 %v5015_v16, %v5025_v6 }
0x1bb3   :  { %v5039_v8 = vmul.f32 1.442695, %v5032_v5 }
0x1bb4   :  { %v5037_v9 = vmul.f32 1.442695, %v5031_v7  ;;  %v6775_v7 = vld [vmem:[%s9059_s4 + $0x13] ss:$0 sm:$0xff] }
0x1bb5   :  { %7996 = vpow2.f32 %v5039_v8 }
0x1bb6   :  { %7998 = vpow2.f32 %v5037_v9 }
0x1bba   :  { %v7993_v10 = vpop.eup %7992 }
0x1bbb   :  { %v7995_v11 = vpop.eup %7994  ;;  %v5044_v21 = vsel %vm609_vm4, %v7993_v10, 0.0 }
0x1bbc   :  { %5045 = vadd.xlane.f32.xlu1 %v5044_v21  ;;  %v5041_v23 = vsel %vm609_vm4, %v7995_v11, 0.0 }
0x1bbd   :  { %5042 = vadd.xlane.f32.xlu0 %v5041_v23 }
0x1bbf   :  { %v7997_v22 = vpop.eup %7996 }
0x1bc0   :  { %v7999_v26 = vpop.eup %7998  ;;  %v5050_v29 = vsel %vm609_vm4, %v7997_v22, 0.0 }
0x1bc1   :  { %5051 = vadd.xlane.f32.xlu1 %v5050_v29  ;;  %v5047_v30 = vsel %vm609_vm4, %v7999_v26, 0.0 }
0x1bc2   :  { %5048 = vadd.xlane.f32.xlu0 %v5047_v30 }
0x1c49   :  { %v5046_v37 = vpop.xlane.xlu1 %5045 }
0x1c4a   :  { %8000 = vrcp.f32 %v5046_v37  ;;  %v5043_v40 = vpop.xlane.xlu0 %5042 }
0x1c4b   :  { %8002 = vrcp.f32 %v5043_v40 }
0x1c4e   :  { %v5052_v41 = vpop.xlane.xlu1 %5051 }
0x1c4f   :  { %8004 = vrcp.f32 %v5052_v41  ;;  %v5049_v38 = vpop.xlane.xlu0 %5048 }
0x1c50   :  { %8006 = vrcp.f32 %v5049_v38 }
0x1c54   :  { %v8001_v32 = vpop.eup %8000 }
0x1c55   :  { %v8003_v24 = vpop.eup %8002  ;;  %v5056_v42 = vmul.f32 %v8001_v32, %v7993_v10 }
0x1c56   :  { %v5054_v33 = vmul.f32 %v8003_v24, %v7995_v11 }
0x1c58   :  { %7515 = vmatprep.mubr.msk.f32.mxu1 %vm609_vm4, %v5054_v33 }
0x1c59   :  { %v8005_v44 = vpop.eup %8004  ;;  %7516 = vmatmul.mubr.msk.f32.vlgmr.msra.gmra.mrb[72].mxu1 %vm609_vm4, %v5056_v42 }
0x1c5a   :  { %v8007_v45 = vpop.eup %8006  ;;  %7532 = vmatpush3.bf16.msra.mxu1 %v7852_v31  ;;  %7535 = vmatprep.mubr.msk.bf16.mxu1 %vm121_vm2, %v8635_v59  ;;  %v5060_v36 = vmul.f32 %v8005_v44, %v7997_v22 }
0x1c5b   :  { %7533 = vmatprep.subr.bf16.mxu1 %v7853_v43  ;;  %v5058_v34 = vmul.f32 %v8007_v45, %v7999_v26 }
0x1c5d   :  { %7522 = vmatprep.mubr.msk.f32.mxu0 %vm609_vm4, %v5058_v34 }
0x1c5e   :  { %7534 = vmatpush3.bf16.msra.mxu1 %v7853_v43  ;;  %7523 = vmatmul.mubr.msk.f32.vlgmr.msra.gmra.mrb[84].mxu0 %vm609_vm4, %v5060_v36 }
0x1c5f   :  { %7547 = vmatprep.subr.bf16.mxu1 %v7854_v35  ;;  %7526 = vmatpush3.bf16.msra.mxu0 %v5234_v25 }
0x1c60   :  { %7539 = vmatprep.subr.bf16.mxu0 %v7856_v27 }
0x1c61   :  { %7536 = vmatmul.mubr.msk.bf16.vlgmr.msra.gmra.mrb[76].mxu1 %vm121_vm2, %v8641_v61 }
0x1c62   :  { %7548 = vmatpush3.bf16.msra.mxu1 %v7854_v35  ;;  %7551 = vmatprep.mubr.msk.bf16.mxu1 %vm121_vm2, %v8635_v59 }
0x1c63   :  { %7549 = vmatprep.subr.bf16.mxu1 %v7855_v47 }
0x1c66   :  { %7550 = vmatpush3.bf16.msra.mxu1 %v7855_v47 }
0x1c69   :  { %7552 = vmatmul.mubr.msk.bf16.vlgmr.msra.gmra.mrb[80].mxu1 %vm121_vm2, %v8641_v61 }
0x1d2c   :  { %v7517_v39 = vpop.f32.mrb[72].mxu1 }
0x1d2d   :  { %v5133_v49 = vpop.f32.mrb[73].mxu1 }
0x1d2e   :  { %v5223_v50 = vpack.c.bf16 %v7517_v39, %v5133_v49 }
0x1d30   :  { %7527 = vmatprep.mubr.msk.bf16.mxu0 %vm50_vm1, %v5223_v50 }
0x1d31   :  { %v7524_v51 = vpop.f32.mrb[84].mxu0 }
0x1d32   :  { %v5214_v14 = vpop.f32.mrb[85].mxu0 }
0x1d33   :  { %v5224_v17 = vpack.c.bf16 %v7524_v51, %v5214_v14 }
0x1d34   :  { %v7537_v53 = vpop.f32.mrb[76].mxu1 }
0x1d35   :  { %v5357_v54 = vadd.f32 %v7537_v53, %v6765_v15  ;;  %v5348_v57 = vpop.f32.mrb[77].mxu1  ;;  %7528 = vmatmul.mubr.msk.bf16.vlgmr.msra.gmra.mrb[76].mxu0 %vm50_vm1, %v5224_v17 }
0x1d36   :  { %v7538_v60 = vpop.f32.mrb[78].mxu1  ;;  %7540 = vmatpush3.bf16.msra.mxu0 %v7856_v27  ;;  %7543 = vmatprep.mubr.msk.bf16.mxu0 %vm121_vm2, %v8635_v59  ;;  %v5349_v16 = vadd.f32 %v6765_v15, %v5348_v57 }
0x1d37   :  { %v5360_v13 = vadd.f32 %v7538_v60, %v6765_v15  ;;  %v5351_v12 = vpop.f32.mrb[79].mxu1  ;;  %7566 = vmatprep.mubr.msk.f32.mxu1 %vm50_vm1, %v5357_v54  ;;  %7541 = vmatprep.subr.bf16.mxu0 %v7857_v52 }
0x1d38   :  { %v5352_v58 = vadd.f32 %v6765_v15, %v5351_v12 }
0x1d3a   :  { %7542 = vmatpush3.bf16.msra.mxu0 %v7857_v52 }
0x1d3c   :  { %v7553_v18 = vpop.f32.mrb[80].mxu1 }
0x1d3d   :  { %v5496_v62 = vpop.f32.mrb[81].mxu1  ;;  %7544 = vmatmul.mubr.msk.bf16.vlgmr.msra.gmra.mrb[88].mxu0 %vm121_vm2, %v8641_v61  ;;  %v5505_v59 = vadd.f32 %v7553_v18, %v6785_v19 }
0x1d3e   :  { %v7554_v63 = vpop.f32.mrb[82].mxu1  ;;  %7559 = vmatprep.mubr.msk.f32.mxu0 %vm50_vm1, %v5349_v16  ;;  %v5497_v2 = vadd.f32 %v6785_v19, %v5496_v62 }
0x1d3f   :  { %v5508_v0 = vadd.f32 %v7554_v63, %v6785_v19  ;;  %v5499_v1 = vpop.f32.mrb[83].mxu1 }
0x1d40   :  { %v5500_v3 = vadd.f32 %v6785_v19, %v5499_v1  ;;  %v6802_v1 = vld [vmem:[%s9060_s5 + $0x1c] sm:$0xf] }
0x1d41   :  { %v7769_v4 = vpack.c.bf16 %v5508_v0, %v5505_v59 }
0x1d42   :  { %v7765_v5 = vpack.c.bf16 %v5500_v3, %v5497_v2  ;;  %v5906_v2 = vsel %vm57_vm0, %v6802_v1, 0 }
0x1e10   :  { %v7545_v6 = vpop.f32.mrb[88].mxu0 }
0x1e11   :  { %v5422_v8 = vpop.f32.mrb[89].mxu0  ;;  %v5431_v10 = vadd.f32 %v7545_v6, %v6775_v7 }
0x1e12   :  { %v7546_v9 = vpop.f32.mrb[90].mxu0  ;;  %v5423_v21 = vadd.f32 %v6775_v7, %v5422_v8 }
0x1e13   :  { %v5434_v11 = vadd.f32 %v7546_v9, %v6775_v7  ;;  %v5425_v61 = vpop.f32.mrb[91].mxu0  ;;  %v6805_v9 = vld [vmem:[%s9058_s6 + $0x8] ss:$0 sm:$0xff] }
0x1e14   :  { %v5426_v23 = vadd.f32 %v6775_v7, %v5425_v61 }
0x1e15   :  { %v7759_v22 = vpack.c.bf16 %v5434_v11, %v5431_v10 }
0x1e16   :  { %v7753_v26 = vpack.c.bf16 %v5426_v23, %v5423_v21 }
0x1e17   :  { %7761 = vmatprep.subr.msk.bf16.mxu1 %vm8225_vm3, %v7759_v22 }
0x1e18   :  { %7755 = vmatprep.subr.msk.bf16.mxu0 %vm8225_vm3, %v7753_v26  ;;  %7764 = vmatpush3.bf16.xpose.msk.msra.mxu1 %vm8225_vm3, %v7759_v22 }
0x1e19   :  { %7758 = vmatpush3.bf16.xpose.msk.msra.mxu0 %vm8225_vm3, %v7753_v26  ;;  %7770 = vmatprep.subr.bf16.mxu1 %v7769_v4 }
0x1e1a   :  { %7766 = vmatprep.subr.bf16.mxu0 %v7765_v5 }
0x1e1f   :  { %7567 = vmatmul.mubr.msk.f32.vlgmr.msra.gmra.mrb[74].mxu1 %vm50_vm1, %v5360_v13 }
0x1e20   :  { %7560 = vmatmul.mubr.msk.f32.vlgmr.msra.gmra.mrb[86].mxu0 %vm50_vm1, %v5352_v58  ;;  %7772 = vmatpush3.bf16.msra.mxu1 %v7769_v4 }
0x1e21   :  { %7768 = vmatpush3.bf16.msra.mxu0 %v7765_v5 }
0x1e22   :  { %7805 = vmatprep.subr.msk.bf16.mxu0 %vm57_vm0, %v6802_v1 }
0x1ef2   :  { %v7568_v29 = vpop.f32.mrb[74].mxu1 }
0x1ef3   :  { %v7561_v30 = vpop.f32.mrb[86].mxu0  ;;  %v5676_v31 = vpop.f32.mrb[75].mxu1  ;;  %v5688_v38 = vmul.f32 0.35355338, %v7568_v29 }
0x1ef4   :  { %v5686_v37 = vmul.f32 0.35355338, %v7561_v30  ;;  %v5589_v40 = vpop.f32.mrb[87].mxu0  ;;  %v5687_v24 = vmul.f32 0.35355338, %v5676_v31 }
0x1ef5   :  { %v5685_v41 = vmul.f32 0.35355338, %v5589_v40  ;;  %v5698_v33 = vsel %vm609_vm4, %v5688_v38, -inf }
0x1ef6   :  { %v5692_v32 = vsel %vm609_vm4, %v5686_v37, -inf  ;;  %v5695_v42 = vsel %vm609_vm4, %v5687_v24, -inf }
0x1ef7   :  { %5693 = vmax.xlane.f32.xlu1 %v5692_v32  ;;  %v5689_v46 = vsel %vm609_vm4, %v5685_v41, -inf }
0x1ef8   :  { %5690 = vmax.xlane.f32.xlu0 %v5689_v46 }
0x1efb   :  { %5699 = vmax.xlane.f32.xlu1 %v5698_v33 }
0x1efc   :  { %5696 = vmax.xlane.f32.xlu0 %v5695_v42 }
0x1f84   :  { %v5694_v43 = vpop.xlane.xlu1 %5693 }
0x1f85   :  { %v5702_v44 = vsub.f32 %v5686_v37, %v5694_v43  ;;  %v5691_v45 = vpop.xlane.xlu0 %5690 }
0x1f86   :  { %v5701_v34 = vsub.f32 %v5685_v41, %v5691_v45  ;;  %v7859_v45 = vld [vmem:[%s9061_s8 + $0x28] sm:$0xff]  }
0x1f87   :  { %v5707_v35 = vmul.f32 1.442695, %v5702_v44  ;;  %v7858_v44 = vld [vmem:[%s9061_s8 + $0x20] sm:$0xff]  }
0x1f88   :  { %v5705_v36 = vmul.f32 1.442695, %v5701_v34  ;;  %v5700_v47 = vpop.xlane.xlu1 %5699  ;;  %7589 = vmatprep.subr.bf16.mxu1 %v7858_v44 }
0x1f89   :  { %8008 = vpow2.f32 %v5707_v35  ;;  %v5704_v28 = vsub.f32 %v5688_v38, %v5700_v47  ;;  %v5697_v25 = vpop.xlane.xlu0 %5696 }
0x1f8a   :  { %8010 = vpow2.f32 %v5705_v36  ;;  %v5703_v27 = vsub.f32 %v5687_v24, %v5697_v25 }
0x1f8b   :  { %v5711_v39 = vmul.f32 1.442695, %v5704_v28 }
0x1f8c   :  { %v5709_v49 = vmul.f32 1.442695, %v5703_v27 }
0x1f8d   :  { %8012 = vpow2.f32 %v5711_v39 }
0x1f8e   :  { %8014 = vpow2.f32 %v5709_v49 }
0x1f93   :  { %v8009_v50 = vpop.eup %8008 }
0x1f94   :  { %v8011_v51 = vpop.eup %8010  ;;  %v5716_v14 = vsel %vm609_vm4, %v8009_v50, 0.0 }
0x1f95   :  { %5717 = vadd.xlane.f32.xlu1 %v5716_v14  ;;  %v5713_v15 = vsel %vm609_vm4, %v8011_v51, 0.0 }
0x1f96   :  { %5714 = vadd.xlane.f32.xlu0 %v5713_v15 }
0x1f97   :  { %v8013_v17 = vpop.eup %8012 }
0x1f98   :  { %v8015_v52 = vpop.eup %8014  ;;  %v5722_v53 = vsel %vm609_vm4, %v8013_v17, 0.0 }
0x1f99   :  { %5723 = vadd.xlane.f32.xlu1 %v5722_v53  ;;  %v5719_v54 = vsel %vm609_vm4, %v8015_v52, 0.0 }
0x1f9a   :  { %5720 = vadd.xlane.f32.xlu0 %v5719_v54 }
0x2022   :  { %v5718_v57 = vpop.xlane.xlu1 %5717 }
0x2023   :  { %8016 = vrcp.f32 %v5718_v57  ;;  %v5715_v60 = vpop.xlane.xlu0 %5714 }
0x2024   :  { %8018 = vrcp.f32 %v5715_v60 }
0x2026   :  { %v5724_v13 = vpop.xlane.xlu1 %5723 }
0x2027   :  { %8020 = vrcp.f32 %v5724_v13  ;;  %v5721_v12 = vpop.xlane.xlu0 %5720 }
0x2028   :  { %8022 = vrcp.f32 %v5721_v12 }
0x202d   :  { %v8017_v58 = vpop.eup %8016 }
0x202e   :  { %v8019_v16 = vpop.eup %8018  ;;  %v5728_v19 = vmul.f32 %v8017_v58, %v8009_v50 }
0x202f   :  { %v5726_v18 = vmul.f32 %v8019_v16, %v8011_v51 }
0x2031   :  { %v8021_v62 = vpop.eup %8020  ;;  %7573 = vmatprep.mubr.msk.f32.mxu0 %vm609_vm4, %v5726_v18 }
0x2032   :  { %v8023_v63 = vpop.eup %8022  ;;  %7574 = vmatmul.mubr.msk.f32.vlgmr.msra.gmra.mrb[92].mxu0 %vm609_vm4, %v5728_v19  ;;  %v5732_v0 = vmul.f32 %v8021_v62, %v8013_v17 }
0x2033   :  { %v5730_v59 = vmul.f32 %v8023_v63, %v8015_v52  ;;  %7584 = vmatpush3.bf16.msra.mxu0 %v5906_v2  ;;  %v6806_v2 = vld [vmem:[%s9058_s6 + $0x9] ss:$0 sm:$0xff] }
0x2035   :  { %7580 = vmatprep.mubr.msk.f32.mxu1 %vm609_vm4, %v5730_v59 }
0x2036   :  { %7581 = vmatmul.mubr.msk.f32.vlgmr.msra.gmra.mrb[84].mxu1 %vm609_vm4, %v5732_v0 }
0x2037   :  { %7590 = vmatpush3.bf16.msra.mxu1 %v7858_v44 }
0x2038   :  { %7591 = vmatprep.subr.bf16.mxu1 %v7859_v45 }
0x203b   :  { %7592 = vmatpush3.bf16.msra.mxu1 %v7859_v45 }
0x2105   :  { %v7575_v3 = vpop.f32.mrb[92].mxu0 }
0x2106   :  { %v5805_v4 = vpop.f32.mrb[93].mxu0 }
0x2107   :  { %v5895_v5 = vpack.c.bf16 %v7575_v3, %v5805_v4 }
0x2109   :  { %v7582_v6 = vpop.f32.mrb[84].mxu1  ;;  %7585 = vmatprep.mubr.msk.bf16.mxu0 %vm50_vm1, %v5895_v5 }
0x210a   :  { %v5886_v7 = vpop.f32.mrb[85].mxu1 }
0x210b   :  { %v5896_v8 = vpack.c.bf16 %v7582_v6, %v5886_v7 }
0x210d   :  { %7586 = vmatmul.mubr.msk.bf16.vlgmr.msra.gmra.mrb[76].mxu0 %vm50_vm1, %v5896_v8 }
0x21e0   :  { %v7587_v10 = vpop.f32.mrb[76].mxu0 }
0x21e1   :  { %v5963_v11 = vadd.f32 %v7587_v10, %v8577_v20  ;;  %v5942_v61 = vpop.f32.mrb[77].mxu0  ;;  %v6807_v10 = vld [vmem:[%s9058_s6 + $0xa] ss:$0 sm:$0xff] }
0x21e2   :  { %v5961_v21 = vadd.f32 %v5942_v61, %v8581_v55  ;;  %v7588_v23 = vpop.f32.mrb[78].mxu0 }
0x21e3   :  { %v8932_v22 = vadd.f32 %v6805_v9, %v5963_v11  ;;  %v5964_v26 = vadd.f32 %v7588_v23, %v8583_v56  ;;  %v5945_v29 = vpop.f32.mrb[79].mxu0 }
0x21e4   :  { %v5962_v30 = vadd.f32 %v5945_v29, %v8587_v48  ;;  %v8936_v31 = vadd.f32 %v6805_v9, %v5961_v21 }
0x21e5   :  { %v8938_v37 = vadd.f32 %v6805_v9, %v5964_v26  ;;  %v5981_v40 = vsel %vm121_vm2, %v8932_v22, 0.0  ;;  %v5993_v24 = vmul.f32 %v8932_v22, %v8932_v22 }
0x21e6   :  { %5982 = vadd.xlane.f32.xlu0 %v5981_v40  ;;  %v8942_v20 = vadd.f32 %v6805_v9, %v5962_v30  ;;  %v5975_v56 = vsel %vm121_vm2, %v8936_v31, 0.0  ;;  %v5991_v48 = vmul.f32 %v8936_v31, %v8936_v31 }
0x21e7   :  { %v5984_v55 = vsel %vm121_vm2, %v8938_v37, 0.0  ;;  %v5994_v33 = vmul.f32 %v8938_v37, %v8938_v37  ;;  %v6001_v42 = vsel %vm121_vm2, %v5993_v24, 0.0  ;;  %v7861_v24 = vld [vmem:[%s9061_s8 + $0x38] sm:$0xff]  }
0x21e8   :  { %5985 = vadd.xlane.f32.xlu1 %v5984_v55  ;;  %v5978_v41 = vsel %vm121_vm2, %v8942_v20, 0.0  ;;  %v5992_v38 = vmul.f32 %v8942_v20, %v8942_v20  ;;  %v5995_v32 = vsel %vm121_vm2, %v5991_v48, 0.0 }
0x21e9   :  { %v6004_v43 = vsel %vm121_vm2, %v5994_v33, 0.0 }
0x21ea   :  { %5976 = vadd.xlane.f32.xlu0 %v5975_v56  ;;  %v5998_v46 = vsel %vm121_vm2, %v5992_v38, 0.0 }
0x21ec   :  { %5979 = vadd.xlane.f32.xlu1 %v5978_v41 }
0x21ee   :  { %5996 = vadd.xlane.f32.xlu0 %v5995_v32  ;;  %v7860_v32 = vld [vmem:[%s9061_s8 + $0x30] sm:$0xff]  }
0x21ef   :  { %7597 = vmatprep.subr.bf16.mxu0 %v7860_v32 }
0x21f0   :  { %5999 = vadd.xlane.f32.xlu1 %v5998_v46  ;;  %7598 = vmatpush3.bf16.xpose.msra.mxu0 %v7860_v32  ;;  %v6813_v46 = vld [vmem:[%s9062_s7 + $0x1] ss:$0 sm:$0xff] }
0x21f1   :  { %7599 = vmatprep.subr.bf16.mxu0 %v7861_v24 }
0x21f2   :  { %6002 = vadd.xlane.f32.xlu0 %v6001_v42 }
0x21f4   :  { %6005 = vadd.xlane.f32.xlu1 %v6004_v43 }
0x21f8   :  { %7600 = vmatpush3.bf16.xpose.msra.mxu0 %v7861_v24 }
0x2273   :  { %v5983_v34 = vpop.xlane.xlu0 %5982 }
0x2274   :  { %v5989_v39 = vmul.f32 0.03125, %v5983_v34 }
0x2275   :  { %v5986_v35 = vpop.xlane.xlu1 %5985 }
0x2276   :  { %v5990_v51 = vmul.f32 0.03125, %v5986_v35  ;;  %v6013_v54 = vmul.f32 %v5989_v39, %v5989_v39  ;;  %v6021_v6 = vsub.f32 %v8932_v22, %v5989_v39 }
0x2277   :  { %v5977_v36 = vpop.xlane.xlu0 %5976 }
0x2278   :  { %v5987_v47 = vmul.f32 0.03125, %v5977_v36  ;;  %v6014_v12 = vmul.f32 %v5990_v51, %v5990_v51  ;;  %v6022_v11 = vsub.f32 %v8938_v37, %v5990_v51 }
0x2279   :  { %v5980_v28 = vpop.xlane.xlu1 %5979 }
0x227a   :  { %v5988_v25 = vmul.f32 0.03125, %v5980_v28  ;;  %v6011_v49 = vmul.f32 %v5987_v47, %v5987_v47  ;;  %v6019_v0 = vsub.f32 %v8936_v31, %v5987_v47 }
0x227b   :  { %v5997_v27 = vpop.xlane.xlu0 %5996 }
0x227c   :  { %v6007_v50 = vmul.f32 0.03125, %v5997_v27  ;;  %v6012_v15 = vmul.f32 %v5988_v25, %v5988_v25  ;;  %v6020_v3 = vsub.f32 %v8942_v20, %v5988_v25 }
0x227d   :  { %v6000_v14 = vpop.xlane.xlu1 %5999 }
0x227e   :  { %v6015_v17 = vsub.f32 %v6007_v50, %v6011_v49  ;;  %v6008_v52 = vmul.f32 0.03125, %v6000_v14 }
0x227f   :  { %v6003_v53 = vpop.xlane.xlu0 %6002 }
0x2280   :  { %v6023_v57 = vadd.f32 1e-05, %v6015_v17  ;;  %v6016_v60 = vsub.f32 %v6008_v52, %v6012_v15  ;;  %v6009_v13 = vmul.f32 0.03125, %v6003_v53 }
0x2281   :  { %v6006_v58 = vpop.xlane.xlu1 %6005 }
0x2282   :  { %8024 = vrsqrt.f32 %v6023_v57  ;;  %v6024_v16 = vadd.f32 1e-05, %v6016_v60  ;;  %v6017_v18 = vsub.f32 %v6009_v13, %v6013_v54  ;;  %v6010_v19 = vmul.f32 0.03125, %v6006_v58 }
0x2284   :  { %8026 = vrsqrt.f32 %v6024_v16  ;;  %v6025_v62 = vadd.f32 1e-05, %v6017_v18  ;;  %v6018_v63 = vsub.f32 %v6010_v19, %v6014_v12 }
0x2286   :  { %8028 = vrsqrt.f32 %v6025_v62  ;;  %v6026_v59 = vadd.f32 1e-05, %v6018_v63 }
0x2288   :  { %8030 = vrsqrt.f32 %v6026_v59 }
0x228c   :  { %v8025_v1 = vpop.eup %8024 }
0x228d   :  { %v6031_v4 = vmul.f32 %v8025_v1, %v6019_v0 }
0x228e   :  { %v8027_v5 = vpop.eup %8026 }
0x228f   :  { %v6032_v7 = vmul.f32 %v8027_v5, %v6020_v3  ;;  %v6041_v8 = vmul.f32 %v6806_v2, %v6031_v4 }
0x2290   :  { %v8029_v9 = vpop.eup %8028 }
0x2291   :  { %v6033_v61 = vmul.f32 %v8029_v9, %v6021_v6  ;;  %v6042_v21 = vmul.f32 %v6806_v2, %v6032_v7  ;;  %v6051_v29 = vadd.f32 %v6807_v10, %v6041_v8 }
0x2292   :  { %v8031_v23 = vpop.eup %8030 }
0x2293   :  { %v6034_v26 = vmul.f32 %v8031_v23, %v6022_v11  ;;  %v6052_v30 = vadd.f32 %v6807_v10, %v6042_v21  ;;  %v6043_v40 = vmul.f32 %v6806_v2, %v6033_v61  ;;  %v6824_v21 = vld [vmem:[%s9058_s6 + $0xb] ss:$0 sm:$0xff] }
0x2295   :  { %v6055_v55 = vpack.c.bf16 %v6052_v30, %v6051_v29  ;;  %v6044_v56 = vmul.f32 %v6806_v2, %v6034_v26  ;;  %v6053_v48 = vadd.f32 %v6807_v10, %v6043_v40 }
0x2297   :  { %7593 = vmatprep.mubr.msk.bf16.mxu1 %vm121_vm2, %v6055_v55  ;;  %v6054_v41 = vadd.f32 %v6807_v10, %v6044_v56 }
0x2299   :  { %v6056_v38 = vpack.c.bf16 %v6054_v41, %v6053_v48 }
0x229b   :  { %7594 = vmatmul.mubr.msk.bf16.vlgmr.msra.gmra.mrb[88].mxu1 %vm121_vm2, %v6056_v38 }
0x236e   :  { %v7595_v33 = vpop.f32.mrb[88].mxu1 }
0x236f   :  { %v6131_v42 = vadd.f32 %v7595_v33, %v6813_v46  ;;  %v6122_v43 = vpop.f32.mrb[89].mxu1 }
0x2370   :  { %v6123_v44 = vadd.f32 %v6813_v46, %v6122_v43  ;;  %v7596_v45 = vpop.f32.mrb[90].mxu1 }
0x2371   :  { %v6139_v34 = vmul.f32 %v6131_v42, %v6131_v42  ;;  %v6134_v35 = vadd.f32 %v7596_v45, %v6813_v46  ;;  %v6125_v36 = vpop.f32.mrb[91].mxu1 }
0x2372   :  { %v6137_v47 = vmul.f32 %v6123_v44, %v6123_v44  ;;  %v6126_v28 = vadd.f32 %v6813_v46, %v6125_v36  ;;  %v7862_v36 = vld [vmem:[%s9063_s10] sm:$0xff]  }
0x2373   :  { %v6143_v25 = vmul.f32 %v6139_v34, %v6131_v42  ;;  %v6140_v27 = vmul.f32 %v6134_v35, %v6134_v35  ;;  %7605 = vmatprep.subr.bf16.mxu1 %v7862_v36 }
0x2374   :  { %v6141_v39 = vmul.f32 %v6137_v47, %v6123_v44  ;;  %v6138_v49 = vmul.f32 %v6126_v28, %v6126_v28  ;;  %v7863_v47 = vld [vmem:[%s9063_s10 + $0x8] sm:$0xff]   ;;  %7606 = vmatpush3.bf16.msra.mxu1 %v7862_v36 }
0x2375   :  { %v6147_v50 = vmul.f32 0.044715, %v6143_v25  ;;  %v6144_v51 = vmul.f32 %v6140_v27, %v6134_v35  ;;  %7607 = vmatprep.subr.bf16.mxu1 %v7863_v47 }
0x2376   :  { %v6145_v14 = vmul.f32 0.044715, %v6141_v39  ;;  %v6142_v15 = vmul.f32 %v6138_v49, %v6126_v28 }
0x2377   :  { %v6151_v17 = vadd.f32 %v6147_v50, %v6131_v42  ;;  %v6148_v52 = vmul.f32 0.044715, %v6144_v51 }
0x2378   :  { %v6149_v53 = vadd.f32 %v6145_v14, %v6123_v44  ;;  %v6146_v54 = vmul.f32 0.044715, %v6142_v15  ;;  %7608 = vmatpush3.bf16.msra.mxu1 %v7863_v47 }
0x2379   :  { %v6155_v57 = vmul.f32 0.7978846, %v6151_v17  ;;  %v6152_v60 = vadd.f32 %v6148_v52, %v6134_v35 }
0x237a   :  { %v6153_v13 = vmul.f32 0.7978846, %v6149_v53  ;;  %v6150_v12 = vadd.f32 %v6146_v54, %v6126_v28 }
0x237b   :  { %8032 = vtanh.f32 %v6155_v57  ;;  %v6156_v58 = vmul.f32 0.7978846, %v6152_v60 }
0x237c   :  { %8034 = vtanh.f32 %v6153_v13  ;;  %v6154_v16 = vmul.f32 0.7978846, %v6150_v12 }
0x237d   :  { %8036 = vtanh.f32 %v6156_v58 }
0x237e   :  { %8038 = vtanh.f32 %v6154_v16 }
0x2385   :  { %v8033_v18 = vpop.eup %8032 }
0x2386   :  { %v8035_v19 = vpop.eup %8034  ;;  %v6163_v62 = vadd.f32 1.0, %v8033_v18 }
0x2387   :  { %v8037_v63 = vpop.eup %8036  ;;  %v6161_v59 = vadd.f32 1.0, %v8035_v19 }
0x2388   :  { %v8039_v0 = vpop.eup %8038  ;;  %v6167_v1 = vmul.f32 0.5, %v6163_v62  ;;  %v6164_v2 = vadd.f32 1.0, %v8037_v63 }
0x2389   :  { %v6162_v3 = vadd.f32 1.0, %v8039_v0  ;;  %v6165_v4 = vmul.f32 0.5, %v6161_v59 }
0x238a   :  { %v6168_v5 = vmul.f32 0.5, %v6164_v2  ;;  %v6171_v7 = vmul.f32 %v6167_v1, %v6131_v42 }
0x238b   :  { %v6166_v6 = vmul.f32 0.5, %v6162_v3  ;;  %v6169_v9 = vmul.f32 %v6165_v4, %v6123_v44 }
0x238c   :  { %v6172_v8 = vmul.f32 %v6168_v5, %v6134_v35 }
0x238d   :  { %v6170_v10 = vmul.f32 %v6166_v6, %v6126_v28  ;;  %v6826_v6 = vld [vmem:[%s9064_s9] ss:$0 sm:$0xff] }
0x238e   :  { %v6174_v11 = vpack.c.bf16 %v6172_v8, %v6171_v7 }
0x238f   :  { %v6173_v61 = vpack.c.bf16 %v6170_v10, %v6169_v9 }
0x2391   :  { %7601 = vmatprep.mubr.bf16.mxu0 %v6173_v61 }
0x2392   :  { %7602 = vmatmul.mubr.bf16.vlgmr.msra.gmra.mrb[96].mxu0 %v6174_v11 }
0x2465   :  { %v7603_v23 = vpop.f32.mrb[96].mxu0 }
0x2466   :  { %v6243_v26 = vadd.f32 %v7603_v23, %v8932_v22  ;;  %v6226_v29 = vpop.f32.mrb[97].mxu0  ;;  %v6827_v23 = vld [vmem:[%s9064_s9 + $0x1] ss:$0 sm:$0xff] }
0x2467   :  { %v6241_v30 = vadd.f32 %v6226_v29, %v8936_v31  ;;  %v7604_v40 = vpop.f32.mrb[98].mxu0 }
0x2468   :  { %v8994_v55 = vadd.f32 %v6824_v21, %v6243_v26  ;;  %v6244_v56 = vadd.f32 %v7604_v40, %v8938_v37  ;;  %v6229_v48 = vpop.f32.mrb[99].mxu0 }
0x2469   :  { %v6242_v41 = vadd.f32 %v6229_v48, %v8942_v20  ;;  %v8998_v38 = vadd.f32 %v6824_v21, %v6241_v30 }
0x246a   :  { %v9000_v32 = vadd.f32 %v6824_v21, %v6244_v56  ;;  %v6264_v24 = vsel %vm121_vm2, %v8994_v55, 0.0  ;;  %v6276_v43 = vmul.f32 %v8994_v55, %v8994_v55 }
0x246b   :  { %6265 = vadd.xlane.f32.xlu0 %v6264_v24  ;;  %v9004_v22 = vadd.f32 %v6824_v21, %v6242_v41  ;;  %v6258_v37 = vsel %vm121_vm2, %v8998_v38, 0.0  ;;  %v6274_v20 = vmul.f32 %v8998_v38, %v8998_v38 }
0x246c   :  { %v6267_v31 = vsel %vm121_vm2, %v9000_v32, 0.0  ;;  %v6277_v45 = vmul.f32 %v9000_v32, %v9000_v32  ;;  %v6284_v34 = vsel %vm121_vm2, %v6276_v43, 0.0 }
0x246d   :  { %6268 = vadd.xlane.f32.xlu1 %v6267_v31  ;;  %v6261_v46 = vsel %vm121_vm2, %v9004_v22, 0.0  ;;  %v6275_v33 = vmul.f32 %v9004_v22, %v9004_v22  ;;  %v6278_v42 = vsel %vm121_vm2, %v6274_v20, 0.0 }
0x246e   :  { %v6287_v35 = vsel %vm121_vm2, %v6277_v45, 0.0 }
0x246f   :  { %6259 = vadd.xlane.f32.xlu0 %v6258_v37  ;;  %v6281_v44 = vsel %vm121_vm2, %v6275_v33, 0.0 }
0x2471   :  { %6262 = vadd.xlane.f32.xlu1 %v6261_v46 }
0x2473   :  { %6279 = vadd.xlane.f32.xlu0 %v6278_v42 }
0x2475   :  { %6282 = vadd.xlane.f32.xlu1 %v6281_v44 }
0x2477   :  { %6285 = vadd.xlane.f32.xlu0 %v6284_v34 }
0x2479   :  { %6288 = vadd.xlane.f32.xlu1 %v6287_v35 }
0x24f8   :  { %v6266_v28 = vpop.xlane.xlu0 %6265 }
0x24f9   :  { %v6272_v14 = vmul.f32 0.03125, %v6266_v28 }
0x24fa   :  { %v6269_v25 = vpop.xlane.xlu1 %6268 }
0x24fb   :  { %v6273_v52 = vmul.f32 0.03125, %v6269_v25  ;;  %v6296_v12 = vmul.f32 %v6272_v14, %v6272_v14  ;;  %v6304_v10 = vsub.f32 %v8994_v55, %v6272_v14 }
0x24fc   :  { %v6260_v27 = vpop.xlane.xlu0 %6259 }
0x24fd   :  { %v6270_v39 = vmul.f32 0.03125, %v6260_v27  ;;  %v6297_v19 = vmul.f32 %v6273_v52, %v6273_v52  ;;  %v6305_v26 = vsub.f32 %v9000_v32, %v6273_v52 }
0x24fe   :  { %v6263_v49 = vpop.xlane.xlu1 %6262 }
0x24ff   :  { %v6271_v50 = vmul.f32 0.03125, %v6263_v49  ;;  %v6294_v15 = vmul.f32 %v6270_v39, %v6270_v39  ;;  %v6302_v4 = vsub.f32 %v8998_v38, %v6270_v39 }
0x2500   :  { %v6280_v51 = vpop.xlane.xlu0 %6279 }
0x2501   :  { %v6290_v17 = vmul.f32 0.03125, %v6280_v51  ;;  %v6295_v54 = vmul.f32 %v6271_v50, %v6271_v50  ;;  %v6303_v7 = vsub.f32 %v9004_v22, %v6271_v50 }
0x2502   :  { %v6283_v53 = vpop.xlane.xlu1 %6282 }
0x2503   :  { %v6298_v57 = vsub.f32 %v6290_v17, %v6294_v15  ;;  %v6291_v60 = vmul.f32 0.03125, %v6283_v53 }
0x2504   :  { %v6286_v13 = vpop.xlane.xlu0 %6285 }
0x2505   :  { %v6306_v58 = vadd.f32 1e-05, %v6298_v57  ;;  %v6299_v16 = vsub.f32 %v6291_v60, %v6295_v54  ;;  %v6292_v18 = vmul.f32 0.03125, %v6286_v13 }
0x2506   :  { %v6289_v62 = vpop.xlane.xlu1 %6288 }
0x2507   :  { %8040 = vrsqrt.f32 %v6306_v58  ;;  %v6307_v63 = vadd.f32 1e-05, %v6299_v16  ;;  %v6300_v59 = vsub.f32 %v6292_v18, %v6296_v12  ;;  %v6293_v0 = vmul.f32 0.03125, %v6289_v62 }
0x2509   :  { %8042 = vrsqrt.f32 %v6307_v63  ;;  %v6308_v1 = vadd.f32 1e-05, %v6300_v59  ;;  %v6301_v2 = vsub.f32 %v6293_v0, %v6297_v19 }
0x250b   :  { %8044 = vrsqrt.f32 %v6308_v1  ;;  %v6309_v3 = vadd.f32 1e-05, %v6301_v2 }
0x250d   :  { %8046 = vrsqrt.f32 %v6309_v3 }
0x2511   :  { %v8041_v5 = vpop.eup %8040 }
0x2512   :  { %v6314_v8 = vmul.f32 %v8041_v5, %v6302_v4 }
0x2513   :  { %v8043_v9 = vpop.eup %8042 }
0x2514   :  { %v6315_v11 = vmul.f32 %v8043_v9, %v6303_v7  ;;  %v6324_v61 = vmul.f32 %v6826_v6, %v6314_v8 }
0x2515   :  { %v8045_v21 = vpop.eup %8044 }
0x2516   :  { %v6316_v29 = vmul.f32 %v8045_v21, %v6304_v10  ;;  %v6325_v30 = vmul.f32 %v6826_v6, %v6315_v11  ;;  %v6334_v48 = vadd.f32 %v6827_v23, %v6324_v61 }
0x2517   :  { %v8047_v40 = vpop.eup %8046 }
0x2518   :  { %v6317_v56 = vmul.f32 %v8047_v40, %v6305_v26  ;;  %v6335_v41 = vadd.f32 %v6827_v23, %v6325_v30  ;;  %v6326_v38 = vmul.f32 %v6826_v6, %v6316_v29 }
0x251a   :  { %v6338_v24 = vpack.c.bf16 %v6335_v41, %v6334_v48  ;;  %v6327_v22 = vmul.f32 %v6826_v6, %v6317_v56  ;;  %v6336_v55 = vadd.f32 %v6827_v23, %v6326_v38 }
0x251c   :  { %7609 = vmatprep.mubr.msk.bf16.mxu1 %vm121_vm2, %v6338_v24  ;;  %v6337_v31 = vadd.f32 %v6827_v23, %v6327_v22 }
0x251e   :  { %v6339_v37 = vpack.c.bf16 %v6337_v31, %v6336_v55 }
0x2520   :  { %7610 = vmatmul.mubr.msk.bf16.vlgmr.msra.gmra.mrb[92].mxu1 %vm121_vm2, %v6339_v37 }
0x25f3   :  { %v7611_v20 = vpop.f32.mrb[92].mxu1 }
0x25f4   :  { %6413 = vst [vmem:[%s9065_s11 + $0x10] sm:$0xff] %v7611_v20  ;;  %v6396_v32 = vpop.f32.mrb[93].mxu1 }
0x25f5   :  { %6411 = vst [vmem:[%s9065_s11] sm:$0xff] %v6396_v32  ;;  %v7612_v46 = vpop.f32.mrb[94].mxu1 }
0x25f6   :  { %6414 = vst [vmem:[%s9065_s11 + $0x18] sm:$0xff] %v7612_v46  ;;  %v6399_v33 = vpop.f32.mrb[95].mxu1 }
0x25f7   :  { %6412 = vst [vmem:[%s9065_s11 + $0x8] sm:$0xff] %v6399_v33 }

</bundles_post_ra>
